<compile_context>
chip_gen: v7x
topology: tpu7x:2x2x1
jax: 0.10.0
libtpu: 0.0.40
codegen_flags: <defaults>
</compile_context>

<pallas_src>
import numpy as np
import jax
import jax.numpy as jnp
from jax.experimental import pallas as pl
from jax.experimental.pallas import tpu as pltpu

NEG = -1e9  # logit value for padded vocab lanes (never sampled, sliced off later)


# ----------------------------- dummy tokenizer -------------------------------
class DummyTokenizer:
    def __init__(self, n_tokens, start_id=1):
        self.n_tokens = n_tokens
        self.start = "^"
        self.char_to_int = {self.start: start_id}


# ------------------------------ Pallas kernel --------------------------------
def make_decoder_kernel(num_layers, n_steps, batch, vocab_pad, tf_steps):
    """tf_steps: python list of bools (teacher-forcing decision per step, drawn
    host-side from np.random.RandomState(1988) compared against `temperature`,
    exactly like the PyTorch module)."""
    B = batch
    Vp = vocab_pad
    # step i's input token is statically known iff i == 0 (start token) or the
    # previous step was teacher forced.
    known_input = [True] + [bool(t) for t in tf_steps[:n_steps - 1]]
    any_sample = not all(known_input)

    def kernel(*refs):
        it = iter(refs)
        emb_tf  = next(it)   # [S*B, E]  embeddings of the teacher-forcing input stream
        de_ref  = next(it)   # [B, In]   cat(z, condition)
        i2h_w   = next(it)   # [In, H]
        i2h_b   = next(it)   # [1, H]
        emb_w   = next(it)   # [Vp, E]   (only needed on sampled steps)

        layers = []
        for l in range(num_layers):
            Wx = tuple(next(it) for _ in range(3))                       # [E,H] / [H,H]
            Wd = tuple(next(it) for _ in range(3)) if l == 0 else None   # [In,H]
            U  = tuple(next(it) for _ in range(3))                       # [H,H]
            b_r, b_z, b_in, b_hn = (next(it) for _ in range(4))          # [1,H]
            layers.append((Wx, Wd, U, b_r, b_z, b_in, b_hn))

        wout_h  = next(it)   # [H, Vp]
        wout_de = next(it)   # [In, Vp]
        bout    = next(it)   # [1, Vp]   (pad lanes = NEG)
        out_ref = next(it)   # [S, B, Vp]
        gix_r_s = next(it)   # VMEM scratch [S*B, H]: batched TF input->hidden, r gate
        gix_z_s = next(it)   # [S*B, H]                                    z gate
        gix_n_s = next(it)   # [S*B, H]                                    n gate

        f32 = jnp.float32
        de = de_ref[...]                                                  # [B, In]

        # ---------- loop-invariant work, hoisted out of the recurrence ----------
        h0 = jnp.dot(de, i2h_w[...], preferred_element_type=f32) + i2h_b[...]
        h = [h0 for _ in range(num_layers)]

        Wx0, Wd0, U0, b0_r, b0_z, b0_in, b0_hn = layers[0]
        # decode-embed contribution to layer-0 input gates (gate biases folded in)
        gid_r = jnp.dot(de, Wd0[0][...], preferred_element_type=f32) + b0_r[...]
        gid_z = jnp.dot(de, Wd0[1][...], preferred_element_type=f32) + b0_z[...]
        gid_n = jnp.dot(de, Wd0[2][...], preferred_element_type=f32) + b0_in[...]
        # decode-embed contribution to the output head (bias folded in)
        out_de = jnp.dot(de, wout_de[...], preferred_element_type=f32) + bout[...]

        # all teacher-forced input->hidden projections as one batched matmul / gate
        emb_all = emb_tf[...]                                             # [S*B, E]
        gix_r_s[...] = jnp.dot(emb_all, Wx0[0][...], preferred_element_type=f32)
        gix_z_s[...] = jnp.dot(emb_all, Wx0[1][...], preferred_element_type=f32)
        gix_n_s[...] = jnp.dot(emb_all, Wx0[2][...], preferred_element_type=f32)

        if any_sample:
            pltpu.prng_seed(1988)
            iota_v = jax.lax.broadcasted_iota(jnp.int32, (B, Vp), 1)      # hoisted

        cur_emb = None   # runtime embedding, only defined after a sampled step

        # Sequential GRU recurrence (statically unrolled; S is small here).
        # TODO(synk): for long sequences carry (h, cur_emb) through a lax.fori_loop
        #             or put S on a grid axis to bound vreg live ranges / pipeline DMA.
        for i in range(n_steps):
            for l in range(num_layers):
                Wx, Wd, U, b_r, b_z, b_in, b_hn = layers[l]
                # issue the per-layer MXU dots back-to-back before any gate math
                if l == 0:
                    if known_input[i]:
                        gi_r = gix_r_s[i * B:(i + 1) * B, :]
                        gi_z = gix_z_s[i * B:(i + 1) * B, :]
                        gi_n = gix_n_s[i * B:(i + 1) * B, :]
                    else:
                        gi_r = jnp.dot(cur_emb, Wx[0][...], preferred_element_type=f32)
                        gi_z = jnp.dot(cur_emb, Wx[1][...], preferred_element_type=f32)
                        gi_n = jnp.dot(cur_emb, Wx[2][...], preferred_element_type=f32)
                    gh_r = jnp.dot(h[l], U[0][...], preferred_element_type=f32)
                    gh_z = jnp.dot(h[l], U[1][...], preferred_element_type=f32)
                    gh_n = jnp.dot(h[l], U[2][...], preferred_element_type=f32)
                    gi_r = gi_r + gid_r
                    gi_z = gi_z + gid_z
                    gi_n = gi_n + gid_n
                else:
                    x = h[l - 1]
                    gi_r = jnp.dot(x, Wx[0][...], preferred_element_type=f32)
                    gi_z = jnp.dot(x, Wx[1][...], preferred_element_type=f32)
                    gi_n = jnp.dot(x, Wx[2][...], preferred_element_type=f32)
                    gh_r = jnp.dot(h[l], U[0][...], preferred_element_type=f32)
                    gh_z = jnp.dot(h[l], U[1][...], preferred_element_type=f32)
                    gh_n = jnp.dot(h[l], U[2][...], preferred_element_type=f32)
                    gi_r = gi_r + b_r[...]
                    gi_z = gi_z + b_z[...]
                    gi_n = gi_n + b_in[...]
                gh_n = gh_n + b_hn[...]
                r  = jax.nn.sigmoid(gi_r + gh_r)
                zg = jax.nn.sigmoid(gi_z + gh_z)
                n  = jnp.tanh(gi_n + r * gh_n)
                h[l] = (1.0 - zg) * n + zg * h[l]

            # lane-dense [B, 128] store (vocab padded; wrapper slices the padding off)
            logits = jnp.dot(h[num_layers - 1], wout_h[...],
                             preferred_element_type=f32) + out_de        # [B, Vp]
            out_ref[i] = logits

            # next-step embedding when this step's decision was "sample"
            if i < n_steps - 1 and not tf_steps[i]:
                # torch.multinomial(exp(logits)) == categorical(softmax(logits));
                # sampled via Gumbel-max with the TPU PRNG.
                # TODO(synk): not bit-identical to torch.multinomial's RNG stream.
                bits = pltpu.bitcast(pltpu.prng_random_bits((B, Vp)), jnp.uint32)
                u = pltpu.bitcast((bits >> 9) | jnp.uint32(0x3F800000), jnp.float32) - 1.0
                g = -jnp.log(-jnp.log(u + 1e-9) + 1e-9)
                pert = logits + g                    # pad lanes stay ~NEG: never chosen
                m = jnp.max(pert, axis=1, keepdims=True)
                cand = jnp.where(pert == m, iota_v, Vp)
                sel = jnp.min(cand, axis=1, keepdims=True)
                onehot = (iota_v == sel).astype(f32)
                cur_emb = jnp.dot(onehot, emb_w[...], preferred_element_type=f32)  # [B, E]

    return kernel


# ------------------------------ python wrapper --------------------------------
def _split_gates(w, H):
    return w[:, 0:H], w[:, H:2 * H], w[:, 2 * H:3 * H]


def _pad_last(x, width, fill=0.0):
    pad = width - x.shape[-1]
    if pad <= 0:
        return x
    return jnp.concatenate(
        [x, jnp.full(x.shape[:-1] + (pad,), fill, x.dtype)], axis=-1)


def decoder_forward(params, inputs, z, condition, temperature, *,
                    tokenizer, num_layers, hidden_size):
    B, S = inputs.shape
    V, E = params["emb"].shape
    H = hidden_size
    Vp = max(128, ((V + 127) // 128) * 128)           # lane-dense logits width
    start_id = tokenizer.char_to_int[tokenizer.start]

    de = jnp.concatenate([z, condition], axis=1).astype(jnp.float32)      # [B, In]

    # teacher-forcing decisions: host-side numpy RandomState(1988), like torch
    rs = np.random.RandomState(1988)
    tf_steps = [bool(rs.rand() < temperature) for _ in range(S)]

    # teacher-forcing input-token stream (step-major) and its embeddings
    tok = jnp.concatenate(
        [jnp.full((B, 1), start_id, jnp.int32), inputs[:, :S - 1].astype(jnp.int32)],
        axis=1)                                                           # [B, S]
    emb_tf = jnp.take(params["emb"], tok.T.reshape(-1), axis=0)          # [S*B, E]
    emb_tf = emb_tf.astype(jnp.float32)

    # embedding table padded to Vp rows (only read on sampled steps)
    emb_pad = jnp.concatenate(
        [params["emb"], jnp.zeros((Vp - V, E), jnp.float32)], axis=0)     # [Vp, E]

    # output head: split off the decode-embed rows, pad vocab lanes to Vp
    wout_h  = _pad_last(params["wout"][:H, :], Vp, 0.0)                   # [H, Vp]
    wout_de = _pad_last(params["wout"][H:, :], Vp, 0.0)                   # [In, Vp]
    bout    = _pad_last(params["bout"], Vp, NEG)                          # [1, Vp]

    args = [emb_tf, de, params["i2h_w"], params["i2h_b"], emb_pad]
    for l in range(num_layers):
        wih = params[f"wih{l}"]
        whh = params[f"whh{l}"]
        bih_r, bih_z, bih_n = _split_gates(params[f"bih{l}"], H)
        bhh_r, bhh_z, bhh_n = _split_gates(params[f"bhh{l}"], H)
        if l == 0:
            args += list(_split_gates(wih[:E, :], H))    # input-token part
            args += list(_split_gates(wih[E:, :], H))    # decode-embed part
        else:
            args += list(_split_gates(wih, H))
        args += list(_split_gates(whh, H))
        # r/z biases merged (bih+bhh); n-gate biases kept separate (r * (h@U_n + b_hn))
        args += [bih_r + bhh_r, bih_z + bhh_z, bih_n, bhh_n]
    args += [wout_h, wout_de, bout]

    kernel = make_decoder_kernel(num_layers, S, B, Vp, tf_steps)
    out = pl.pallas_call(
        kernel,
        out_shape=jax.ShapeDtypeStruct((S, B, Vp), jnp.float32),
        in_specs=[pl.BlockSpec(memory_space=pltpu.MemorySpace.VMEM)] * len(args),
        out_specs=pl.BlockSpec(memory_space=pltpu.MemorySpace.VMEM),
        scratch_shapes=[pltpu.VMEM((S * B, H), jnp.float32) for _ in range(3)],
    )(*args)
    return out.transpose(1, 0, 2)[:, :, :V]             # [B, S, V] (PyTorch convention)


# ------------------------------ pure-JAX reference ----------------------------
def reference_forward(params, inputs, z, condition, temperature, *,
                      tokenizer, num_layers, hidden_size):
    B, S = inputs.shape
    V = params["emb"].shape[0]
    H = hidden_size
    start_id = tokenizer.char_to_int[tokenizer.start]
    hi = jax.lax.Precision.HIGHEST

    de = jnp.concatenate([z, condition], axis=1).astype(jnp.float32)
    h = [jnp.dot(de, params["i2h_w"], precision=hi) + params["i2h_b"][0]
         for _ in range(num_layers)]
    cur = jax.nn.one_hot(jnp.full((B,), start_id, jnp.int32), V, dtype=jnp.float32)

    rs = np.random.RandomState(1988)
    outs = []
    for i in range(S):
        emb = jnp.dot(cur, params["emb"], precision=hi)
        x = jnp.concatenate([emb, de], axis=1)
        for l in range(num_layers):
            gi = jnp.dot(x, params[f"wih{l}"], precision=hi) + params[f"bih{l}"][0]
            gh = jnp.dot(h[l], params[f"whh{l}"], precision=hi) + params[f"bhh{l}"][0]
            r = jax.nn.sigmoid(gi[:, :H] + gh[:, :H])
            zg = jax.nn.sigmoid(gi[:, H:2 * H] + gh[:, H:2 * H])
            n = jnp.tanh(gi[:, 2 * H:] + r * gh[:, 2 * H:])
            h[l] = (1.0 - zg) * n + zg * h[l]
            x = h[l]
        logits = jnp.dot(jnp.concatenate([x, de], axis=1), params["wout"],
                         precision=hi) + params["bout"][0]
        outs.append(logits)
        if rs.rand() < temperature:
            cur = jax.nn.one_hot(inputs[:, i], V, dtype=jnp.float32)
        # (non-TF branch not needed in the reference check; demo uses temperature=1.0)
    return jnp.stack(outs, axis=1)


# ------------------------------ parameter init --------------------------------
def init_params(key, vocab_size, emb_size, hidden_size, num_layers, input_size):
    H = hidden_size
    ks = iter(jax.random.split(key, 6 + 4 * num_layers))
    p = {}
    p["emb"]   = 0.1 * jax.random.normal(next(ks), (vocab_size, emb_size), jnp.float32)
    p["i2h_w"] = 0.1 * jax.random.normal(next(ks), (input_size, H), jnp.float32)
    p["i2h_b"] = 0.1 * jax.random.normal(next(ks), (1, H), jnp.float32)
    for l in range(num_layers):
        in_l = (emb_size + input_size) if l == 0 else H
        p[f"wih{l}"] = 0.1 * jax.random.normal(next(ks), (in_l, 3 * H), jnp.float32)
        p[f"whh{l}"] = 0.1 * jax.random.normal(next(ks), (H, 3 * H), jnp.float32)
        p[f"bih{l}"] = 0.1 * jax.random.normal(next(ks), (1, 3 * H), jnp.float32)
        p[f"bhh{l}"] = 0.1 * jax.random.normal(next(ks), (1, 3 * H), jnp.float32)
    p["wout"] = 0.1 * jax.random.normal(next(ks), (H + input_size, vocab_size), jnp.float32)
    p["bout"] = 0.1 * jax.random.normal(next(ks), (1, vocab_size), jnp.float32)
    return p


# ----------------------------------- main --------------------------------------
if __name__ == "__main__":
    # small shapes consistent with the module
    batch = 8
    seq_len = 8
    vocab_size = 32
    emb_size = 16
    hidden_size = 32
    num_layers = 2
    latent_size = 8
    condition_size = 8
    input_size = latent_size + condition_size
    temperature = 1.0   # all steps teacher-forced (rand() in [0,1) < 1.0), like torch

    tokenizer = DummyTokenizer(vocab_size, start_id=1)

    key = jax.random.PRNGKey(0)
    kp, ki, kz, kc = jax.random.split(key, 4)
    params = init_params(kp, vocab_size, emb_size, hidden_size, num_layers, input_size)

    inputs = jax.random.randint(ki, (batch, seq_len), 0, vocab_size, dtype=jnp.int32)
    z = jax.random.normal(kz, (batch, latent_size), jnp.float32)
    condition = jax.random.normal(kc, (batch, condition_size), jnp.float32)

    out = decoder_forward(params, inputs, z, condition, temperature,
                          tokenizer=tokenizer, num_layers=num_layers,
                          hidden_size=hidden_size)
    out = jax.block_until_ready(out)

    ref = reference_forward(params, inputs, z, condition, temperature,
                            tokenizer=tokenizer, num_layers=num_layers,
                            hidden_size=hidden_size)
    ref = jax.block_until_ready(ref)

    assert out.shape == (batch, seq_len, vocab_size), out.shape
    np.testing.assert_allclose(np.asarray(out), np.asarray(ref), rtol=2e-3, atol=2e-3)
    print("KERNEL_OK")
</pallas_src>

<mosaic_0001>
module attributes {stable_mosaic.version = 11 : i64} {
  func.func @kernel(%arg0: memref<64x16xf32, #tpu.memory_space<vmem>>, %arg1: memref<8x16xf32, #tpu.memory_space<vmem>>, %arg2: memref<16x32xf32, #tpu.memory_space<vmem>>, %arg3: memref<1x32xf32, #tpu.memory_space<vmem>>, %arg4: memref<128x16xf32, #tpu.memory_space<vmem>>, %arg5: memref<16x32xf32, #tpu.memory_space<vmem>>, %arg6: memref<16x32xf32, #tpu.memory_space<vmem>>, %arg7: memref<16x32xf32, #tpu.memory_space<vmem>>, %arg8: memref<16x32xf32, #tpu.memory_space<vmem>>, %arg9: memref<16x32xf32, #tpu.memory_space<vmem>>, %arg10: memref<16x32xf32, #tpu.memory_space<vmem>>, %arg11: memref<32x32xf32, #tpu.memory_space<vmem>>, %arg12: memref<32x32xf32, #tpu.memory_space<vmem>>, %arg13: memref<32x32xf32, #tpu.memory_space<vmem>>, %arg14: memref<1x32xf32, #tpu.memory_space<vmem>>, %arg15: memref<1x32xf32, #tpu.memory_space<vmem>>, %arg16: memref<1x32xf32, #tpu.memory_space<vmem>>, %arg17: memref<1x32xf32, #tpu.memory_space<vmem>>, %arg18: memref<32x32xf32, #tpu.memory_space<vmem>>, %arg19: memref<32x32xf32, #tpu.memory_space<vmem>>, %arg20: memref<32x32xf32, #tpu.memory_space<vmem>>, %arg21: memref<32x32xf32, #tpu.memory_space<vmem>>, %arg22: memref<32x32xf32, #tpu.memory_space<vmem>>, %arg23: memref<32x32xf32, #tpu.memory_space<vmem>>, %arg24: memref<1x32xf32, #tpu.memory_space<vmem>>, %arg25: memref<1x32xf32, #tpu.memory_space<vmem>>, %arg26: memref<1x32xf32, #tpu.memory_space<vmem>>, %arg27: memref<1x32xf32, #tpu.memory_space<vmem>>, %arg28: memref<32x128xf32, #tpu.memory_space<vmem>>, %arg29: memref<16x128xf32, #tpu.memory_space<vmem>>, %arg30: memref<1x128xf32, #tpu.memory_space<vmem>>, %arg31: memref<8x8x128xf32, #tpu.memory_space<vmem>>, %arg32: memref<64x32xf32, #tpu.memory_space<vmem>>, %arg33: memref<64x32xf32, #tpu.memory_space<vmem>>, %arg34: memref<64x32xf32, #tpu.memory_space<vmem>>) attributes {dimension_semantics = [], scalar_prefetch = 0 : i64, scratch_operands = 3 : i64, tpu.core_type = #tpu.core_type<tc>} {
    %c0 = arith.constant 0 : index
    %c0_0 = arith.constant 0 : index
    %0 = vector.load %arg1[%c0, %c0_0] : memref<8x16xf32, #tpu.memory_space<vmem>>, vector<8x16xf32>
    %c0_1 = arith.constant 0 : index
    %c0_2 = arith.constant 0 : index
    %1 = vector.load %arg2[%c0_1, %c0_2] : memref<16x32xf32, #tpu.memory_space<vmem>>, vector<16x32xf32>
    %cst = arith.constant dense<0.000000e+00> : vector<8x32xf32>
    %2 = tpu.matmul %0, %1, %cst {dimension_numbers = #tpu.dot_dimension_numbers<[1], [0], [0], [1], [0, 0, 1, 1], [], []>} : vector<8x16xf32>, vector<16x32xf32>, vector<8x32xf32> -> vector<8x32xf32>
    %c0_3 = arith.constant 0 : index
    %c0_4 = arith.constant 0 : index
    %3 = vector.load %arg3[%c0_3, %c0_4] : memref<1x32xf32, #tpu.memory_space<vmem>>, vector<1x32xf32>
    %4 = vector.broadcast %3 : vector<1x32xf32> to vector<8x32xf32>
    %5 = arith.addf %2, %4 : vector<8x32xf32>
    %c0_5 = arith.constant 0 : index
    %c0_6 = arith.constant 0 : index
    %6 = vector.load %arg8[%c0_5, %c0_6] : memref<16x32xf32, #tpu.memory_space<vmem>>, vector<16x32xf32>
    %cst_7 = arith.constant dense<0.000000e+00> : vector<8x32xf32>
    %7 = tpu.matmul %0, %6, %cst_7 {dimension_numbers = #tpu.dot_dimension_numbers<[1], [0], [0], [1], [0, 0, 1, 1], [], []>} : vector<8x16xf32>, vector<16x32xf32>, vector<8x32xf32> -> vector<8x32xf32>
    %c0_8 = arith.constant 0 : index
    %c0_9 = arith.constant 0 : index
    %8 = vector.load %arg14[%c0_8, %c0_9] : memref<1x32xf32, #tpu.memory_space<vmem>>, vector<1x32xf32>
    %9 = vector.broadcast %8 : vector<1x32xf32> to vector<8x32xf32>
    %10 = arith.addf %7, %9 : vector<8x32xf32>
    %c0_10 = arith.constant 0 : index
    %c0_11 = arith.constant 0 : index
    %11 = vector.load %arg9[%c0_10, %c0_11] : memref<16x32xf32, #tpu.memory_space<vmem>>, vector<16x32xf32>
    %cst_12 = arith.constant dense<0.000000e+00> : vector<8x32xf32>
    %12 = tpu.matmul %0, %11, %cst_12 {dimension_numbers = #tpu.dot_dimension_numbers<[1], [0], [0], [1], [0, 0, 1, 1], [], []>} : vector<8x16xf32>, vector<16x32xf32>, vector<8x32xf32> -> vector<8x32xf32>
    %c0_13 = arith.constant 0 : index
    %c0_14 = arith.constant 0 : index
    %13 = vector.load %arg15[%c0_13, %c0_14] : memref<1x32xf32, #tpu.memory_space<vmem>>, vector<1x32xf32>
    %14 = vector.broadcast %13 : vector<1x32xf32> to vector<8x32xf32>
    %15 = arith.addf %12, %14 : vector<8x32xf32>
    %c0_15 = arith.constant 0 : index
    %c0_16 = arith.constant 0 : index
    %16 = vector.load %arg10[%c0_15, %c0_16] : memref<16x32xf32, #tpu.memory_space<vmem>>, vector<16x32xf32>
    %cst_17 = arith.constant dense<0.000000e+00> : vector<8x32xf32>
    %17 = tpu.matmul %0, %16, %cst_17 {dimension_numbers = #tpu.dot_dimension_numbers<[1], [0], [0], [1], [0, 0, 1, 1], [], []>} : vector<8x16xf32>, vector<16x32xf32>, vector<8x32xf32> -> vector<8x32xf32>
    %c0_18 = arith.constant 0 : index
    %c0_19 = arith.constant 0 : index
    %18 = vector.load %arg16[%c0_18, %c0_19] : memref<1x32xf32, #tpu.memory_space<vmem>>, vector<1x32xf32>
    %19 = vector.broadcast %18 : vector<1x32xf32> to vector<8x32xf32>
    %20 = arith.addf %17, %19 : vector<8x32xf32>
    %c0_20 = arith.constant 0 : index
    %c0_21 = arith.constant 0 : index
    %21 = vector.load %arg29[%c0_20, %c0_21] : memref<16x128xf32, #tpu.memory_space<vmem>>, vector<16x128xf32>
    %cst_22 = arith.constant dense<0.000000e+00> : vector<8x128xf32>
    %22 = tpu.matmul %0, %21, %cst_22 {dimension_numbers = #tpu.dot_dimension_numbers<[1], [0], [0], [1], [0, 0, 1, 1], [], []>} : vector<8x16xf32>, vector<16x128xf32>, vector<8x128xf32> -> vector<8x128xf32>
    %c0_23 = arith.constant 0 : index
    %c0_24 = arith.constant 0 : index
    %23 = vector.load %arg30[%c0_23, %c0_24] : memref<1x128xf32, #tpu.memory_space<vmem>>, vector<1x128xf32>
    %24 = vector.broadcast %23 : vector<1x128xf32> to vector<8x128xf32>
    %25 = arith.addf %22, %24 : vector<8x128xf32>
    %c0_25 = arith.constant 0 : index
    %c0_26 = arith.constant 0 : index
    %26 = vector.load %arg0[%c0_25, %c0_26] : memref<64x16xf32, #tpu.memory_space<vmem>>, vector<64x16xf32>
    %c0_27 = arith.constant 0 : index
    %c0_28 = arith.constant 0 : index
    %27 = vector.load %arg5[%c0_27, %c0_28] : memref<16x32xf32, #tpu.memory_space<vmem>>, vector<16x32xf32>
    %cst_29 = arith.constant dense<0.000000e+00> : vector<64x32xf32>
    %28 = tpu.matmul %26, %27, %cst_29 {dimension_numbers = #tpu.dot_dimension_numbers<[1], [0], [0], [1], [0, 0, 1, 1], [], []>} : vector<64x16xf32>, vector<16x32xf32>, vector<64x32xf32> -> vector<64x32xf32>
    %c0_30 = arith.constant 0 : index
    %c0_31 = arith.constant 0 : index
    %29 = vector.load %arg32[%c0_30, %c0_31] : memref<64x32xf32, #tpu.memory_space<vmem>>, vector<64x32xf32>
    tpu.vector_store %arg32[%c0_30, %c0_31], %28 {strides = array<i32>} : memref<64x32xf32, #tpu.memory_space<vmem>>, vector<64x32xf32>,
    %c0_32 = arith.constant 0 : index
    %c0_33 = arith.constant 0 : index
    %30 = vector.load %arg6[%c0_32, %c0_33] : memref<16x32xf32, #tpu.memory_space<vmem>>, vector<16x32xf32>
    %cst_34 = arith.constant dense<0.000000e+00> : vector<64x32xf32>
    %31 = tpu.matmul %26, %30, %cst_34 {dimension_numbers = #tpu.dot_dimension_numbers<[1], [0], [0], [1], [0, 0, 1, 1], [], []>} : vector<64x16xf32>, vector<16x32xf32>, vector<64x32xf32> -> vector<64x32xf32>
    %c0_35 = arith.constant 0 : index
    %c0_36 = arith.constant 0 : index
    %32 = vector.load %arg33[%c0_35, %c0_36] : memref<64x32xf32, #tpu.memory_space<vmem>>, vector<64x32xf32>
    tpu.vector_store %arg33[%c0_35, %c0_36], %31 {strides = array<i32>} : memref<64x32xf32, #tpu.memory_space<vmem>>, vector<64x32xf32>,
    %c0_37 = arith.constant 0 : index
    %c0_38 = arith.constant 0 : index
    %33 = vector.load %arg7[%c0_37, %c0_38] : memref<16x32xf32, #tpu.memory_space<vmem>>, vector<16x32xf32>
    %cst_39 = arith.constant dense<0.000000e+00> : vector<64x32xf32>
    %34 = tpu.matmul %26, %33, %cst_39 {dimension_numbers = #tpu.dot_dimension_numbers<[1], [0], [0], [1], [0, 0, 1, 1], [], []>} : vector<64x16xf32>, vector<16x32xf32>, vector<64x32xf32> -> vector<64x32xf32>
    %c0_40 = arith.constant 0 : index
    %c0_41 = arith.constant 0 : index
    %35 = vector.load %arg34[%c0_40, %c0_41] : memref<64x32xf32, #tpu.memory_space<vmem>>, vector<64x32xf32>
    tpu.vector_store %arg34[%c0_40, %c0_41], %34 {strides = array<i32>} : memref<64x32xf32, #tpu.memory_space<vmem>>, vector<64x32xf32>,
    %c0_42 = arith.constant 0 : index
    %c0_43 = arith.constant 0 : index
    %36 = vector.load %arg32[%c0_42, %c0_43] : memref<64x32xf32, #tpu.memory_space<vmem>>, vector<8x32xf32>
    %c0_44 = arith.constant 0 : index
    %c0_45 = arith.constant 0 : index
    %37 = vector.load %arg33[%c0_44, %c0_45] : memref<64x32xf32, #tpu.memory_space<vmem>>, vector<8x32xf32>
    %c0_46 = arith.constant 0 : index
    %c0_47 = arith.constant 0 : index
    %38 = vector.load %arg34[%c0_46, %c0_47] : memref<64x32xf32, #tpu.memory_space<vmem>>, vector<8x32xf32>
    %c0_48 = arith.constant 0 : index
    %c0_49 = arith.constant 0 : index
    %39 = vector.load %arg11[%c0_48, %c0_49] : memref<32x32xf32, #tpu.memory_space<vmem>>, vector<32x32xf32>
    %cst_50 = arith.constant dense<0.000000e+00> : vector<8x32xf32>
    %40 = tpu.matmul %5, %39, %cst_50 {dimension_numbers = #tpu.dot_dimension_numbers<[1], [0], [0], [1], [0, 0, 1, 1], [], []>} : vector<8x32xf32>, vector<32x32xf32>, vector<8x32xf32> -> vector<8x32xf32>
    %c0_51 = arith.constant 0 : index
    %c0_52 = arith.constant 0 : index
    %41 = vector.load %arg12[%c0_51, %c0_52] : memref<32x32xf32, #tpu.memory_space<vmem>>, vector<32x32xf32>
    %cst_53 = arith.constant dense<0.000000e+00> : vector<8x32xf32>
    %42 = tpu.matmul %5, %41, %cst_53 {dimension_numbers = #tpu.dot_dimension_numbers<[1], [0], [0], [1], [0, 0, 1, 1], [], []>} : vector<8x32xf32>, vector<32x32xf32>, vector<8x32xf32> -> vector<8x32xf32>
    %c0_54 = arith.constant 0 : index
    %c0_55 = arith.constant 0 : index
    %43 = vector.load %arg13[%c0_54, %c0_55] : memref<32x32xf32, #tpu.memory_space<vmem>>, vector<32x32xf32>
    %cst_56 = arith.constant dense<0.000000e+00> : vector<8x32xf32>
    %44 = tpu.matmul %5, %43, %cst_56 {dimension_numbers = #tpu.dot_dimension_numbers<[1], [0], [0], [1], [0, 0, 1, 1], [], []>} : vector<8x32xf32>, vector<32x32xf32>, vector<8x32xf32> -> vector<8x32xf32>
    %45 = arith.addf %36, %10 : vector<8x32xf32>
    %46 = arith.addf %37, %15 : vector<8x32xf32>
    %47 = arith.addf %38, %20 : vector<8x32xf32>
    %c0_57 = arith.constant 0 : index
    %c0_58 = arith.constant 0 : index
    %48 = vector.load %arg17[%c0_57, %c0_58] : memref<1x32xf32, #tpu.memory_space<vmem>>, vector<1x32xf32>
    %49 = vector.broadcast %48 : vector<1x32xf32> to vector<8x32xf32>
    %50 = arith.addf %44, %49 : vector<8x32xf32>
    %51 = arith.addf %45, %40 : vector<8x32xf32>
    %52 = arith.negf %51 : vector<8x32xf32>
    %53 = math.exp %52 : vector<8x32xf32>
    %cst_59 = arith.constant 1.000000e+00 : f32
    %54 = vector.broadcast %cst_59 : f32 to vector<8x32xf32>
    %55 = arith.addf %54, %53 : vector<8x32xf32>
    %56 = arith.divf %54, %55 : vector<8x32xf32>
    %57 = arith.addf %46, %42 : vector<8x32xf32>
    %58 = arith.negf %57 : vector<8x32xf32>
    %59 = math.exp %58 : vector<8x32xf32>
    %cst_60 = arith.constant 1.000000e+00 : f32
    %60 = vector.broadcast %cst_60 : f32 to vector<8x32xf32>
    %61 = arith.addf %60, %59 : vector<8x32xf32>
    %62 = arith.divf %60, %61 : vector<8x32xf32>
    %63 = arith.mulf %56, %50 : vector<8x32xf32>
    %64 = arith.addf %47, %63 : vector<8x32xf32>
    %65 = math.tanh %64 : vector<8x32xf32>
    %cst_61 = arith.constant 1.000000e+00 : f32
    %66 = vector.broadcast %cst_61 : f32 to vector<8x32xf32>
    %67 = arith.subf %66, %62 : vector<8x32xf32>
    %68 = arith.mulf %67, %65 : vector<8x32xf32>
    %69 = arith.mulf %62, %5 : vector<8x32xf32>
    %70 = arith.addf %68, %69 : vector<8x32xf32>
    %c0_62 = arith.constant 0 : index
    %c0_63 = arith.constant 0 : index
    %71 = vector.load %arg18[%c0_62, %c0_63] : memref<32x32xf32, #tpu.memory_space<vmem>>, vector<32x32xf32>
    %cst_64 = arith.constant dense<0.000000e+00> : vector<8x32xf32>
    %72 = tpu.matmul %70, %71, %cst_64 {dimension_numbers = #tpu.dot_dimension_numbers<[1], [0], [0], [1], [0, 0, 1, 1], [], []>} : vector<8x32xf32>, vector<32x32xf32>, vector<8x32xf32> -> vector<8x32xf32>
    %c0_65 = arith.constant 0 : index
    %c0_66 = arith.constant 0 : index
    %73 = vector.load %arg19[%c0_65, %c0_66] : memref<32x32xf32, #tpu.memory_space<vmem>>, vector<32x32xf32>
    %cst_67 = arith.constant dense<0.000000e+00> : vector<8x32xf32>
    %74 = tpu.matmul %70, %73, %cst_67 {dimension_numbers = #tpu.dot_dimension_numbers<[1], [0], [0], [1], [0, 0, 1, 1], [], []>} : vector<8x32xf32>, vector<32x32xf32>, vector<8x32xf32> -> vector<8x32xf32>
    %c0_68 = arith.constant 0 : index
    %c0_69 = arith.constant 0 : index
    %75 = vector.load %arg20[%c0_68, %c0_69] : memref<32x32xf32, #tpu.memory_space<vmem>>, vector<32x32xf32>
    %cst_70 = arith.constant dense<0.000000e+00> : vector<8x32xf32>
    %76 = tpu.matmul %70, %75, %cst_70 {dimension_numbers = #tpu.dot_dimension_numbers<[1], [0], [0], [1], [0, 0, 1, 1], [], []>} : vector<8x32xf32>, vector<32x32xf32>, vector<8x32xf32> -> vector<8x32xf32>
    %c0_71 = arith.constant 0 : index
    %c0_72 = arith.constant 0 : index
    %77 = vector.load %arg21[%c0_71, %c0_72] : memref<32x32xf32, #tpu.memory_space<vmem>>, vector<32x32xf32>
    %cst_73 = arith.constant dense<0.000000e+00> : vector<8x32xf32>
    %78 = tpu.matmul %5, %77, %cst_73 {dimension_numbers = #tpu.dot_dimension_numbers<[1], [0], [0], [1], [0, 0, 1, 1], [], []>} : vector<8x32xf32>, vector<32x32xf32>, vector<8x32xf32> -> vector<8x32xf32>
    %c0_74 = arith.constant 0 : index
    %c0_75 = arith.constant 0 : index
    %79 = vector.load %arg22[%c0_74, %c0_75] : memref<32x32xf32, #tpu.memory_space<vmem>>, vector<32x32xf32>
    %cst_76 = arith.constant dense<0.000000e+00> : vector<8x32xf32>
    %80 = tpu.matmul %5, %79, %cst_76 {dimension_numbers = #tpu.dot_dimension_numbers<[1], [0], [0], [1], [0, 0, 1, 1], [], []>} : vector<8x32xf32>, vector<32x32xf32>, vector<8x32xf32> -> vector<8x32xf32>
    %c0_77 = arith.constant 0 : index
    %c0_78 = arith.constant 0 : index
    %81 = vector.load %arg23[%c0_77, %c0_78] : memref<32x32xf32, #tpu.memory_space<vmem>>, vector<32x32xf32>
    %cst_79 = arith.constant dense<0.000000e+00> : vector<8x32xf32>
    %82 = tpu.matmul %5, %81, %cst_79 {dimension_numbers = #tpu.dot_dimension_numbers<[1], [0], [0], [1], [0, 0, 1, 1], [], []>} : vector<8x32xf32>, vector<32x32xf32>, vector<8x32xf32> -> vector<8x32xf32>
    %c0_80 = arith.constant 0 : index
    %c0_81 = arith.constant 0 : index
    %83 = vector.load %arg24[%c0_80, %c0_81] : memref<1x32xf32, #tpu.memory_space<vmem>>, vector<1x32xf32>
    %84 = vector.broadcast %83 : vector<1x32xf32> to vector<8x32xf32>
    %85 = arith.addf %72, %84 : vector<8x32xf32>
    %c0_82 = arith.constant 0 : index
    %c0_83 = arith.constant 0 : index
    %86 = vector.load %arg25[%c0_82, %c0_83] : memref<1x32xf32, #tpu.memory_space<vmem>>, vector<1x32xf32>
    %87 = vector.broadcast %86 : vector<1x32xf32> to vector<8x32xf32>
    %88 = arith.addf %74, %87 : vector<8x32xf32>
    %c0_84 = arith.constant 0 : index
    %c0_85 = arith.constant 0 : index
    %89 = vector.load %arg26[%c0_84, %c0_85] : memref<1x32xf32, #tpu.memory_space<vmem>>, vector<1x32xf32>
    %90 = vector.broadcast %89 : vector<1x32xf32> to vector<8x32xf32>
    %91 = arith.addf %76, %90 : vector<8x32xf32>
    %c0_86 = arith.constant 0 : index
    %c0_87 = arith.constant 0 : index
    %92 = vector.load %arg27[%c0_86, %c0_87] : memref<1x32xf32, #tpu.memory_space<vmem>>, vector<1x32xf32>
    %93 = vector.broadcast %92 : vector<1x32xf32> to vector<8x32xf32>
    %94 = arith.addf %82, %93 : vector<8x32xf32>
    %95 = arith.addf %85, %78 : vector<8x32xf32>
    %96 = arith.negf %95 : vector<8x32xf32>
    %97 = math.exp %96 : vector<8x32xf32>
    %cst_88 = arith.constant 1.000000e+00 : f32
    %98 = vector.broadcast %cst_88 : f32 to vector<8x32xf32>
    %99 = arith.addf %98, %97 : vector<8x32xf32>
    %100 = arith.divf %98, %99 : vector<8x32xf32>
    %101 = arith.addf %88, %80 : vector<8x32xf32>
    %102 = arith.negf %101 : vector<8x32xf32>
    %103 = math.exp %102 : vector<8x32xf32>
    %cst_89 = arith.constant 1.000000e+00 : f32
    %104 = vector.broadcast %cst_89 : f32 to vector<8x32xf32>
    %105 = arith.addf %104, %103 : vector<8x32xf32>
    %106 = arith.divf %104, %105 : vector<8x32xf32>
    %107 = arith.mulf %100, %94 : vector<8x32xf32>
    %108 = arith.addf %91, %107 : vector<8x32xf32>
    %109 = math.tanh %108 : vector<8x32xf32>
    %cst_90 = arith.constant 1.000000e+00 : f32
    %110 = vector.broadcast %cst_90 : f32 to vector<8x32xf32>
    %111 = arith.subf %110, %106 : vector<8x32xf32>
    %112 = arith.mulf %111, %109 : vector<8x32xf32>
    %113 = arith.mulf %106, %5 : vector<8x32xf32>
    %114 = arith.addf %112, %113 : vector<8x32xf32>
    %c0_91 = arith.constant 0 : index
    %c0_92 = arith.constant 0 : index
    %115 = vector.load %arg28[%c0_91, %c0_92] : memref<32x128xf32, #tpu.memory_space<vmem>>, vector<32x128xf32>
    %cst_93 = arith.constant dense<0.000000e+00> : vector<8x128xf32>
    %116 = tpu.matmul %114, %115, %cst_93 {dimension_numbers = #tpu.dot_dimension_numbers<[1], [0], [0], [1], [0, 0, 1, 1], [], []>} : vector<8x32xf32>, vector<32x128xf32>, vector<8x128xf32> -> vector<8x128xf32>
    %117 = arith.addf %116, %25 : vector<8x128xf32>
    %c0_94 = arith.constant 0 : index
    %c0_95 = arith.constant 0 : index
    %c0_96 = arith.constant 0 : index
    %118 = vector.load %arg31[%c0_94, %c0_95, %c0_96] : memref<8x8x128xf32, #tpu.memory_space<vmem>>, vector<1x8x128xf32>
    %119 = vector.shape_cast %118 : vector<1x8x128xf32> to vector<8x128xf32>
    %120 = vector.shape_cast %117 : vector<8x128xf32> to vector<1x8x128xf32>
    tpu.vector_store %arg31[%c0_94, %c0_95, %c0_96], %120 {strides = array<i32>} : memref<8x8x128xf32, #tpu.memory_space<vmem>>, vector<1x8x128xf32>,
    %c8 = arith.constant 8 : index
    %c0_97 = arith.constant 0 : index
    %121 = vector.load %arg32[%c8, %c0_97] : memref<64x32xf32, #tpu.memory_space<vmem>>, vector<8x32xf32>
    %c8_98 = arith.constant 8 : index
    %c0_99 = arith.constant 0 : index
    %122 = vector.load %arg33[%c8_98, %c0_99] : memref<64x32xf32, #tpu.memory_space<vmem>>, vector<8x32xf32>
    %c8_100 = arith.constant 8 : index
    %c0_101 = arith.constant 0 : index
    %123 = vector.load %arg34[%c8_100, %c0_101] : memref<64x32xf32, #tpu.memory_space<vmem>>, vector<8x32xf32>
    %c0_102 = arith.constant 0 : index
    %c0_103 = arith.constant 0 : index
    %124 = vector.load %arg11[%c0_102, %c0_103] : memref<32x32xf32, #tpu.memory_space<vmem>>, vector<32x32xf32>
    %cst_104 = arith.constant dense<0.000000e+00> : vector<8x32xf32>
    %125 = tpu.matmul %70, %124, %cst_104 {dimension_numbers = #tpu.dot_dimension_numbers<[1], [0], [0], [1], [0, 0, 1, 1], [], []>} : vector<8x32xf32>, vector<32x32xf32>, vector<8x32xf32> -> vector<8x32xf32>
    %c0_105 = arith.constant 0 : index
    %c0_106 = arith.constant 0 : index
    %126 = vector.load %arg12[%c0_105, %c0_106] : memref<32x32xf32, #tpu.memory_space<vmem>>, vector<32x32xf32>
    %cst_107 = arith.constant dense<0.000000e+00> : vector<8x32xf32>
    %127 = tpu.matmul %70, %126, %cst_107 {dimension_numbers = #tpu.dot_dimension_numbers<[1], [0], [0], [1], [0, 0, 1, 1], [], []>} : vector<8x32xf32>, vector<32x32xf32>, vector<8x32xf32> -> vector<8x32xf32>
    %c0_108 = arith.constant 0 : index
    %c0_109 = arith.constant 0 : index
    %128 = vector.load %arg13[%c0_108, %c0_109] : memref<32x32xf32, #tpu.memory_space<vmem>>, vector<32x32xf32>
    %cst_110 = arith.constant dense<0.000000e+00> : vector<8x32xf32>
    %129 = tpu.matmul %70, %128, %cst_110 {dimension_numbers = #tpu.dot_dimension_numbers<[1], [0], [0], [1], [0, 0, 1, 1], [], []>} : vector<8x32xf32>, vector<32x32xf32>, vector<8x32xf32> -> vector<8x32xf32>
    %130 = arith.addf %121, %10 : vector<8x32xf32>
    %131 = arith.addf %122, %15 : vector<8x32xf32>
    %132 = arith.addf %123, %20 : vector<8x32xf32>
    %c0_111 = arith.constant 0 : index
    %c0_112 = arith.constant 0 : index
    %133 = vector.load %arg17[%c0_111, %c0_112] : memref<1x32xf32, #tpu.memory_space<vmem>>, vector<1x32xf32>
    %134 = vector.broadcast %133 : vector<1x32xf32> to vector<8x32xf32>
    %135 = arith.addf %129, %134 : vector<8x32xf32>
    %136 = arith.addf %130, %125 : vector<8x32xf32>
    %137 = arith.negf %136 : vector<8x32xf32>
    %138 = math.exp %137 : vector<8x32xf32>
    %cst_113 = arith.constant 1.000000e+00 : f32
    %139 = vector.broadcast %cst_113 : f32 to vector<8x32xf32>
    %140 = arith.addf %139, %138 : vector<8x32xf32>
    %141 = arith.divf %139, %140 : vector<8x32xf32>
    %142 = arith.addf %131, %127 : vector<8x32xf32>
    %143 = arith.negf %142 : vector<8x32xf32>
    %144 = math.exp %143 : vector<8x32xf32>
    %cst_114 = arith.constant 1.000000e+00 : f32
    %145 = vector.broadcast %cst_114 : f32 to vector<8x32xf32>
    %146 = arith.addf %145, %144 : vector<8x32xf32>
    %147 = arith.divf %145, %146 : vector<8x32xf32>
    %148 = arith.mulf %141, %135 : vector<8x32xf32>
    %149 = arith.addf %132, %148 : vector<8x32xf32>
    %150 = math.tanh %149 : vector<8x32xf32>
    %cst_115 = arith.constant 1.000000e+00 : f32
    %151 = vector.broadcast %cst_115 : f32 to vector<8x32xf32>
    %152 = arith.subf %151, %147 : vector<8x32xf32>
    %153 = arith.mulf %152, %150 : vector<8x32xf32>
    %154 = arith.mulf %147, %70 : vector<8x32xf32>
    %155 = arith.addf %153, %154 : vector<8x32xf32>
    %c0_116 = arith.constant 0 : index
    %c0_117 = arith.constant 0 : index
    %156 = vector.load %arg18[%c0_116, %c0_117] : memref<32x32xf32, #tpu.memory_space<vmem>>, vector<32x32xf32>
    %cst_118 = arith.constant dense<0.000000e+00> : vector<8x32xf32>
    %157 = tpu.matmul %155, %156, %cst_118 {dimension_numbers = #tpu.dot_dimension_numbers<[1], [0], [0], [1], [0, 0, 1, 1], [], []>} : vector<8x32xf32>, vector<32x32xf32>, vector<8x32xf32> -> vector<8x32xf32>
    %c0_119 = arith.constant 0 : index
    %c0_120 = arith.constant 0 : index
    %158 = vector.load %arg19[%c0_119, %c0_120] : memref<32x32xf32, #tpu.memory_space<vmem>>, vector<32x32xf32>
    %cst_121 = arith.constant dense<0.000000e+00> : vector<8x32xf32>
    %159 = tpu.matmul %155, %158, %cst_121 {dimension_numbers = #tpu.dot_dimension_numbers<[1], [0], [0], [1], [0, 0, 1, 1], [], []>} : vector<8x32xf32>, vector<32x32xf32>, vector<8x32xf32> -> vector<8x32xf32>
    %c0_122 = arith.constant 0 : index
    %c0_123 = arith.constant 0 : index
    %160 = vector.load %arg20[%c0_122, %c0_123] : memref<32x32xf32, #tpu.memory_space<vmem>>, vector<32x32xf32>
    %cst_124 = arith.constant dense<0.000000e+00> : vector<8x32xf32>
    %161 = tpu.matmul %155, %160, %cst_124 {dimension_numbers = #tpu.dot_dimension_numbers<[1], [0], [0], [1], [0, 0, 1, 1], [], []>} : vector<8x32xf32>, vector<32x32xf32>, vector<8x32xf32> -> vector<8x32xf32>
    %c0_125 = arith.constant 0 : index
    %c0_126 = arith.constant 0 : index
    %162 = vector.load %arg21[%c0_125, %c0_126] : memref<32x32xf32, #tpu.memory_space<vmem>>, vector<32x32xf32>
    %cst_127 = arith.constant dense<0.000000e+00> : vector<8x32xf32>
    %163 = tpu.matmul %114, %162, %cst_127 {dimension_numbers = #tpu.dot_dimension_numbers<[1], [0], [0], [1], [0, 0, 1, 1], [], []>} : vector<8x32xf32>, vector<32x32xf32>, vector<8x32xf32> -> vector<8x32xf32>
    %c0_128 = arith.constant 0 : index
    %c0_129 = arith.constant 0 : index
    %164 = vector.load %arg22[%c0_128, %c0_129] : memref<32x32xf32, #tpu.memory_space<vmem>>, vector<32x32xf32>
    %cst_130 = arith.constant dense<0.000000e+00> : vector<8x32xf32>
    %165 = tpu.matmul %114, %164, %cst_130 {dimension_numbers = #tpu.dot_dimension_numbers<[1], [0], [0], [1], [0, 0, 1, 1], [], []>} : vector<8x32xf32>, vector<32x32xf32>, vector<8x32xf32> -> vector<8x32xf32>
    %c0_131 = arith.constant 0 : index
    %c0_132 = arith.constant 0 : index
    %166 = vector.load %arg23[%c0_131, %c0_132] : memref<32x32xf32, #tpu.memory_space<vmem>>, vector<32x32xf32>
    %cst_133 = arith.constant dense<0.000000e+00> : vector<8x32xf32>
    %167 = tpu.matmul %114, %166, %cst_133 {dimension_numbers = #tpu.dot_dimension_numbers<[1], [0], [0], [1], [0, 0, 1, 1], [], []>} : vector<8x32xf32>, vector<32x32xf32>, vector<8x32xf32> -> vector<8x32xf32>
    %c0_134 = arith.constant 0 : index
    %c0_135 = arith.constant 0 : index
    %168 = vector.load %arg24[%c0_134, %c0_135] : memref<1x32xf32, #tpu.memory_space<vmem>>, vector<1x32xf32>
    %169 = vector.broadcast %168 : vector<1x32xf32> to vector<8x32xf32>
    %170 = arith.addf %157, %169 : vector<8x32xf32>
    %c0_136 = arith.constant 0 : index
    %c0_137 = arith.constant 0 : index
    %171 = vector.load %arg25[%c0_136, %c0_137] : memref<1x32xf32, #tpu.memory_space<vmem>>, vector<1x32xf32>
    %172 = vector.broadcast %171 : vector<1x32xf32> to vector<8x32xf32>
    %173 = arith.addf %159, %172 : vector<8x32xf32>
    %c0_138 = arith.constant 0 : index
    %c0_139 = arith.constant 0 : index
    %174 = vector.load %arg26[%c0_138, %c0_139] : memref<1x32xf32, #tpu.memory_space<vmem>>, vector<1x32xf32>
    %175 = vector.broadcast %174 : vector<1x32xf32> to vector<8x32xf32>
    %176 = arith.addf %161, %175 : vector<8x32xf32>
    %c0_140 = arith.constant 0 : index
    %c0_141 = arith.constant 0 : index
    %177 = vector.load %arg27[%c0_140, %c0_141] : memref<1x32xf32, #tpu.memory_space<vmem>>, vector<1x32xf32>
    %178 = vector.broadcast %177 : vector<1x32xf32> to vector<8x32xf32>
    %179 = arith.addf %167, %178 : vector<8x32xf32>
    %180 = arith.addf %170, %163 : vector<8x32xf32>
    %181 = arith.negf %180 : vector<8x32xf32>
    %182 = math.exp %181 : vector<8x32xf32>
    %cst_142 = arith.constant 1.000000e+00 : f32
    %183 = vector.broadcast %cst_142 : f32 to vector<8x32xf32>
    %184 = arith.addf %183, %182 : vector<8x32xf32>
    %185 = arith.divf %183, %184 : vector<8x32xf32>
    %186 = arith.addf %173, %165 : vector<8x32xf32>
    %187 = arith.negf %186 : vector<8x32xf32>
    %188 = math.exp %187 : vector<8x32xf32>
    %cst_143 = arith.constant 1.000000e+00 : f32
    %189 = vector.broadcast %cst_143 : f32 to vector<8x32xf32>
    %190 = arith.addf %189, %188 : vector<8x32xf32>
    %191 = arith.divf %189, %190 : vector<8x32xf32>
    %192 = arith.mulf %185, %179 : vector<8x32xf32>
    %193 = arith.addf %176, %192 : vector<8x32xf32>
    %194 = math.tanh %193 : vector<8x32xf32>
    %cst_144 = arith.constant 1.000000e+00 : f32
    %195 = vector.broadcast %cst_144 : f32 to vector<8x32xf32>
    %196 = arith.subf %195, %191 : vector<8x32xf32>
    %197 = arith.mulf %196, %194 : vector<8x32xf32>
    %198 = arith.mulf %191, %114 : vector<8x32xf32>
    %199 = arith.addf %197, %198 : vector<8x32xf32>
    %c0_145 = arith.constant 0 : index
    %c0_146 = arith.constant 0 : index
    %200 = vector.load %arg28[%c0_145, %c0_146] : memref<32x128xf32, #tpu.memory_space<vmem>>, vector<32x128xf32>
    %cst_147 = arith.constant dense<0.000000e+00> : vector<8x128xf32>
    %201 = tpu.matmul %199, %200, %cst_147 {dimension_numbers = #tpu.dot_dimension_numbers<[1], [0], [0], [1], [0, 0, 1, 1], [], []>} : vector<8x32xf32>, vector<32x128xf32>, vector<8x128xf32> -> vector<8x128xf32>
    %202 = arith.addf %201, %25 : vector<8x128xf32>
    %c1 = arith.constant 1 : index
    %c0_148 = arith.constant 0 : index
    %c0_149 = arith.constant 0 : index
    %203 = vector.load %arg31[%c1, %c0_148, %c0_149] : memref<8x8x128xf32, #tpu.memory_space<vmem>>, vector<1x8x128xf32>
    %204 = vector.shape_cast %203 : vector<1x8x128xf32> to vector<8x128xf32>
    %205 = vector.shape_cast %202 : vector<8x128xf32> to vector<1x8x128xf32>
    tpu.vector_store %arg31[%c1, %c0_148, %c0_149], %205 {strides = array<i32>} : memref<8x8x128xf32, #tpu.memory_space<vmem>>, vector<1x8x128xf32>,
    %c16 = arith.constant 16 : index
    %c0_150 = arith.constant 0 : index
    %206 = vector.load %arg32[%c16, %c0_150] : memref<64x32xf32, #tpu.memory_space<vmem>>, vector<8x32xf32>
    %c16_151 = arith.constant 16 : index
    %c0_152 = arith.constant 0 : index
    %207 = vector.load %arg33[%c16_151, %c0_152] : memref<64x32xf32, #tpu.memory_space<vmem>>, vector<8x32xf32>
    %c16_153 = arith.constant 16 : index
    %c0_154 = arith.constant 0 : index
    %208 = vector.load %arg34[%c16_153, %c0_154] : memref<64x32xf32, #tpu.memory_space<vmem>>, vector<8x32xf32>
    %c0_155 = arith.constant 0 : index
    %c0_156 = arith.constant 0 : index
    %209 = vector.load %arg11[%c0_155, %c0_156] : memref<32x32xf32, #tpu.memory_space<vmem>>, vector<32x32xf32>
    %cst_157 = arith.constant dense<0.000000e+00> : vector<8x32xf32>
    %210 = tpu.matmul %155, %209, %cst_157 {dimension_numbers = #tpu.dot_dimension_numbers<[1], [0], [0], [1], [0, 0, 1, 1], [], []>} : vector<8x32xf32>, vector<32x32xf32>, vector<8x32xf32> -> vector<8x32xf32>
    %c0_158 = arith.constant 0 : index
    %c0_159 = arith.constant 0 : index
    %211 = vector.load %arg12[%c0_158, %c0_159] : memref<32x32xf32, #tpu.memory_space<vmem>>, vector<32x32xf32>
    %cst_160 = arith.constant dense<0.000000e+00> : vector<8x32xf32>
    %212 = tpu.matmul %155, %211, %cst_160 {dimension_numbers = #tpu.dot_dimension_numbers<[1], [0], [0], [1], [0, 0, 1, 1], [], []>} : vector<8x32xf32>, vector<32x32xf32>, vector<8x32xf32> -> vector<8x32xf32>
    %c0_161 = arith.constant 0 : index
    %c0_162 = arith.constant 0 : index
    %213 = vector.load %arg13[%c0_161, %c0_162] : memref<32x32xf32, #tpu.memory_space<vmem>>, vector<32x32xf32>
    %cst_163 = arith.constant dense<0.000000e+00> : vector<8x32xf32>
    %214 = tpu.matmul %155, %213, %cst_163 {dimension_numbers = #tpu.dot_dimension_numbers<[1], [0], [0], [1], [0, 0, 1, 1], [], []>} : vector<8x32xf32>, vector<32x32xf32>, vector<8x32xf32> -> vector<8x32xf32>
    %215 = arith.addf %206, %10 : vector<8x32xf32>
    %216 = arith.addf %207, %15 : vector<8x32xf32>
    %217 = arith.addf %208, %20 : vector<8x32xf32>
    %c0_164 = arith.constant 0 : index
    %c0_165 = arith.constant 0 : index
    %218 = vector.load %arg17[%c0_164, %c0_165] : memref<1x32xf32, #tpu.memory_space<vmem>>, vector<1x32xf32>
    %219 = vector.broadcast %218 : vector<1x32xf32> to vector<8x32xf32>
    %220 = arith.addf %214, %219 : vector<8x32xf32>
    %221 = arith.addf %215, %210 : vector<8x32xf32>
    %222 = arith.negf %221 : vector<8x32xf32>
    %223 = math.exp %222 : vector<8x32xf32>
    %cst_166 = arith.constant 1.000000e+00 : f32
    %224 = vector.broadcast %cst_166 : f32 to vector<8x32xf32>
    %225 = arith.addf %224, %223 : vector<8x32xf32>
    %226 = arith.divf %224, %225 : vector<8x32xf32>
    %227 = arith.addf %216, %212 : vector<8x32xf32>
    %228 = arith.negf %227 : vector<8x32xf32>
    %229 = math.exp %228 : vector<8x32xf32>
    %cst_167 = arith.constant 1.000000e+00 : f32
    %230 = vector.broadcast %cst_167 : f32 to vector<8x32xf32>
    %231 = arith.addf %230, %229 : vector<8x32xf32>
    %232 = arith.divf %230, %231 : vector<8x32xf32>
    %233 = arith.mulf %226, %220 : vector<8x32xf32>
    %234 = arith.addf %217, %233 : vector<8x32xf32>
    %235 = math.tanh %234 : vector<8x32xf32>
    %cst_168 = arith.constant 1.000000e+00 : f32
    %236 = vector.broadcast %cst_168 : f32 to vector<8x32xf32>
    %237 = arith.subf %236, %232 : vector<8x32xf32>
    %238 = arith.mulf %237, %235 : vector<8x32xf32>
    %239 = arith.mulf %232, %155 : vector<8x32xf32>
    %240 = arith.addf %238, %239 : vector<8x32xf32>
    %c0_169 = arith.constant 0 : index
    %c0_170 = arith.constant 0 : index
    %241 = vector.load %arg18[%c0_169, %c0_170] : memref<32x32xf32, #tpu.memory_space<vmem>>, vector<32x32xf32>
    %cst_171 = arith.constant dense<0.000000e+00> : vector<8x32xf32>
    %242 = tpu.matmul %240, %241, %cst_171 {dimension_numbers = #tpu.dot_dimension_numbers<[1], [0], [0], [1], [0, 0, 1, 1], [], []>} : vector<8x32xf32>, vector<32x32xf32>, vector<8x32xf32> -> vector<8x32xf32>
    %c0_172 = arith.constant 0 : index
    %c0_173 = arith.constant 0 : index
    %243 = vector.load %arg19[%c0_172, %c0_173] : memref<32x32xf32, #tpu.memory_space<vmem>>, vector<32x32xf32>
    %cst_174 = arith.constant dense<0.000000e+00> : vector<8x32xf32>
    %244 = tpu.matmul %240, %243, %cst_174 {dimension_numbers = #tpu.dot_dimension_numbers<[1], [0], [0], [1], [0, 0, 1, 1], [], []>} : vector<8x32xf32>, vector<32x32xf32>, vector<8x32xf32> -> vector<8x32xf32>
    %c0_175 = arith.constant 0 : index
    %c0_176 = arith.constant 0 : index
    %245 = vector.load %arg20[%c0_175, %c0_176] : memref<32x32xf32, #tpu.memory_space<vmem>>, vector<32x32xf32>
    %cst_177 = arith.constant dense<0.000000e+00> : vector<8x32xf32>
    %246 = tpu.matmul %240, %245, %cst_177 {dimension_numbers = #tpu.dot_dimension_numbers<[1], [0], [0], [1], [0, 0, 1, 1], [], []>} : vector<8x32xf32>, vector<32x32xf32>, vector<8x32xf32> -> vector<8x32xf32>
    %c0_178 = arith.constant 0 : index
    %c0_179 = arith.constant 0 : index
    %247 = vector.load %arg21[%c0_178, %c0_179] : memref<32x32xf32, #tpu.memory_space<vmem>>, vector<32x32xf32>
    %cst_180 = arith.constant dense<0.000000e+00> : vector<8x32xf32>
    %248 = tpu.matmul %199, %247, %cst_180 {dimension_numbers = #tpu.dot_dimension_numbers<[1], [0], [0], [1], [0, 0, 1, 1], [], []>} : vector<8x32xf32>, vector<32x32xf32>, vector<8x32xf32> -> vector<8x32xf32>
    %c0_181 = arith.constant 0 : index
    %c0_182 = arith.constant 0 : index
    %249 = vector.load %arg22[%c0_181, %c0_182] : memref<32x32xf32, #tpu.memory_space<vmem>>, vector<32x32xf32>
    %cst_183 = arith.constant dense<0.000000e+00> : vector<8x32xf32>
    %250 = tpu.matmul %199, %249, %cst_183 {dimension_numbers = #tpu.dot_dimension_numbers<[1], [0], [0], [1], [0, 0, 1, 1], [], []>} : vector<8x32xf32>, vector<32x32xf32>, vector<8x32xf32> -> vector<8x32xf32>
    %c0_184 = arith.constant 0 : index
    %c0_185 = arith.constant 0 : index
    %251 = vector.load %arg23[%c0_184, %c0_185] : memref<32x32xf32, #tpu.memory_space<vmem>>, vector<32x32xf32>
    %cst_186 = arith.constant dense<0.000000e+00> : vector<8x32xf32>
    %252 = tpu.matmul %199, %251, %cst_186 {dimension_numbers = #tpu.dot_dimension_numbers<[1], [0], [0], [1], [0, 0, 1, 1], [], []>} : vector<8x32xf32>, vector<32x32xf32>, vector<8x32xf32> -> vector<8x32xf32>
    %c0_187 = arith.constant 0 : index
    %c0_188 = arith.constant 0 : index
    %253 = vector.load %arg24[%c0_187, %c0_188] : memref<1x32xf32, #tpu.memory_space<vmem>>, vector<1x32xf32>
    %254 = vector.broadcast %253 : vector<1x32xf32> to vector<8x32xf32>
    %255 = arith.addf %242, %254 : vector<8x32xf32>
    %c0_189 = arith.constant 0 : index
    %c0_190 = arith.constant 0 : index
    %256 = vector.load %arg25[%c0_189, %c0_190] : memref<1x32xf32, #tpu.memory_space<vmem>>, vector<1x32xf32>
    %257 = vector.broadcast %256 : vector<1x32xf32> to vector<8x32xf32>
    %258 = arith.addf %244, %257 : vector<8x32xf32>
    %c0_191 = arith.constant 0 : index
    %c0_192 = arith.constant 0 : index
    %259 = vector.load %arg26[%c0_191, %c0_192] : memref<1x32xf32, #tpu.memory_space<vmem>>, vector<1x32xf32>
    %260 = vector.broadcast %259 : vector<1x32xf32> to vector<8x32xf32>
    %261 = arith.addf %246, %260 : vector<8x32xf32>
    %c0_193 = arith.constant 0 : index
    %c0_194 = arith.constant 0 : index
    %262 = vector.load %arg27[%c0_193, %c0_194] : memref<1x32xf32, #tpu.memory_space<vmem>>, vector<1x32xf32>
    %263 = vector.broadcast %262 : vector<1x32xf32> to vector<8x32xf32>
    %264 = arith.addf %252, %263 : vector<8x32xf32>
    %265 = arith.addf %255, %248 : vector<8x32xf32>
    %266 = arith.negf %265 : vector<8x32xf32>
    %267 = math.exp %266 : vector<8x32xf32>
    %cst_195 = arith.constant 1.000000e+00 : f32
    %268 = vector.broadcast %cst_195 : f32 to vector<8x32xf32>
    %269 = arith.addf %268, %267 : vector<8x32xf32>
    %270 = arith.divf %268, %269 : vector<8x32xf32>
    %271 = arith.addf %258, %250 : vector<8x32xf32>
    %272 = arith.negf %271 : vector<8x32xf32>
    %273 = math.exp %272 : vector<8x32xf32>
    %cst_196 = arith.constant 1.000000e+00 : f32
    %274 = vector.broadcast %cst_196 : f32 to vector<8x32xf32>
    %275 = arith.addf %274, %273 : vector<8x32xf32>
    %276 = arith.divf %274, %275 : vector<8x32xf32>
    %277 = arith.mulf %270, %264 : vector<8x32xf32>
    %278 = arith.addf %261, %277 : vector<8x32xf32>
    %279 = math.tanh %278 : vector<8x32xf32>
    %cst_197 = arith.constant 1.000000e+00 : f32
    %280 = vector.broadcast %cst_197 : f32 to vector<8x32xf32>
    %281 = arith.subf %280, %276 : vector<8x32xf32>
    %282 = arith.mulf %281, %279 : vector<8x32xf32>
    %283 = arith.mulf %276, %199 : vector<8x32xf32>
    %284 = arith.addf %282, %283 : vector<8x32xf32>
    %c0_198 = arith.constant 0 : index
    %c0_199 = arith.constant 0 : index
    %285 = vector.load %arg28[%c0_198, %c0_199] : memref<32x128xf32, #tpu.memory_space<vmem>>, vector<32x128xf32>
    %cst_200 = arith.constant dense<0.000000e+00> : vector<8x128xf32>
    %286 = tpu.matmul %284, %285, %cst_200 {dimension_numbers = #tpu.dot_dimension_numbers<[1], [0], [0], [1], [0, 0, 1, 1], [], []>} : vector<8x32xf32>, vector<32x128xf32>, vector<8x128xf32> -> vector<8x128xf32>
    %287 = arith.addf %286, %25 : vector<8x128xf32>
    %c2 = arith.constant 2 : index
    %c0_201 = arith.constant 0 : index
    %c0_202 = arith.constant 0 : index
    %288 = vector.load %arg31[%c2, %c0_201, %c0_202] : memref<8x8x128xf32, #tpu.memory_space<vmem>>, vector<1x8x128xf32>
    %289 = vector.shape_cast %288 : vector<1x8x128xf32> to vector<8x128xf32>
    %290 = vector.shape_cast %287 : vector<8x128xf32> to vector<1x8x128xf32>
    tpu.vector_store %arg31[%c2, %c0_201, %c0_202], %290 {strides = array<i32>} : memref<8x8x128xf32, #tpu.memory_space<vmem>>, vector<1x8x128xf32>,
    %c24 = arith.constant 24 : index
    %c0_203 = arith.constant 0 : index
    %291 = vector.load %arg32[%c24, %c0_203] : memref<64x32xf32, #tpu.memory_space<vmem>>, vector<8x32xf32>
    %c24_204 = arith.constant 24 : index
    %c0_205 = arith.constant 0 : index
    %292 = vector.load %arg33[%c24_204, %c0_205] : memref<64x32xf32, #tpu.memory_space<vmem>>, vector<8x32xf32>
    %c24_206 = arith.constant 24 : index
    %c0_207 = arith.constant 0 : index
    %293 = vector.load %arg34[%c24_206, %c0_207] : memref<64x32xf32, #tpu.memory_space<vmem>>, vector<8x32xf32>
    %c0_208 = arith.constant 0 : index
    %c0_209 = arith.constant 0 : index
    %294 = vector.load %arg11[%c0_208, %c0_209] : memref<32x32xf32, #tpu.memory_space<vmem>>, vector<32x32xf32>
    %cst_210 = arith.constant dense<0.000000e+00> : vector<8x32xf32>
    %295 = tpu.matmul %240, %294, %cst_210 {dimension_numbers = #tpu.dot_dimension_numbers<[1], [0], [0], [1], [0, 0, 1, 1], [], []>} : vector<8x32xf32>, vector<32x32xf32>, vector<8x32xf32> -> vector<8x32xf32>
    %c0_211 = arith.constant 0 : index
    %c0_212 = arith.constant 0 : index
    %296 = vector.load %arg12[%c0_211, %c0_212] : memref<32x32xf32, #tpu.memory_space<vmem>>, vector<32x32xf32>
    %cst_213 = arith.constant dense<0.000000e+00> : vector<8x32xf32>
    %297 = tpu.matmul %240, %296, %cst_213 {dimension_numbers = #tpu.dot_dimension_numbers<[1], [0], [0], [1], [0, 0, 1, 1], [], []>} : vector<8x32xf32>, vector<32x32xf32>, vector<8x32xf32> -> vector<8x32xf32>
    %c0_214 = arith.constant 0 : index
    %c0_215 = arith.constant 0 : index
    %298 = vector.load %arg13[%c0_214, %c0_215] : memref<32x32xf32, #tpu.memory_space<vmem>>, vector<32x32xf32>
    %cst_216 = arith.constant dense<0.000000e+00> : vector<8x32xf32>
    %299 = tpu.matmul %240, %298, %cst_216 {dimension_numbers = #tpu.dot_dimension_numbers<[1], [0], [0], [1], [0, 0, 1, 1], [], []>} : vector<8x32xf32>, vector<32x32xf32>, vector<8x32xf32> -> vector<8x32xf32>
    %300 = arith.addf %291, %10 : vector<8x32xf32>
    %301 = arith.addf %292, %15 : vector<8x32xf32>
    %302 = arith.addf %293, %20 : vector<8x32xf32>
    %c0_217 = arith.constant 0 : index
    %c0_218 = arith.constant 0 : index
    %303 = vector.load %arg17[%c0_217, %c0_218] : memref<1x32xf32, #tpu.memory_space<vmem>>, vector<1x32xf32>
    %304 = vector.broadcast %303 : vector<1x32xf32> to vector<8x32xf32>
    %305 = arith.addf %299, %304 : vector<8x32xf32>
    %306 = arith.addf %300, %295 : vector<8x32xf32>
    %307 = arith.negf %306 : vector<8x32xf32>
    %308 = math.exp %307 : vector<8x32xf32>
    %cst_219 = arith.constant 1.000000e+00 : f32
    %309 = vector.broadcast %cst_219 : f32 to vector<8x32xf32>
    %310 = arith.addf %309, %308 : vector<8x32xf32>
    %311 = arith.divf %309, %310 : vector<8x32xf32>
    %312 = arith.addf %301, %297 : vector<8x32xf32>
    %313 = arith.negf %312 : vector<8x32xf32>
    %314 = math.exp %313 : vector<8x32xf32>
    %cst_220 = arith.constant 1.000000e+00 : f32
    %315 = vector.broadcast %cst_220 : f32 to vector<8x32xf32>
    %316 = arith.addf %315, %314 : vector<8x32xf32>
    %317 = arith.divf %315, %316 : vector<8x32xf32>
    %318 = arith.mulf %311, %305 : vector<8x32xf32>
    %319 = arith.addf %302, %318 : vector<8x32xf32>
    %320 = math.tanh %319 : vector<8x32xf32>
    %cst_221 = arith.constant 1.000000e+00 : f32
    %321 = vector.broadcast %cst_221 : f32 to vector<8x32xf32>
    %322 = arith.subf %321, %317 : vector<8x32xf32>
    %323 = arith.mulf %322, %320 : vector<8x32xf32>
    %324 = arith.mulf %317, %240 : vector<8x32xf32>
    %325 = arith.addf %323, %324 : vector<8x32xf32>
    %c0_222 = arith.constant 0 : index
    %c0_223 = arith.constant 0 : index
    %326 = vector.load %arg18[%c0_222, %c0_223] : memref<32x32xf32, #tpu.memory_space<vmem>>, vector<32x32xf32>
    %cst_224 = arith.constant dense<0.000000e+00> : vector<8x32xf32>
    %327 = tpu.matmul %325, %326, %cst_224 {dimension_numbers = #tpu.dot_dimension_numbers<[1], [0], [0], [1], [0, 0, 1, 1], [], []>} : vector<8x32xf32>, vector<32x32xf32>, vector<8x32xf32> -> vector<8x32xf32>
    %c0_225 = arith.constant 0 : index
    %c0_226 = arith.constant 0 : index
    %328 = vector.load %arg19[%c0_225, %c0_226] : memref<32x32xf32, #tpu.memory_space<vmem>>, vector<32x32xf32>
    %cst_227 = arith.constant dense<0.000000e+00> : vector<8x32xf32>
    %329 = tpu.matmul %325, %328, %cst_227 {dimension_numbers = #tpu.dot_dimension_numbers<[1], [0], [0], [1], [0, 0, 1, 1], [], []>} : vector<8x32xf32>, vector<32x32xf32>, vector<8x32xf32> -> vector<8x32xf32>
    %c0_228 = arith.constant 0 : index
    %c0_229 = arith.constant 0 : index
    %330 = vector.load %arg20[%c0_228, %c0_229] : memref<32x32xf32, #tpu.memory_space<vmem>>, vector<32x32xf32>
    %cst_230 = arith.constant dense<0.000000e+00> : vector<8x32xf32>
    %331 = tpu.matmul %325, %330, %cst_230 {dimension_numbers = #tpu.dot_dimension_numbers<[1], [0], [0], [1], [0, 0, 1, 1], [], []>} : vector<8x32xf32>, vector<32x32xf32>, vector<8x32xf32> -> vector<8x32xf32>
    %c0_231 = arith.constant 0 : index
    %c0_232 = arith.constant 0 : index
    %332 = vector.load %arg21[%c0_231, %c0_232] : memref<32x32xf32, #tpu.memory_space<vmem>>, vector<32x32xf32>
    %cst_233 = arith.constant dense<0.000000e+00> : vector<8x32xf32>
    %333 = tpu.matmul %284, %332, %cst_233 {dimension_numbers = #tpu.dot_dimension_numbers<[1], [0], [0], [1], [0, 0, 1, 1], [], []>} : vector<8x32xf32>, vector<32x32xf32>, vector<8x32xf32> -> vector<8x32xf32>
    %c0_234 = arith.constant 0 : index
    %c0_235 = arith.constant 0 : index
    %334 = vector.load %arg22[%c0_234, %c0_235] : memref<32x32xf32, #tpu.memory_space<vmem>>, vector<32x32xf32>
    %cst_236 = arith.constant dense<0.000000e+00> : vector<8x32xf32>
    %335 = tpu.matmul %284, %334, %cst_236 {dimension_numbers = #tpu.dot_dimension_numbers<[1], [0], [0], [1], [0, 0, 1, 1], [], []>} : vector<8x32xf32>, vector<32x32xf32>, vector<8x32xf32> -> vector<8x32xf32>
    %c0_237 = arith.constant 0 : index
    %c0_238 = arith.constant 0 : index
    %336 = vector.load %arg23[%c0_237, %c0_238] : memref<32x32xf32, #tpu.memory_space<vmem>>, vector<32x32xf32>
    %cst_239 = arith.constant dense<0.000000e+00> : vector<8x32xf32>
    %337 = tpu.matmul %284, %336, %cst_239 {dimension_numbers = #tpu.dot_dimension_numbers<[1], [0], [0], [1], [0, 0, 1, 1], [], []>} : vector<8x32xf32>, vector<32x32xf32>, vector<8x32xf32> -> vector<8x32xf32>
    %c0_240 = arith.constant 0 : index
    %c0_241 = arith.constant 0 : index
    %338 = vector.load %arg24[%c0_240, %c0_241] : memref<1x32xf32, #tpu.memory_space<vmem>>, vector<1x32xf32>
    %339 = vector.broadcast %338 : vector<1x32xf32> to vector<8x32xf32>
    %340 = arith.addf %327, %339 : vector<8x32xf32>
    %c0_242 = arith.constant 0 : index
    %c0_243 = arith.constant 0 : index
    %341 = vector.load %arg25[%c0_242, %c0_243] : memref<1x32xf32, #tpu.memory_space<vmem>>, vector<1x32xf32>
    %342 = vector.broadcast %341 : vector<1x32xf32> to vector<8x32xf32>
    %343 = arith.addf %329, %342 : vector<8x32xf32>
    %c0_244 = arith.constant 0 : index
    %c0_245 = arith.constant 0 : index
    %344 = vector.load %arg26[%c0_244, %c0_245] : memref<1x32xf32, #tpu.memory_space<vmem>>, vector<1x32xf32>
    %345 = vector.broadcast %344 : vector<1x32xf32> to vector<8x32xf32>
    %346 = arith.addf %331, %345 : vector<8x32xf32>
    %c0_246 = arith.constant 0 : index
    %c0_247 = arith.constant 0 : index
    %347 = vector.load %arg27[%c0_246, %c0_247] : memref<1x32xf32, #tpu.memory_space<vmem>>, vector<1x32xf32>
    %348 = vector.broadcast %347 : vector<1x32xf32> to vector<8x32xf32>
    %349 = arith.addf %337, %348 : vector<8x32xf32>
    %350 = arith.addf %340, %333 : vector<8x32xf32>
    %351 = arith.negf %350 : vector<8x32xf32>
    %352 = math.exp %351 : vector<8x32xf32>
    %cst_248 = arith.constant 1.000000e+00 : f32
    %353 = vector.broadcast %cst_248 : f32 to vector<8x32xf32>
    %354 = arith.addf %353, %352 : vector<8x32xf32>
    %355 = arith.divf %353, %354 : vector<8x32xf32>
    %356 = arith.addf %343, %335 : vector<8x32xf32>
    %357 = arith.negf %356 : vector<8x32xf32>
    %358 = math.exp %357 : vector<8x32xf32>
    %cst_249 = arith.constant 1.000000e+00 : f32
    %359 = vector.broadcast %cst_249 : f32 to vector<8x32xf32>
    %360 = arith.addf %359, %358 : vector<8x32xf32>
    %361 = arith.divf %359, %360 : vector<8x32xf32>
    %362 = arith.mulf %355, %349 : vector<8x32xf32>
    %363 = arith.addf %346, %362 : vector<8x32xf32>
    %364 = math.tanh %363 : vector<8x32xf32>
    %cst_250 = arith.constant 1.000000e+00 : f32
    %365 = vector.broadcast %cst_250 : f32 to vector<8x32xf32>
    %366 = arith.subf %365, %361 : vector<8x32xf32>
    %367 = arith.mulf %366, %364 : vector<8x32xf32>
    %368 = arith.mulf %361, %284 : vector<8x32xf32>
    %369 = arith.addf %367, %368 : vector<8x32xf32>
    %c0_251 = arith.constant 0 : index
    %c0_252 = arith.constant 0 : index
    %370 = vector.load %arg28[%c0_251, %c0_252] : memref<32x128xf32, #tpu.memory_space<vmem>>, vector<32x128xf32>
    %cst_253 = arith.constant dense<0.000000e+00> : vector<8x128xf32>
    %371 = tpu.matmul %369, %370, %cst_253 {dimension_numbers = #tpu.dot_dimension_numbers<[1], [0], [0], [1], [0, 0, 1, 1], [], []>} : vector<8x32xf32>, vector<32x128xf32>, vector<8x128xf32> -> vector<8x128xf32>
    %372 = arith.addf %371, %25 : vector<8x128xf32>
    %c3 = arith.constant 3 : index
    %c0_254 = arith.constant 0 : index
    %c0_255 = arith.constant 0 : index
    %373 = vector.load %arg31[%c3, %c0_254, %c0_255] : memref<8x8x128xf32, #tpu.memory_space<vmem>>, vector<1x8x128xf32>
    %374 = vector.shape_cast %373 : vector<1x8x128xf32> to vector<8x128xf32>
    %375 = vector.shape_cast %372 : vector<8x128xf32> to vector<1x8x128xf32>
    tpu.vector_store %arg31[%c3, %c0_254, %c0_255], %375 {strides = array<i32>} : memref<8x8x128xf32, #tpu.memory_space<vmem>>, vector<1x8x128xf32>,
    %c32 = arith.constant 32 : index
    %c0_256 = arith.constant 0 : index
    %376 = vector.load %arg32[%c32, %c0_256] : memref<64x32xf32, #tpu.memory_space<vmem>>, vector<8x32xf32>
    %c32_257 = arith.constant 32 : index
    %c0_258 = arith.constant 0 : index
    %377 = vector.load %arg33[%c32_257, %c0_258] : memref<64x32xf32, #tpu.memory_space<vmem>>, vector<8x32xf32>
    %c32_259 = arith.constant 32 : index
    %c0_260 = arith.constant 0 : index
    %378 = vector.load %arg34[%c32_259, %c0_260] : memref<64x32xf32, #tpu.memory_space<vmem>>, vector<8x32xf32>
    %c0_261 = arith.constant 0 : index
    %c0_262 = arith.constant 0 : index
    %379 = vector.load %arg11[%c0_261, %c0_262] : memref<32x32xf32, #tpu.memory_space<vmem>>, vector<32x32xf32>
    %cst_263 = arith.constant dense<0.000000e+00> : vector<8x32xf32>
    %380 = tpu.matmul %325, %379, %cst_263 {dimension_numbers = #tpu.dot_dimension_numbers<[1], [0], [0], [1], [0, 0, 1, 1], [], []>} : vector<8x32xf32>, vector<32x32xf32>, vector<8x32xf32> -> vector<8x32xf32>
    %c0_264 = arith.constant 0 : index
    %c0_265 = arith.constant 0 : index
    %381 = vector.load %arg12[%c0_264, %c0_265] : memref<32x32xf32, #tpu.memory_space<vmem>>, vector<32x32xf32>
    %cst_266 = arith.constant dense<0.000000e+00> : vector<8x32xf32>
    %382 = tpu.matmul %325, %381, %cst_266 {dimension_numbers = #tpu.dot_dimension_numbers<[1], [0], [0], [1], [0, 0, 1, 1], [], []>} : vector<8x32xf32>, vector<32x32xf32>, vector<8x32xf32> -> vector<8x32xf32>
    %c0_267 = arith.constant 0 : index
    %c0_268 = arith.constant 0 : index
    %383 = vector.load %arg13[%c0_267, %c0_268] : memref<32x32xf32, #tpu.memory_space<vmem>>, vector<32x32xf32>
    %cst_269 = arith.constant dense<0.000000e+00> : vector<8x32xf32>
    %384 = tpu.matmul %325, %383, %cst_269 {dimension_numbers = #tpu.dot_dimension_numbers<[1], [0], [0], [1], [0, 0, 1, 1], [], []>} : vector<8x32xf32>, vector<32x32xf32>, vector<8x32xf32> -> vector<8x32xf32>
    %385 = arith.addf %376, %10 : vector<8x32xf32>
    %386 = arith.addf %377, %15 : vector<8x32xf32>
    %387 = arith.addf %378, %20 : vector<8x32xf32>
    %c0_270 = arith.constant 0 : index
    %c0_271 = arith.constant 0 : index
    %388 = vector.load %arg17[%c0_270, %c0_271] : memref<1x32xf32, #tpu.memory_space<vmem>>, vector<1x32xf32>
    %389 = vector.broadcast %388 : vector<1x32xf32> to vector<8x32xf32>
    %390 = arith.addf %384, %389 : vector<8x32xf32>
    %391 = arith.addf %385, %380 : vector<8x32xf32>
    %392 = arith.negf %391 : vector<8x32xf32>
    %393 = math.exp %392 : vector<8x32xf32>
    %cst_272 = arith.constant 1.000000e+00 : f32
    %394 = vector.broadcast %cst_272 : f32 to vector<8x32xf32>
    %395 = arith.addf %394, %393 : vector<8x32xf32>
    %396 = arith.divf %394, %395 : vector<8x32xf32>
    %397 = arith.addf %386, %382 : vector<8x32xf32>
    %398 = arith.negf %397 : vector<8x32xf32>
    %399 = math.exp %398 : vector<8x32xf32>
    %cst_273 = arith.constant 1.000000e+00 : f32
    %400 = vector.broadcast %cst_273 : f32 to vector<8x32xf32>
    %401 = arith.addf %400, %399 : vector<8x32xf32>
    %402 = arith.divf %400, %401 : vector<8x32xf32>
    %403 = arith.mulf %396, %390 : vector<8x32xf32>
    %404 = arith.addf %387, %403 : vector<8x32xf32>
    %405 = math.tanh %404 : vector<8x32xf32>
    %cst_274 = arith.constant 1.000000e+00 : f32
    %406 = vector.broadcast %cst_274 : f32 to vector<8x32xf32>
    %407 = arith.subf %406, %402 : vector<8x32xf32>
    %408 = arith.mulf %407, %405 : vector<8x32xf32>
    %409 = arith.mulf %402, %325 : vector<8x32xf32>
    %410 = arith.addf %408, %409 : vector<8x32xf32>
    %c0_275 = arith.constant 0 : index
    %c0_276 = arith.constant 0 : index
    %411 = vector.load %arg18[%c0_275, %c0_276] : memref<32x32xf32, #tpu.memory_space<vmem>>, vector<32x32xf32>
    %cst_277 = arith.constant dense<0.000000e+00> : vector<8x32xf32>
    %412 = tpu.matmul %410, %411, %cst_277 {dimension_numbers = #tpu.dot_dimension_numbers<[1], [0], [0], [1], [0, 0, 1, 1], [], []>} : vector<8x32xf32>, vector<32x32xf32>, vector<8x32xf32> -> vector<8x32xf32>
    %c0_278 = arith.constant 0 : index
    %c0_279 = arith.constant 0 : index
    %413 = vector.load %arg19[%c0_278, %c0_279] : memref<32x32xf32, #tpu.memory_space<vmem>>, vector<32x32xf32>
    %cst_280 = arith.constant dense<0.000000e+00> : vector<8x32xf32>
    %414 = tpu.matmul %410, %413, %cst_280 {dimension_numbers = #tpu.dot_dimension_numbers<[1], [0], [0], [1], [0, 0, 1, 1], [], []>} : vector<8x32xf32>, vector<32x32xf32>, vector<8x32xf32> -> vector<8x32xf32>
    %c0_281 = arith.constant 0 : index
    %c0_282 = arith.constant 0 : index
    %415 = vector.load %arg20[%c0_281, %c0_282] : memref<32x32xf32, #tpu.memory_space<vmem>>, vector<32x32xf32>
    %cst_283 = arith.constant dense<0.000000e+00> : vector<8x32xf32>
    %416 = tpu.matmul %410, %415, %cst_283 {dimension_numbers = #tpu.dot_dimension_numbers<[1], [0], [0], [1], [0, 0, 1, 1], [], []>} : vector<8x32xf32>, vector<32x32xf32>, vector<8x32xf32> -> vector<8x32xf32>
    %c0_284 = arith.constant 0 : index
    %c0_285 = arith.constant 0 : index
    %417 = vector.load %arg21[%c0_284, %c0_285] : memref<32x32xf32, #tpu.memory_space<vmem>>, vector<32x32xf32>
    %cst_286 = arith.constant dense<0.000000e+00> : vector<8x32xf32>
    %418 = tpu.matmul %369, %417, %cst_286 {dimension_numbers = #tpu.dot_dimension_numbers<[1], [0], [0], [1], [0, 0, 1, 1], [], []>} : vector<8x32xf32>, vector<32x32xf32>, vector<8x32xf32> -> vector<8x32xf32>
    %c0_287 = arith.constant 0 : index
    %c0_288 = arith.constant 0 : index
    %419 = vector.load %arg22[%c0_287, %c0_288] : memref<32x32xf32, #tpu.memory_space<vmem>>, vector<32x32xf32>
    %cst_289 = arith.constant dense<0.000000e+00> : vector<8x32xf32>
    %420 = tpu.matmul %369, %419, %cst_289 {dimension_numbers = #tpu.dot_dimension_numbers<[1], [0], [0], [1], [0, 0, 1, 1], [], []>} : vector<8x32xf32>, vector<32x32xf32>, vector<8x32xf32> -> vector<8x32xf32>
    %c0_290 = arith.constant 0 : index
    %c0_291 = arith.constant 0 : index
    %421 = vector.load %arg23[%c0_290, %c0_291] : memref<32x32xf32, #tpu.memory_space<vmem>>, vector<32x32xf32>
    %cst_292 = arith.constant dense<0.000000e+00> : vector<8x32xf32>
    %422 = tpu.matmul %369, %421, %cst_292 {dimension_numbers = #tpu.dot_dimension_numbers<[1], [0], [0], [1], [0, 0, 1, 1], [], []>} : vector<8x32xf32>, vector<32x32xf32>, vector<8x32xf32> -> vector<8x32xf32>
    %c0_293 = arith.constant 0 : index
    %c0_294 = arith.constant 0 : index
    %423 = vector.load %arg24[%c0_293, %c0_294] : memref<1x32xf32, #tpu.memory_space<vmem>>, vector<1x32xf32>
    %424 = vector.broadcast %423 : vector<1x32xf32> to vector<8x32xf32>
    %425 = arith.addf %412, %424 : vector<8x32xf32>
    %c0_295 = arith.constant 0 : index
    %c0_296 = arith.constant 0 : index
    %426 = vector.load %arg25[%c0_295, %c0_296] : memref<1x32xf32, #tpu.memory_space<vmem>>, vector<1x32xf32>
    %427 = vector.broadcast %426 : vector<1x32xf32> to vector<8x32xf32>
    %428 = arith.addf %414, %427 : vector<8x32xf32>
    %c0_297 = arith.constant 0 : index
    %c0_298 = arith.constant 0 : index
    %429 = vector.load %arg26[%c0_297, %c0_298] : memref<1x32xf32, #tpu.memory_space<vmem>>, vector<1x32xf32>
    %430 = vector.broadcast %429 : vector<1x32xf32> to vector<8x32xf32>
    %431 = arith.addf %416, %430 : vector<8x32xf32>
    %c0_299 = arith.constant 0 : index
    %c0_300 = arith.constant 0 : index
    %432 = vector.load %arg27[%c0_299, %c0_300] : memref<1x32xf32, #tpu.memory_space<vmem>>, vector<1x32xf32>
    %433 = vector.broadcast %432 : vector<1x32xf32> to vector<8x32xf32>
    %434 = arith.addf %422, %433 : vector<8x32xf32>
    %435 = arith.addf %425, %418 : vector<8x32xf32>
    %436 = arith.negf %435 : vector<8x32xf32>
    %437 = math.exp %436 : vector<8x32xf32>
    %cst_301 = arith.constant 1.000000e+00 : f32
    %438 = vector.broadcast %cst_301 : f32 to vector<8x32xf32>
    %439 = arith.addf %438, %437 : vector<8x32xf32>
    %440 = arith.divf %438, %439 : vector<8x32xf32>
    %441 = arith.addf %428, %420 : vector<8x32xf32>
    %442 = arith.negf %441 : vector<8x32xf32>
    %443 = math.exp %442 : vector<8x32xf32>
    %cst_302 = arith.constant 1.000000e+00 : f32
    %444 = vector.broadcast %cst_302 : f32 to vector<8x32xf32>
    %445 = arith.addf %444, %443 : vector<8x32xf32>
    %446 = arith.divf %444, %445 : vector<8x32xf32>
    %447 = arith.mulf %440, %434 : vector<8x32xf32>
    %448 = arith.addf %431, %447 : vector<8x32xf32>
    %449 = math.tanh %448 : vector<8x32xf32>
    %cst_303 = arith.constant 1.000000e+00 : f32
    %450 = vector.broadcast %cst_303 : f32 to vector<8x32xf32>
    %451 = arith.subf %450, %446 : vector<8x32xf32>
    %452 = arith.mulf %451, %449 : vector<8x32xf32>
    %453 = arith.mulf %446, %369 : vector<8x32xf32>
    %454 = arith.addf %452, %453 : vector<8x32xf32>
    %c0_304 = arith.constant 0 : index
    %c0_305 = arith.constant 0 : index
    %455 = vector.load %arg28[%c0_304, %c0_305] : memref<32x128xf32, #tpu.memory_space<vmem>>, vector<32x128xf32>
    %cst_306 = arith.constant dense<0.000000e+00> : vector<8x128xf32>
    %456 = tpu.matmul %454, %455, %cst_306 {dimension_numbers = #tpu.dot_dimension_numbers<[1], [0], [0], [1], [0, 0, 1, 1], [], []>} : vector<8x32xf32>, vector<32x128xf32>, vector<8x128xf32> -> vector<8x128xf32>
    %457 = arith.addf %456, %25 : vector<8x128xf32>
    %c4 = arith.constant 4 : index
    %c0_307 = arith.constant 0 : index
    %c0_308 = arith.constant 0 : index
    %458 = vector.load %arg31[%c4, %c0_307, %c0_308] : memref<8x8x128xf32, #tpu.memory_space<vmem>>, vector<1x8x128xf32>
    %459 = vector.shape_cast %458 : vector<1x8x128xf32> to vector<8x128xf32>
    %460 = vector.shape_cast %457 : vector<8x128xf32> to vector<1x8x128xf32>
    tpu.vector_store %arg31[%c4, %c0_307, %c0_308], %460 {strides = array<i32>} : memref<8x8x128xf32, #tpu.memory_space<vmem>>, vector<1x8x128xf32>,
    %c40 = arith.constant 40 : index
    %c0_309 = arith.constant 0 : index
    %461 = vector.load %arg32[%c40, %c0_309] : memref<64x32xf32, #tpu.memory_space<vmem>>, vector<8x32xf32>
    %c40_310 = arith.constant 40 : index
    %c0_311 = arith.constant 0 : index
    %462 = vector.load %arg33[%c40_310, %c0_311] : memref<64x32xf32, #tpu.memory_space<vmem>>, vector<8x32xf32>
    %c40_312 = arith.constant 40 : index
    %c0_313 = arith.constant 0 : index
    %463 = vector.load %arg34[%c40_312, %c0_313] : memref<64x32xf32, #tpu.memory_space<vmem>>, vector<8x32xf32>
    %c0_314 = arith.constant 0 : index
    %c0_315 = arith.constant 0 : index
    %464 = vector.load %arg11[%c0_314, %c0_315] : memref<32x32xf32, #tpu.memory_space<vmem>>, vector<32x32xf32>
    %cst_316 = arith.constant dense<0.000000e+00> : vector<8x32xf32>
    %465 = tpu.matmul %410, %464, %cst_316 {dimension_numbers = #tpu.dot_dimension_numbers<[1], [0], [0], [1], [0, 0, 1, 1], [], []>} : vector<8x32xf32>, vector<32x32xf32>, vector<8x32xf32> -> vector<8x32xf32>
    %c0_317 = arith.constant 0 : index
    %c0_318 = arith.constant 0 : index
    %466 = vector.load %arg12[%c0_317, %c0_318] : memref<32x32xf32, #tpu.memory_space<vmem>>, vector<32x32xf32>
    %cst_319 = arith.constant dense<0.000000e+00> : vector<8x32xf32>
    %467 = tpu.matmul %410, %466, %cst_319 {dimension_numbers = #tpu.dot_dimension_numbers<[1], [0], [0], [1], [0, 0, 1, 1], [], []>} : vector<8x32xf32>, vector<32x32xf32>, vector<8x32xf32> -> vector<8x32xf32>
    %c0_320 = arith.constant 0 : index
    %c0_321 = arith.constant 0 : index
    %468 = vector.load %arg13[%c0_320, %c0_321] : memref<32x32xf32, #tpu.memory_space<vmem>>, vector<32x32xf32>
    %cst_322 = arith.constant dense<0.000000e+00> : vector<8x32xf32>
    %469 = tpu.matmul %410, %468, %cst_322 {dimension_numbers = #tpu.dot_dimension_numbers<[1], [0], [0], [1], [0, 0, 1, 1], [], []>} : vector<8x32xf32>, vector<32x32xf32>, vector<8x32xf32> -> vector<8x32xf32>
    %470 = arith.addf %461, %10 : vector<8x32xf32>
    %471 = arith.addf %462, %15 : vector<8x32xf32>
    %472 = arith.addf %463, %20 : vector<8x32xf32>
    %c0_323 = arith.constant 0 : index
    %c0_324 = arith.constant 0 : index
    %473 = vector.load %arg17[%c0_323, %c0_324] : memref<1x32xf32, #tpu.memory_space<vmem>>, vector<1x32xf32>
    %474 = vector.broadcast %473 : vector<1x32xf32> to vector<8x32xf32>
    %475 = arith.addf %469, %474 : vector<8x32xf32>
    %476 = arith.addf %470, %465 : vector<8x32xf32>
    %477 = arith.negf %476 : vector<8x32xf32>
    %478 = math.exp %477 : vector<8x32xf32>
    %cst_325 = arith.constant 1.000000e+00 : f32
    %479 = vector.broadcast %cst_325 : f32 to vector<8x32xf32>
    %480 = arith.addf %479, %478 : vector<8x32xf32>
    %481 = arith.divf %479, %480 : vector<8x32xf32>
    %482 = arith.addf %471, %467 : vector<8x32xf32>
    %483 = arith.negf %482 : vector<8x32xf32>
    %484 = math.exp %483 : vector<8x32xf32>
    %cst_326 = arith.constant 1.000000e+00 : f32
    %485 = vector.broadcast %cst_326 : f32 to vector<8x32xf32>
    %486 = arith.addf %485, %484 : vector<8x32xf32>
    %487 = arith.divf %485, %486 : vector<8x32xf32>
    %488 = arith.mulf %481, %475 : vector<8x32xf32>
    %489 = arith.addf %472, %488 : vector<8x32xf32>
    %490 = math.tanh %489 : vector<8x32xf32>
    %cst_327 = arith.constant 1.000000e+00 : f32
    %491 = vector.broadcast %cst_327 : f32 to vector<8x32xf32>
    %492 = arith.subf %491, %487 : vector<8x32xf32>
    %493 = arith.mulf %492, %490 : vector<8x32xf32>
    %494 = arith.mulf %487, %410 : vector<8x32xf32>
    %495 = arith.addf %493, %494 : vector<8x32xf32>
    %c0_328 = arith.constant 0 : index
    %c0_329 = arith.constant 0 : index
    %496 = vector.load %arg18[%c0_328, %c0_329] : memref<32x32xf32, #tpu.memory_space<vmem>>, vector<32x32xf32>
    %cst_330 = arith.constant dense<0.000000e+00> : vector<8x32xf32>
    %497 = tpu.matmul %495, %496, %cst_330 {dimension_numbers = #tpu.dot_dimension_numbers<[1], [0], [0], [1], [0, 0, 1, 1], [], []>} : vector<8x32xf32>, vector<32x32xf32>, vector<8x32xf32> -> vector<8x32xf32>
    %c0_331 = arith.constant 0 : index
    %c0_332 = arith.constant 0 : index
    %498 = vector.load %arg19[%c0_331, %c0_332] : memref<32x32xf32, #tpu.memory_space<vmem>>, vector<32x32xf32>
    %cst_333 = arith.constant dense<0.000000e+00> : vector<8x32xf32>
    %499 = tpu.matmul %495, %498, %cst_333 {dimension_numbers = #tpu.dot_dimension_numbers<[1], [0], [0], [1], [0, 0, 1, 1], [], []>} : vector<8x32xf32>, vector<32x32xf32>, vector<8x32xf32> -> vector<8x32xf32>
    %c0_334 = arith.constant 0 : index
    %c0_335 = arith.constant 0 : index
    %500 = vector.load %arg20[%c0_334, %c0_335] : memref<32x32xf32, #tpu.memory_space<vmem>>, vector<32x32xf32>
    %cst_336 = arith.constant dense<0.000000e+00> : vector<8x32xf32>
    %501 = tpu.matmul %495, %500, %cst_336 {dimension_numbers = #tpu.dot_dimension_numbers<[1], [0], [0], [1], [0, 0, 1, 1], [], []>} : vector<8x32xf32>, vector<32x32xf32>, vector<8x32xf32> -> vector<8x32xf32>
    %c0_337 = arith.constant 0 : index
    %c0_338 = arith.constant 0 : index
    %502 = vector.load %arg21[%c0_337, %c0_338] : memref<32x32xf32, #tpu.memory_space<vmem>>, vector<32x32xf32>
    %cst_339 = arith.constant dense<0.000000e+00> : vector<8x32xf32>
    %503 = tpu.matmul %454, %502, %cst_339 {dimension_numbers = #tpu.dot_dimension_numbers<[1], [0], [0], [1], [0, 0, 1, 1], [], []>} : vector<8x32xf32>, vector<32x32xf32>, vector<8x32xf32> -> vector<8x32xf32>
    %c0_340 = arith.constant 0 : index
    %c0_341 = arith.constant 0 : index
    %504 = vector.load %arg22[%c0_340, %c0_341] : memref<32x32xf32, #tpu.memory_space<vmem>>, vector<32x32xf32>
    %cst_342 = arith.constant dense<0.000000e+00> : vector<8x32xf32>
    %505 = tpu.matmul %454, %504, %cst_342 {dimension_numbers = #tpu.dot_dimension_numbers<[1], [0], [0], [1], [0, 0, 1, 1], [], []>} : vector<8x32xf32>, vector<32x32xf32>, vector<8x32xf32> -> vector<8x32xf32>
    %c0_343 = arith.constant 0 : index
    %c0_344 = arith.constant 0 : index
    %506 = vector.load %arg23[%c0_343, %c0_344] : memref<32x32xf32, #tpu.memory_space<vmem>>, vector<32x32xf32>
    %cst_345 = arith.constant dense<0.000000e+00> : vector<8x32xf32>
    %507 = tpu.matmul %454, %506, %cst_345 {dimension_numbers = #tpu.dot_dimension_numbers<[1], [0], [0], [1], [0, 0, 1, 1], [], []>} : vector<8x32xf32>, vector<32x32xf32>, vector<8x32xf32> -> vector<8x32xf32>
    %c0_346 = arith.constant 0 : index
    %c0_347 = arith.constant 0 : index
    %508 = vector.load %arg24[%c0_346, %c0_347] : memref<1x32xf32, #tpu.memory_space<vmem>>, vector<1x32xf32>
    %509 = vector.broadcast %508 : vector<1x32xf32> to vector<8x32xf32>
    %510 = arith.addf %497, %509 : vector<8x32xf32>
    %c0_348 = arith.constant 0 : index
    %c0_349 = arith.constant 0 : index
    %511 = vector.load %arg25[%c0_348, %c0_349] : memref<1x32xf32, #tpu.memory_space<vmem>>, vector<1x32xf32>
    %512 = vector.broadcast %511 : vector<1x32xf32> to vector<8x32xf32>
    %513 = arith.addf %499, %512 : vector<8x32xf32>
    %c0_350 = arith.constant 0 : index
    %c0_351 = arith.constant 0 : index
    %514 = vector.load %arg26[%c0_350, %c0_351] : memref<1x32xf32, #tpu.memory_space<vmem>>, vector<1x32xf32>
    %515 = vector.broadcast %514 : vector<1x32xf32> to vector<8x32xf32>
    %516 = arith.addf %501, %515 : vector<8x32xf32>
    %c0_352 = arith.constant 0 : index
    %c0_353 = arith.constant 0 : index
    %517 = vector.load %arg27[%c0_352, %c0_353] : memref<1x32xf32, #tpu.memory_space<vmem>>, vector<1x32xf32>
    %518 = vector.broadcast %517 : vector<1x32xf32> to vector<8x32xf32>
    %519 = arith.addf %507, %518 : vector<8x32xf32>
    %520 = arith.addf %510, %503 : vector<8x32xf32>
    %521 = arith.negf %520 : vector<8x32xf32>
    %522 = math.exp %521 : vector<8x32xf32>
    %cst_354 = arith.constant 1.000000e+00 : f32
    %523 = vector.broadcast %cst_354 : f32 to vector<8x32xf32>
    %524 = arith.addf %523, %522 : vector<8x32xf32>
    %525 = arith.divf %523, %524 : vector<8x32xf32>
    %526 = arith.addf %513, %505 : vector<8x32xf32>
    %527 = arith.negf %526 : vector<8x32xf32>
    %528 = math.exp %527 : vector<8x32xf32>
    %cst_355 = arith.constant 1.000000e+00 : f32
    %529 = vector.broadcast %cst_355 : f32 to vector<8x32xf32>
    %530 = arith.addf %529, %528 : vector<8x32xf32>
    %531 = arith.divf %529, %530 : vector<8x32xf32>
    %532 = arith.mulf %525, %519 : vector<8x32xf32>
    %533 = arith.addf %516, %532 : vector<8x32xf32>
    %534 = math.tanh %533 : vector<8x32xf32>
    %cst_356 = arith.constant 1.000000e+00 : f32
    %535 = vector.broadcast %cst_356 : f32 to vector<8x32xf32>
    %536 = arith.subf %535, %531 : vector<8x32xf32>
    %537 = arith.mulf %536, %534 : vector<8x32xf32>
    %538 = arith.mulf %531, %454 : vector<8x32xf32>
    %539 = arith.addf %537, %538 : vector<8x32xf32>
    %c0_357 = arith.constant 0 : index
    %c0_358 = arith.constant 0 : index
    %540 = vector.load %arg28[%c0_357, %c0_358] : memref<32x128xf32, #tpu.memory_space<vmem>>, vector<32x128xf32>
    %cst_359 = arith.constant dense<0.000000e+00> : vector<8x128xf32>
    %541 = tpu.matmul %539, %540, %cst_359 {dimension_numbers = #tpu.dot_dimension_numbers<[1], [0], [0], [1], [0, 0, 1, 1], [], []>} : vector<8x32xf32>, vector<32x128xf32>, vector<8x128xf32> -> vector<8x128xf32>
    %542 = arith.addf %541, %25 : vector<8x128xf32>
    %c5 = arith.constant 5 : index
    %c0_360 = arith.constant 0 : index
    %c0_361 = arith.constant 0 : index
    %543 = vector.load %arg31[%c5, %c0_360, %c0_361] : memref<8x8x128xf32, #tpu.memory_space<vmem>>, vector<1x8x128xf32>
    %544 = vector.shape_cast %543 : vector<1x8x128xf32> to vector<8x128xf32>
    %545 = vector.shape_cast %542 : vector<8x128xf32> to vector<1x8x128xf32>
    tpu.vector_store %arg31[%c5, %c0_360, %c0_361], %545 {strides = array<i32>} : memref<8x8x128xf32, #tpu.memory_space<vmem>>, vector<1x8x128xf32>,
    %c48 = arith.constant 48 : index
    %c0_362 = arith.constant 0 : index
    %546 = vector.load %arg32[%c48, %c0_362] : memref<64x32xf32, #tpu.memory_space<vmem>>, vector<8x32xf32>
    %c48_363 = arith.constant 48 : index
    %c0_364 = arith.constant 0 : index
    %547 = vector.load %arg33[%c48_363, %c0_364] : memref<64x32xf32, #tpu.memory_space<vmem>>, vector<8x32xf32>
    %c48_365 = arith.constant 48 : index
    %c0_366 = arith.constant 0 : index
    %548 = vector.load %arg34[%c48_365, %c0_366] : memref<64x32xf32, #tpu.memory_space<vmem>>, vector<8x32xf32>
    %c0_367 = arith.constant 0 : index
    %c0_368 = arith.constant 0 : index
    %549 = vector.load %arg11[%c0_367, %c0_368] : memref<32x32xf32, #tpu.memory_space<vmem>>, vector<32x32xf32>
    %cst_369 = arith.constant dense<0.000000e+00> : vector<8x32xf32>
    %550 = tpu.matmul %495, %549, %cst_369 {dimension_numbers = #tpu.dot_dimension_numbers<[1], [0], [0], [1], [0, 0, 1, 1], [], []>} : vector<8x32xf32>, vector<32x32xf32>, vector<8x32xf32> -> vector<8x32xf32>
    %c0_370 = arith.constant 0 : index
    %c0_371 = arith.constant 0 : index
    %551 = vector.load %arg12[%c0_370, %c0_371] : memref<32x32xf32, #tpu.memory_space<vmem>>, vector<32x32xf32>
    %cst_372 = arith.constant dense<0.000000e+00> : vector<8x32xf32>
    %552 = tpu.matmul %495, %551, %cst_372 {dimension_numbers = #tpu.dot_dimension_numbers<[1], [0], [0], [1], [0, 0, 1, 1], [], []>} : vector<8x32xf32>, vector<32x32xf32>, vector<8x32xf32> -> vector<8x32xf32>
    %c0_373 = arith.constant 0 : index
    %c0_374 = arith.constant 0 : index
    %553 = vector.load %arg13[%c0_373, %c0_374] : memref<32x32xf32, #tpu.memory_space<vmem>>, vector<32x32xf32>
    %cst_375 = arith.constant dense<0.000000e+00> : vector<8x32xf32>
    %554 = tpu.matmul %495, %553, %cst_375 {dimension_numbers = #tpu.dot_dimension_numbers<[1], [0], [0], [1], [0, 0, 1, 1], [], []>} : vector<8x32xf32>, vector<32x32xf32>, vector<8x32xf32> -> vector<8x32xf32>
    %555 = arith.addf %546, %10 : vector<8x32xf32>
    %556 = arith.addf %547, %15 : vector<8x32xf32>
    %557 = arith.addf %548, %20 : vector<8x32xf32>
    %c0_376 = arith.constant 0 : index
    %c0_377 = arith.constant 0 : index
    %558 = vector.load %arg17[%c0_376, %c0_377] : memref<1x32xf32, #tpu.memory_space<vmem>>, vector<1x32xf32>
    %559 = vector.broadcast %558 : vector<1x32xf32> to vector<8x32xf32>
    %560 = arith.addf %554, %559 : vector<8x32xf32>
    %561 = arith.addf %555, %550 : vector<8x32xf32>
    %562 = arith.negf %561 : vector<8x32xf32>
    %563 = math.exp %562 : vector<8x32xf32>
    %cst_378 = arith.constant 1.000000e+00 : f32
    %564 = vector.broadcast %cst_378 : f32 to vector<8x32xf32>
    %565 = arith.addf %564, %563 : vector<8x32xf32>
    %566 = arith.divf %564, %565 : vector<8x32xf32>
    %567 = arith.addf %556, %552 : vector<8x32xf32>
    %568 = arith.negf %567 : vector<8x32xf32>
    %569 = math.exp %568 : vector<8x32xf32>
    %cst_379 = arith.constant 1.000000e+00 : f32
    %570 = vector.broadcast %cst_379 : f32 to vector<8x32xf32>
    %571 = arith.addf %570, %569 : vector<8x32xf32>
    %572 = arith.divf %570, %571 : vector<8x32xf32>
    %573 = arith.mulf %566, %560 : vector<8x32xf32>
    %574 = arith.addf %557, %573 : vector<8x32xf32>
    %575 = math.tanh %574 : vector<8x32xf32>
    %cst_380 = arith.constant 1.000000e+00 : f32
    %576 = vector.broadcast %cst_380 : f32 to vector<8x32xf32>
    %577 = arith.subf %576, %572 : vector<8x32xf32>
    %578 = arith.mulf %577, %575 : vector<8x32xf32>
    %579 = arith.mulf %572, %495 : vector<8x32xf32>
    %580 = arith.addf %578, %579 : vector<8x32xf32>
    %c0_381 = arith.constant 0 : index
    %c0_382 = arith.constant 0 : index
    %581 = vector.load %arg18[%c0_381, %c0_382] : memref<32x32xf32, #tpu.memory_space<vmem>>, vector<32x32xf32>
    %cst_383 = arith.constant dense<0.000000e+00> : vector<8x32xf32>
    %582 = tpu.matmul %580, %581, %cst_383 {dimension_numbers = #tpu.dot_dimension_numbers<[1], [0], [0], [1], [0, 0, 1, 1], [], []>} : vector<8x32xf32>, vector<32x32xf32>, vector<8x32xf32> -> vector<8x32xf32>
    %c0_384 = arith.constant 0 : index
    %c0_385 = arith.constant 0 : index
    %583 = vector.load %arg19[%c0_384, %c0_385] : memref<32x32xf32, #tpu.memory_space<vmem>>, vector<32x32xf32>
    %cst_386 = arith.constant dense<0.000000e+00> : vector<8x32xf32>
    %584 = tpu.matmul %580, %583, %cst_386 {dimension_numbers = #tpu.dot_dimension_numbers<[1], [0], [0], [1], [0, 0, 1, 1], [], []>} : vector<8x32xf32>, vector<32x32xf32>, vector<8x32xf32> -> vector<8x32xf32>
    %c0_387 = arith.constant 0 : index
    %c0_388 = arith.constant 0 : index
    %585 = vector.load %arg20[%c0_387, %c0_388] : memref<32x32xf32, #tpu.memory_space<vmem>>, vector<32x32xf32>
    %cst_389 = arith.constant dense<0.000000e+00> : vector<8x32xf32>
    %586 = tpu.matmul %580, %585, %cst_389 {dimension_numbers = #tpu.dot_dimension_numbers<[1], [0], [0], [1], [0, 0, 1, 1], [], []>} : vector<8x32xf32>, vector<32x32xf32>, vector<8x32xf32> -> vector<8x32xf32>
    %c0_390 = arith.constant 0 : index
    %c0_391 = arith.constant 0 : index
    %587 = vector.load %arg21[%c0_390, %c0_391] : memref<32x32xf32, #tpu.memory_space<vmem>>, vector<32x32xf32>
    %cst_392 = arith.constant dense<0.000000e+00> : vector<8x32xf32>
    %588 = tpu.matmul %539, %587, %cst_392 {dimension_numbers = #tpu.dot_dimension_numbers<[1], [0], [0], [1], [0, 0, 1, 1], [], []>} : vector<8x32xf32>, vector<32x32xf32>, vector<8x32xf32> -> vector<8x32xf32>
    %c0_393 = arith.constant 0 : index
    %c0_394 = arith.constant 0 : index
    %589 = vector.load %arg22[%c0_393, %c0_394] : memref<32x32xf32, #tpu.memory_space<vmem>>, vector<32x32xf32>
    %cst_395 = arith.constant dense<0.000000e+00> : vector<8x32xf32>
    %590 = tpu.matmul %539, %589, %cst_395 {dimension_numbers = #tpu.dot_dimension_numbers<[1], [0], [0], [1], [0, 0, 1, 1], [], []>} : vector<8x32xf32>, vector<32x32xf32>, vector<8x32xf32> -> vector<8x32xf32>
    %c0_396 = arith.constant 0 : index
    %c0_397 = arith.constant 0 : index
    %591 = vector.load %arg23[%c0_396, %c0_397] : memref<32x32xf32, #tpu.memory_space<vmem>>, vector<32x32xf32>
    %cst_398 = arith.constant dense<0.000000e+00> : vector<8x32xf32>
    %592 = tpu.matmul %539, %591, %cst_398 {dimension_numbers = #tpu.dot_dimension_numbers<[1], [0], [0], [1], [0, 0, 1, 1], [], []>} : vector<8x32xf32>, vector<32x32xf32>, vector<8x32xf32> -> vector<8x32xf32>
    %c0_399 = arith.constant 0 : index
    %c0_400 = arith.constant 0 : index
    %593 = vector.load %arg24[%c0_399, %c0_400] : memref<1x32xf32, #tpu.memory_space<vmem>>, vector<1x32xf32>
    %594 = vector.broadcast %593 : vector<1x32xf32> to vector<8x32xf32>
    %595 = arith.addf %582, %594 : vector<8x32xf32>
    %c0_401 = arith.constant 0 : index
    %c0_402 = arith.constant 0 : index
    %596 = vector.load %arg25[%c0_401, %c0_402] : memref<1x32xf32, #tpu.memory_space<vmem>>, vector<1x32xf32>
    %597 = vector.broadcast %596 : vector<1x32xf32> to vector<8x32xf32>
    %598 = arith.addf %584, %597 : vector<8x32xf32>
    %c0_403 = arith.constant 0 : index
    %c0_404 = arith.constant 0 : index
    %599 = vector.load %arg26[%c0_403, %c0_404] : memref<1x32xf32, #tpu.memory_space<vmem>>, vector<1x32xf32>
    %600 = vector.broadcast %599 : vector<1x32xf32> to vector<8x32xf32>
    %601 = arith.addf %586, %600 : vector<8x32xf32>
    %c0_405 = arith.constant 0 : index
    %c0_406 = arith.constant 0 : index
    %602 = vector.load %arg27[%c0_405, %c0_406] : memref<1x32xf32, #tpu.memory_space<vmem>>, vector<1x32xf32>
    %603 = vector.broadcast %602 : vector<1x32xf32> to vector<8x32xf32>
    %604 = arith.addf %592, %603 : vector<8x32xf32>
    %605 = arith.addf %595, %588 : vector<8x32xf32>
    %606 = arith.negf %605 : vector<8x32xf32>
    %607 = math.exp %606 : vector<8x32xf32>
    %cst_407 = arith.constant 1.000000e+00 : f32
    %608 = vector.broadcast %cst_407 : f32 to vector<8x32xf32>
    %609 = arith.addf %608, %607 : vector<8x32xf32>
    %610 = arith.divf %608, %609 : vector<8x32xf32>
    %611 = arith.addf %598, %590 : vector<8x32xf32>
    %612 = arith.negf %611 : vector<8x32xf32>
    %613 = math.exp %612 : vector<8x32xf32>
    %cst_408 = arith.constant 1.000000e+00 : f32
    %614 = vector.broadcast %cst_408 : f32 to vector<8x32xf32>
    %615 = arith.addf %614, %613 : vector<8x32xf32>
    %616 = arith.divf %614, %615 : vector<8x32xf32>
    %617 = arith.mulf %610, %604 : vector<8x32xf32>
    %618 = arith.addf %601, %617 : vector<8x32xf32>
    %619 = math.tanh %618 : vector<8x32xf32>
    %cst_409 = arith.constant 1.000000e+00 : f32
    %620 = vector.broadcast %cst_409 : f32 to vector<8x32xf32>
    %621 = arith.subf %620, %616 : vector<8x32xf32>
    %622 = arith.mulf %621, %619 : vector<8x32xf32>
    %623 = arith.mulf %616, %539 : vector<8x32xf32>
    %624 = arith.addf %622, %623 : vector<8x32xf32>
    %c0_410 = arith.constant 0 : index
    %c0_411 = arith.constant 0 : index
    %625 = vector.load %arg28[%c0_410, %c0_411] : memref<32x128xf32, #tpu.memory_space<vmem>>, vector<32x128xf32>
    %cst_412 = arith.constant dense<0.000000e+00> : vector<8x128xf32>
    %626 = tpu.matmul %624, %625, %cst_412 {dimension_numbers = #tpu.dot_dimension_numbers<[1], [0], [0], [1], [0, 0, 1, 1], [], []>} : vector<8x32xf32>, vector<32x128xf32>, vector<8x128xf32> -> vector<8x128xf32>
    %627 = arith.addf %626, %25 : vector<8x128xf32>
    %c6 = arith.constant 6 : index
    %c0_413 = arith.constant 0 : index
    %c0_414 = arith.constant 0 : index
    %628 = vector.load %arg31[%c6, %c0_413, %c0_414] : memref<8x8x128xf32, #tpu.memory_space<vmem>>, vector<1x8x128xf32>
    %629 = vector.shape_cast %628 : vector<1x8x128xf32> to vector<8x128xf32>
    %630 = vector.shape_cast %627 : vector<8x128xf32> to vector<1x8x128xf32>
    tpu.vector_store %arg31[%c6, %c0_413, %c0_414], %630 {strides = array<i32>} : memref<8x8x128xf32, #tpu.memory_space<vmem>>, vector<1x8x128xf32>,
    %c56 = arith.constant 56 : index
    %c0_415 = arith.constant 0 : index
    %631 = vector.load %arg32[%c56, %c0_415] : memref<64x32xf32, #tpu.memory_space<vmem>>, vector<8x32xf32>
    %c56_416 = arith.constant 56 : index
    %c0_417 = arith.constant 0 : index
    %632 = vector.load %arg33[%c56_416, %c0_417] : memref<64x32xf32, #tpu.memory_space<vmem>>, vector<8x32xf32>
    %c56_418 = arith.constant 56 : index
    %c0_419 = arith.constant 0 : index
    %633 = vector.load %arg34[%c56_418, %c0_419] : memref<64x32xf32, #tpu.memory_space<vmem>>, vector<8x32xf32>
    %c0_420 = arith.constant 0 : index
    %c0_421 = arith.constant 0 : index
    %634 = vector.load %arg11[%c0_420, %c0_421] : memref<32x32xf32, #tpu.memory_space<vmem>>, vector<32x32xf32>
    %cst_422 = arith.constant dense<0.000000e+00> : vector<8x32xf32>
    %635 = tpu.matmul %580, %634, %cst_422 {dimension_numbers = #tpu.dot_dimension_numbers<[1], [0], [0], [1], [0, 0, 1, 1], [], []>} : vector<8x32xf32>, vector<32x32xf32>, vector<8x32xf32> -> vector<8x32xf32>
    %c0_423 = arith.constant 0 : index
    %c0_424 = arith.constant 0 : index
    %636 = vector.load %arg12[%c0_423, %c0_424] : memref<32x32xf32, #tpu.memory_space<vmem>>, vector<32x32xf32>
    %cst_425 = arith.constant dense<0.000000e+00> : vector<8x32xf32>
    %637 = tpu.matmul %580, %636, %cst_425 {dimension_numbers = #tpu.dot_dimension_numbers<[1], [0], [0], [1], [0, 0, 1, 1], [], []>} : vector<8x32xf32>, vector<32x32xf32>, vector<8x32xf32> -> vector<8x32xf32>
    %c0_426 = arith.constant 0 : index
    %c0_427 = arith.constant 0 : index
    %638 = vector.load %arg13[%c0_426, %c0_427] : memref<32x32xf32, #tpu.memory_space<vmem>>, vector<32x32xf32>
    %cst_428 = arith.constant dense<0.000000e+00> : vector<8x32xf32>
    %639 = tpu.matmul %580, %638, %cst_428 {dimension_numbers = #tpu.dot_dimension_numbers<[1], [0], [0], [1], [0, 0, 1, 1], [], []>} : vector<8x32xf32>, vector<32x32xf32>, vector<8x32xf32> -> vector<8x32xf32>
    %640 = arith.addf %631, %10 : vector<8x32xf32>
    %641 = arith.addf %632, %15 : vector<8x32xf32>
    %642 = arith.addf %633, %20 : vector<8x32xf32>
    %c0_429 = arith.constant 0 : index
    %c0_430 = arith.constant 0 : index
    %643 = vector.load %arg17[%c0_429, %c0_430] : memref<1x32xf32, #tpu.memory_space<vmem>>, vector<1x32xf32>
    %644 = vector.broadcast %643 : vector<1x32xf32> to vector<8x32xf32>
    %645 = arith.addf %639, %644 : vector<8x32xf32>
    %646 = arith.addf %640, %635 : vector<8x32xf32>
    %647 = arith.negf %646 : vector<8x32xf32>
    %648 = math.exp %647 : vector<8x32xf32>
    %cst_431 = arith.constant 1.000000e+00 : f32
    %649 = vector.broadcast %cst_431 : f32 to vector<8x32xf32>
    %650 = arith.addf %649, %648 : vector<8x32xf32>
    %651 = arith.divf %649, %650 : vector<8x32xf32>
    %652 = arith.addf %641, %637 : vector<8x32xf32>
    %653 = arith.negf %652 : vector<8x32xf32>
    %654 = math.exp %653 : vector<8x32xf32>
    %cst_432 = arith.constant 1.000000e+00 : f32
    %655 = vector.broadcast %cst_432 : f32 to vector<8x32xf32>
    %656 = arith.addf %655, %654 : vector<8x32xf32>
    %657 = arith.divf %655, %656 : vector<8x32xf32>
    %658 = arith.mulf %651, %645 : vector<8x32xf32>
    %659 = arith.addf %642, %658 : vector<8x32xf32>
    %660 = math.tanh %659 : vector<8x32xf32>
    %cst_433 = arith.constant 1.000000e+00 : f32
    %661 = vector.broadcast %cst_433 : f32 to vector<8x32xf32>
    %662 = arith.subf %661, %657 : vector<8x32xf32>
    %663 = arith.mulf %662, %660 : vector<8x32xf32>
    %664 = arith.mulf %657, %580 : vector<8x32xf32>
    %665 = arith.addf %663, %664 : vector<8x32xf32>
    %c0_434 = arith.constant 0 : index
    %c0_435 = arith.constant 0 : index
    %666 = vector.load %arg18[%c0_434, %c0_435] : memref<32x32xf32, #tpu.memory_space<vmem>>, vector<32x32xf32>
    %cst_436 = arith.constant dense<0.000000e+00> : vector<8x32xf32>
    %667 = tpu.matmul %665, %666, %cst_436 {dimension_numbers = #tpu.dot_dimension_numbers<[1], [0], [0], [1], [0, 0, 1, 1], [], []>} : vector<8x32xf32>, vector<32x32xf32>, vector<8x32xf32> -> vector<8x32xf32>
    %c0_437 = arith.constant 0 : index
    %c0_438 = arith.constant 0 : index
    %668 = vector.load %arg19[%c0_437, %c0_438] : memref<32x32xf32, #tpu.memory_space<vmem>>, vector<32x32xf32>
    %cst_439 = arith.constant dense<0.000000e+00> : vector<8x32xf32>
    %669 = tpu.matmul %665, %668, %cst_439 {dimension_numbers = #tpu.dot_dimension_numbers<[1], [0], [0], [1], [0, 0, 1, 1], [], []>} : vector<8x32xf32>, vector<32x32xf32>, vector<8x32xf32> -> vector<8x32xf32>
    %c0_440 = arith.constant 0 : index
    %c0_441 = arith.constant 0 : index
    %670 = vector.load %arg20[%c0_440, %c0_441] : memref<32x32xf32, #tpu.memory_space<vmem>>, vector<32x32xf32>
    %cst_442 = arith.constant dense<0.000000e+00> : vector<8x32xf32>
    %671 = tpu.matmul %665, %670, %cst_442 {dimension_numbers = #tpu.dot_dimension_numbers<[1], [0], [0], [1], [0, 0, 1, 1], [], []>} : vector<8x32xf32>, vector<32x32xf32>, vector<8x32xf32> -> vector<8x32xf32>
    %c0_443 = arith.constant 0 : index
    %c0_444 = arith.constant 0 : index
    %672 = vector.load %arg21[%c0_443, %c0_444] : memref<32x32xf32, #tpu.memory_space<vmem>>, vector<32x32xf32>
    %cst_445 = arith.constant dense<0.000000e+00> : vector<8x32xf32>
    %673 = tpu.matmul %624, %672, %cst_445 {dimension_numbers = #tpu.dot_dimension_numbers<[1], [0], [0], [1], [0, 0, 1, 1], [], []>} : vector<8x32xf32>, vector<32x32xf32>, vector<8x32xf32> -> vector<8x32xf32>
    %c0_446 = arith.constant 0 : index
    %c0_447 = arith.constant 0 : index
    %674 = vector.load %arg22[%c0_446, %c0_447] : memref<32x32xf32, #tpu.memory_space<vmem>>, vector<32x32xf32>
    %cst_448 = arith.constant dense<0.000000e+00> : vector<8x32xf32>
    %675 = tpu.matmul %624, %674, %cst_448 {dimension_numbers = #tpu.dot_dimension_numbers<[1], [0], [0], [1], [0, 0, 1, 1], [], []>} : vector<8x32xf32>, vector<32x32xf32>, vector<8x32xf32> -> vector<8x32xf32>
    %c0_449 = arith.constant 0 : index
    %c0_450 = arith.constant 0 : index
    %676 = vector.load %arg23[%c0_449, %c0_450] : memref<32x32xf32, #tpu.memory_space<vmem>>, vector<32x32xf32>
    %cst_451 = arith.constant dense<0.000000e+00> : vector<8x32xf32>
    %677 = tpu.matmul %624, %676, %cst_451 {dimension_numbers = #tpu.dot_dimension_numbers<[1], [0], [0], [1], [0, 0, 1, 1], [], []>} : vector<8x32xf32>, vector<32x32xf32>, vector<8x32xf32> -> vector<8x32xf32>
    %c0_452 = arith.constant 0 : index
    %c0_453 = arith.constant 0 : index
    %678 = vector.load %arg24[%c0_452, %c0_453] : memref<1x32xf32, #tpu.memory_space<vmem>>, vector<1x32xf32>
    %679 = vector.broadcast %678 : vector<1x32xf32> to vector<8x32xf32>
    %680 = arith.addf %667, %679 : vector<8x32xf32>
    %c0_454 = arith.constant 0 : index
    %c0_455 = arith.constant 0 : index
    %681 = vector.load %arg25[%c0_454, %c0_455] : memref<1x32xf32, #tpu.memory_space<vmem>>, vector<1x32xf32>
    %682 = vector.broadcast %681 : vector<1x32xf32> to vector<8x32xf32>
    %683 = arith.addf %669, %682 : vector<8x32xf32>
    %c0_456 = arith.constant 0 : index
    %c0_457 = arith.constant 0 : index
    %684 = vector.load %arg26[%c0_456, %c0_457] : memref<1x32xf32, #tpu.memory_space<vmem>>, vector<1x32xf32>
    %685 = vector.broadcast %684 : vector<1x32xf32> to vector<8x32xf32>
    %686 = arith.addf %671, %685 : vector<8x32xf32>
    %c0_458 = arith.constant 0 : index
    %c0_459 = arith.constant 0 : index
    %687 = vector.load %arg27[%c0_458, %c0_459] : memref<1x32xf32, #tpu.memory_space<vmem>>, vector<1x32xf32>
    %688 = vector.broadcast %687 : vector<1x32xf32> to vector<8x32xf32>
    %689 = arith.addf %677, %688 : vector<8x32xf32>
    %690 = arith.addf %680, %673 : vector<8x32xf32>
    %691 = arith.negf %690 : vector<8x32xf32>
    %692 = math.exp %691 : vector<8x32xf32>
    %cst_460 = arith.constant 1.000000e+00 : f32
    %693 = vector.broadcast %cst_460 : f32 to vector<8x32xf32>
    %694 = arith.addf %693, %692 : vector<8x32xf32>
    %695 = arith.divf %693, %694 : vector<8x32xf32>
    %696 = arith.addf %683, %675 : vector<8x32xf32>
    %697 = arith.negf %696 : vector<8x32xf32>
    %698 = math.exp %697 : vector<8x32xf32>
    %cst_461 = arith.constant 1.000000e+00 : f32
    %699 = vector.broadcast %cst_461 : f32 to vector<8x32xf32>
    %700 = arith.addf %699, %698 : vector<8x32xf32>
    %701 = arith.divf %699, %700 : vector<8x32xf32>
    %702 = arith.mulf %695, %689 : vector<8x32xf32>
    %703 = arith.addf %686, %702 : vector<8x32xf32>
    %704 = math.tanh %703 : vector<8x32xf32>
    %cst_462 = arith.constant 1.000000e+00 : f32
    %705 = vector.broadcast %cst_462 : f32 to vector<8x32xf32>
    %706 = arith.subf %705, %701 : vector<8x32xf32>
    %707 = arith.mulf %706, %704 : vector<8x32xf32>
    %708 = arith.mulf %701, %624 : vector<8x32xf32>
    %709 = arith.addf %707, %708 : vector<8x32xf32>
    %c0_463 = arith.constant 0 : index
    %c0_464 = arith.constant 0 : index
    %710 = vector.load %arg28[%c0_463, %c0_464] : memref<32x128xf32, #tpu.memory_space<vmem>>, vector<32x128xf32>
    %cst_465 = arith.constant dense<0.000000e+00> : vector<8x128xf32>
    %711 = tpu.matmul %709, %710, %cst_465 {dimension_numbers = #tpu.dot_dimension_numbers<[1], [0], [0], [1], [0, 0, 1, 1], [], []>} : vector<8x32xf32>, vector<32x128xf32>, vector<8x128xf32> -> vector<8x128xf32>
    %712 = arith.addf %711, %25 : vector<8x128xf32>
    %c7 = arith.constant 7 : index
    %c0_466 = arith.constant 0 : index
    %c0_467 = arith.constant 0 : index
    %713 = vector.load %arg31[%c7, %c0_466, %c0_467] : memref<8x8x128xf32, #tpu.memory_space<vmem>>, vector<1x8x128xf32>
    %714 = vector.shape_cast %713 : vector<1x8x128xf32> to vector<8x128xf32>
    %715 = vector.shape_cast %712 : vector<8x128xf32> to vector<1x8x128xf32>
    tpu.vector_store %arg31[%c7, %c0_466, %c0_467], %715 {strides = array<i32>} : memref<8x8x128xf32, #tpu.memory_space<vmem>>, vector<1x8x128xf32>,
    return
  }
}

</mosaic_0001>

<bundles_post_ra>
// kernel: tpu_custom_call.1
= control target key start
LH: loop header
LB: loop body
LE: loop exit
PB: predicated region body
PF: predicated region fallthrough
CT: control target
= control target key end

     0   :  { %s10532_s6 = smov 1   ;;  %s10533_s10 = smov 2   ;;  %s11961_s0 = inlined_call_operand.smem [shape: u32[32], index: -1, kind: input, shape index: {}] }
   0x1   :  { %s10591_s5 = sld [smem:[%s11961_s0]]   ;;  %s10534_s14 = smov 3  }
   0x2   :  { %s10596_s9 = sld [smem:[%s11961_s0 + %s10532_s6]]   ;;  %s10535_s18 = smov 5  }
   0x3   :  { %s10601_s13 = sld [smem:[%s11961_s0 + %s10533_s10]]   ;;  %s10536_s22 = smov 6  }
   0x4   :  { %s10606_s17 = sld [smem:[%s11961_s0 + %s10534_s14]]   ;;  %s10537_s26 = smov 7  }
   0x5   :  { %s10611_s21 = sld [smem:[%s11961_s0 + %s10535_s18]]   ;;  %s10538_s30 = smov 8  }
   0x6   :  { %s10616_s25 = sld [smem:[%s11961_s0 + %s10536_s22]]   ;;  %s10539_s4 = smov 9  }
   0x7   :  { %11975 = sst [smem:[#allocation39_spill]] %s10591_s5  ;;  %s10540_s10 = smov 10  }
   0x8   :  { %s10621_s29 = sld [smem:[%s11961_s0 + %s10537_s26]]   ;;  %s10541_s15 = smov 11  }
   0x9   :  { %s10626_s3 = sld [smem:[%s11961_s0 + %s10538_s30]]   ;;  %s10542_s20 = smov 12  }
   0xa   :  { %s10631_s8 = sld [smem:[%s11961_s0 + %s10539_s4]]   ;;  %s10543_s26 = smov 13  }
   0xb   :  { %s10636_s14 = sld [smem:[%s11961_s0 + %s10540_s10]]   ;;  %s10544_s1 = smov 14  }
   0xc   :  { %s10641_s19 = sld [smem:[%s11961_s0 + %s10541_s15]]   ;;  %s10545_s7 = smov 15  }
   0xd   :  { %s10646_s24 = sld [smem:[%s11961_s0 + %s10542_s20]]   ;;  %s10546_s15 = smov 16  }
   0xe   :  { %s10651_s30 = sld [smem:[%s11961_s0 + %s10543_s26]]   ;;  %s10547_s22 = smov 17  }
   0xf   :  { %s10656_s6 = sld [smem:[%s11961_s0 + %s10544_s1]]   ;;  %s10548_s28 = smov 18  }
  0x10   :  { %s10661_s12 = sld [smem:[%s11961_s0 + %s10545_s7]]   ;;  %s10549_s7 = smov 19  }
  0x11   :  { %s10666_s20 = sld [smem:[%s11961_s0 + %s10546_s15]]   ;;  %s10550_s15 = smov 20  }
  0x12   :  { %11976 = sst [smem:[#allocation40_spill]] %s10641_s19 }
  0x13   :  { %11977 = sst [smem:[#allocation41_spill]] %s10646_s24 }
  0x14   :  { %11978 = sst [smem:[#allocation42_spill]] %s10651_s30 }
  0x15   :  { %s10671_s27 = sld [smem:[%s11961_s0 + %s10547_s22]]   ;;  %s10551_s22 = smov 21  }
  0x16   :  { %s10676_s4 = sld [smem:[%s11961_s0 + %s10548_s28]]   ;;  %s10552_s28 = smov 22  }
  0x17   :  { %s10681_s24 = sld [smem:[%s11961_s0 + %s10549_s7]]   ;;  %s10553_s7 = smov 23  }
  0x18   :  { %s10686_s30 = sld [smem:[%s11961_s0 + %s10550_s15]]   ;;  %s10554_s15 = smov 24  }
  0x19   :  { %s10691_s19 = sld [smem:[%s11961_s0 + %s10551_s22]]   ;;  %s10555_s22 = smov 25  }
  0x1c   :  { %11979 = sst [smem:[#allocation43_spill]] %s10676_s4 }
  0x1d   :  { %11980 = sst [smem:[#allocation44_spill]] %s10681_s24 }
  0x1e   :  { %11981 = sst [smem:[#allocation45_spill]] %s10686_s30 }
  0x1f   :  { %11982 = sst [smem:[#allocation46_spill]] %s10691_s19 }
  0x20   :  { %s10696_s4 = sld [smem:[%s11961_s0 + %s10552_s28]]   ;;  %s10556_s28 = smov 26  }
  0x21   :  { %s10701_s24 = sld [smem:[%s11961_s0 + %s10553_s7]]   ;;  %s10557_s7 = smov 27  }
  0x22   :  { %s10706_s30 = sld [smem:[%s11961_s0 + %s10554_s15]]   ;;  %s10558_s15 = smov 28  }
  0x23   :  { %s10711_s19 = sld [smem:[%s11961_s0 + %s10555_s22]]   ;;  %s10559_s22 = smov 29  }
  0x26   :  { %11983 = sst [smem:[#allocation47_spill]] %s10696_s4 }
  0x27   :  { %11984 = sst [smem:[#allocation48_spill]] %s10701_s24 }
  0x28   :  { %11985 = sst [smem:[#allocation49_spill]] %s10706_s30 }
  0x29   :  { %11986 = sst [smem:[#allocation50_spill]] %s10711_s19 }
  0x2a   :  { %s10716_s4 = sld [smem:[%s11961_s0 + %s10556_s28]]   ;;  %s10560_s28 = smov 30  }
  0x2b   :  { %s10721_s24 = sld [smem:[%s11961_s0 + %s10557_s7]]   ;;  %s10561_s7 = smov 31  }
  0x2c   :  { %s10726_s30 = sld [smem:[%s11961_s0 + %s10558_s15]]  }
  0x2d   :  { %s10731_s19 = sld [smem:[%s11961_s0 + %s10559_s22]]  }
  0x2e   :  { %s10736_s5 = sld [smem:[%s11961_s0 + %s10560_s28]]  }
  0x31   :  { %11987 = sst [smem:[#allocation51_spill]] %s10721_s24 }
  0x32   :  { %s10741_s24 = sld [smem:[%s11961_s0 + %s10561_s7]]  }
  0x33   :  { %68 = vsyncpa [#allocation6], 0 }
  0x34   :  { %69 = vsyncpa [#allocation9], 0 }
  0x35   :  { %70 = vsyncpa [#allocation12], 0 }
  0x36   :  { %71 = vsyncpa [#allocation15], 0 }
  0x37   :  { %72 = vsyncpa [#allocation18], 0 }
  0x38   :  { %73 = vsyncpa [#allocation21], 0 }
  0x39   :  { %74 = vsyncpa [#allocation24], 0 }
  0x3a   :  { %75 = vsyncpa [#allocation27], 0 }
  0x3b   :  { %76 = vsyncpa [#allocation7], 0  ;;  %s10562_s15 = smov [#allocation8]   ;;  %s10162_s18 = scalar_lea.hbm %s10601_s13, 256 }
  0x3c   :  { %s94_s16 = sshll.u32 %s10562_s15, 4  ;;  %p10163_p0 = scmp.ne.s32.totalorder %s10601_s13, %s10162_s18  ;;  %s95_s16 = int_to_ptr.vmem [resolvable:$true] %s94_s16 }
  0x3d   :  { %p10166_p1 = scmp.lt.u32.totalorder %s10162_s18, %s10601_s13 }
  0x3f   :  { %p10168_p2 = pnand %p10166_p1, %p10163_p0 }
  0x41   :  { %10171 = shalt.err (!%p10168_p2)
}
  0x42   :  { %s10172_s0 = scalar_lea.vmem %s95_s16, 256  ;;  %p10177_p4 = scmp.lt.s32.totalorder %s95_s16, %s95_s16 }
  0x43   :  { %p10173_p3 = scmp.ne.s32.totalorder %s95_s16, %s10172_s0  ;;  %p10178_p5 = scmp.lt.s32.totalorder %s10172_s0, %s10172_s0 }
  0x45   :  { %p10179_p6 = por %p10178_p5, %p10177_p4 }
  0x47   :  { %p10180_p7 = pnand %p10179_p6, %p10173_p3 }
  0x49   :  { %10183 = shalt.err (!%p10180_p7)
}
  0x4a   :  { %s10563_s22 = smov 128   ;;  %s10564_s23 = smov 8  }
  0x4b   :  { %100 = dma.hbm_to_vmem [thread:$0]  %s10601_s13, 256, %s95_s16, [#allocation9], %s10563_s22, %s10563_s22, %s10564_s23  }
  0x4c   :  { %s10565_s26 = smov [#allocation11]   ;;  %s10566_s1 = smov [#allocation14]  }
  0x4d   :  { %s118_s28 = sshll.u32 %s10565_s26, 4  ;;  %s142_s2 = sshll.u32 %s10566_s1, 4  ;;  %s119_s28 = int_to_ptr.vmem [resolvable:$true] %s118_s28  ;;  %s143_s2 = int_to_ptr.vmem [resolvable:$true] %s142_s2 }
  0x4e   :  { %s10184_s7 = scalar_lea.hbm %s10611_s21, 256 }
  0x4f   :  { %p10185_p8 = scmp.ne.s32.totalorder %s10611_s21, %s10184_s7  ;;  %p10188_p9 = scmp.lt.u32.totalorder %s10184_s7, %s10611_s21 }
  0x51   :  { %p10190_p10 = pnand %p10188_p9, %p10185_p8 }
  0x53   :  { %10193 = shalt.err (!%p10190_p10)
}
  0x54   :  { %s10194_s10 = scalar_lea.vmem %s119_s28, 256  ;;  %p10199_p12 = scmp.lt.s32.totalorder %s119_s28, %s119_s28 }
  0x55   :  { %p10195_p11 = scmp.ne.s32.totalorder %s119_s28, %s10194_s10  ;;  %p10200_p13 = scmp.lt.s32.totalorder %s10194_s10, %s10194_s10 }
  0x57   :  { %p10201_p0 = por %p10200_p13, %p10199_p12 }
  0x59   :  { %p10202_p1 = pnand %p10201_p0, %p10195_p11 }
  0x5b   :  { %10205 = shalt.err (!%p10202_p1)
}
  0x5c   :  { %124 = dma.hbm_to_vmem [thread:$0]  %s10611_s21, 256, %s119_s28, [#allocation12], %s10563_s22, %s10563_s22, %s10564_s23  }
  0x5d   :  { %s10206_s13 = scalar_lea.hbm %s10621_s29, 256 }
  0x5e   :  { %p10207_p2 = scmp.ne.s32.totalorder %s10621_s29, %s10206_s13  ;;  %p10210_p3 = scmp.lt.u32.totalorder %s10206_s13, %s10621_s29 }
  0x60   :  { %p10212_p4 = pnand %p10210_p3, %p10207_p2 }
  0x62   :  { %10215 = shalt.err (!%p10212_p4)
}
  0x63   :  { %s10216_s11 = scalar_lea.vmem %s143_s2, 256  ;;  %p10221_p6 = scmp.lt.s32.totalorder %s143_s2, %s143_s2 }
  0x64   :  { %p10217_p5 = scmp.ne.s32.totalorder %s143_s2, %s10216_s11  ;;  %p10222_p7 = scmp.lt.s32.totalorder %s10216_s11, %s10216_s11 }
  0x66   :  { %p10223_p8 = por %p10222_p7, %p10221_p6 }
  0x68   :  { %p10224_p9 = pnand %p10223_p8, %p10217_p5 }
  0x6a   :  { %10227 = shalt.err (!%p10224_p9)
}
  0x6b   :  { %148 = dma.hbm_to_vmem [thread:$0]  %s10621_s29, 256, %s143_s2, [#allocation15], %s10563_s22, %s10563_s22, %s10564_s23  }
  0x6c   :  { %s10567_s21 = smov [#allocation17]   ;;  %s10568_s16 = smov [#allocation20]  }
  0x6d   :  { %s166_s15 = sshll.u32 %s10567_s21, 4  ;;  %s197_s18 = sshll.u32 %s10568_s16, 4  ;;  %s167_s15 = int_to_ptr.vmem [resolvable:$true] %s166_s15  ;;  %s198_s18 = int_to_ptr.vmem [resolvable:$true] %s197_s18 }
  0x6e   :  { %s10228_s0 = scalar_lea.hbm %s10631_s8, 256 }
  0x6f   :  { %p10229_p10 = scmp.ne.s32.totalorder %s10631_s8, %s10228_s0  ;;  %p10232_p11 = scmp.lt.u32.totalorder %s10228_s0, %s10631_s8 }
  0x71   :  { %p10234_p12 = pnand %p10232_p11, %p10229_p10 }
  0x73   :  { %10237 = shalt.err (!%p10234_p12)
}
  0x74   :  { %s10238_s26 = scalar_lea.vmem %s167_s15, 256  ;;  %p10243_p0 = scmp.lt.s32.totalorder %s167_s15, %s167_s15 }
  0x75   :  { %p10239_p13 = scmp.ne.s32.totalorder %s167_s15, %s10238_s26  ;;  %p10244_p1 = scmp.lt.s32.totalorder %s10238_s26, %s10238_s26 }
  0x77   :  { %p10245_p2 = por %p10244_p1, %p10243_p0 }
  0x79   :  { %p10246_p3 = pnand %p10245_p2, %p10239_p13 }
  0x7b   :  { %10249 = shalt.err (!%p10246_p3)
}
  0x7c   :  { %172 = dma.hbm_to_vmem [thread:$0]  %s10631_s8, 256, %s167_s15, [#allocation18], %s10563_s22, %s10563_s22, %s10564_s23  }
  0x7d   :  { %s10250_s29 = scalar_lea.hbm %s10656_s6, 16 }
  0x7e   :  { %p10251_p4 = scmp.ne.s32.totalorder %s10656_s6, %s10250_s29  ;;  %p10254_p5 = scmp.lt.u32.totalorder %s10250_s29, %s10656_s6 }
  0x80   :  { %p10256_p6 = pnand %p10254_p5, %p10251_p4 }
  0x82   :  { %10259 = shalt.err (!%p10256_p6)
}
  0x83   :  { %s10260_s28 = scalar_lea.vmem %s198_s18, 16  ;;  %s10264_s1 = scalar_lea.vmem %s198_s18, 32 }
  0x84   :  { %p10261_p7 = scmp.ne.s32.totalorder %s198_s18, %s10260_s28  ;;  %p10265_p8 = scmp.lt.s32.totalorder %s198_s18, %s198_s18 }
  0x85   :  { %p10266_p9 = scmp.lt.s32.totalorder %s10264_s1, %s10260_s28 }
  0x87   :  { %p10267_p10 = por %p10266_p9, %p10265_p8 }
  0x89   :  { %p10268_p11 = pnand %p10267_p10, %p10261_p7 }
  0x8b   :  { %10271 = shalt.err (!%p10268_p11)
}
  0x8c   :  { %200 = dma.hbm_to_vmem [thread:$0]  %s10656_s6, 16, %s198_s18, [#allocation21]  }
  0x8d   :  { %s10569_s8 = smov [#allocation23]   ;;  %s10570_s7 = smov [#allocation26]  }
  0x8e   :  { %s217_s2 = sshll.u32 %s10569_s8, 4  ;;  %s253_s10 = sshll.u32 %s10570_s7, 4  ;;  %s218_s2 = int_to_ptr.vmem [resolvable:$true] %s217_s2  ;;  %s254_s10 = int_to_ptr.vmem [resolvable:$true] %s253_s10 }
  0x8f   :  { %s10272_s13 = scalar_lea.hbm %s10666_s20, 16 }
  0x90   :  { %p10273_p12 = scmp.ne.s32.totalorder %s10666_s20, %s10272_s13  ;;  %p10276_p13 = scmp.lt.u32.totalorder %s10272_s13, %s10666_s20 }
  0x92   :  { %p10278_p0 = pnand %p10276_p13, %p10273_p12 }
  0x94   :  { %10281 = shalt.err (!%p10278_p0)
}
  0x95   :  { %s10282_s11 = scalar_lea.vmem %s218_s2, 16  ;;  %s10286_s21 = scalar_lea.vmem %s218_s2, 32 }
  0x96   :  { %p10283_p1 = scmp.ne.s32.totalorder %s218_s2, %s10282_s11  ;;  %p10287_p2 = scmp.lt.s32.totalorder %s218_s2, %s218_s2 }
  0x97   :  { %p10288_p3 = scmp.lt.s32.totalorder %s10286_s21, %s10282_s11 }
  0x99   :  { %p10289_p4 = por %p10288_p3, %p10287_p2 }
  0x9b   :  { %p10290_p5 = pnand %p10289_p4, %p10283_p1 }
  0x9d   :  { %10293 = shalt.err (!%p10290_p5)
}
  0x9e   :  { %220 = dma.hbm_to_vmem [thread:$0]  %s10666_s20, 16, %s218_s2, [#allocation24]  }
  0x9f   :  { %s10294_s6 = scalar_lea.hbm %s10716_s4, 16 }
  0xa0   :  { %p10295_p6 = scmp.ne.s32.totalorder %s10716_s4, %s10294_s6  ;;  %p10298_p7 = scmp.lt.u32.totalorder %s10294_s6, %s10716_s4 }
  0xa2   :  { %p10300_p8 = pnand %p10298_p7, %p10295_p6 }
  0xa4   :  { %10303 = shalt.err (!%p10300_p8)
}
  0xa5   :  { %s10304_s15 = scalar_lea.vmem %s254_s10, 16  ;;  %s10308_s16 = scalar_lea.vmem %s254_s10, 32 }
  0xa6   :  { %p10305_p9 = scmp.ne.s32.totalorder %s254_s10, %s10304_s15  ;;  %p10309_p10 = scmp.lt.s32.totalorder %s254_s10, %s254_s10 }
  0xa7   :  { %p10310_p11 = scmp.lt.s32.totalorder %s10308_s16, %s10304_s15 }
  0xa9   :  { %p10311_p12 = por %p10310_p11, %p10309_p10 }
  0xab   :  { %p10312_p13 = pnand %p10311_p12, %p10305_p9 }
  0xad   :  { %10315 = shalt.err (!%p10312_p13)
}
  0xae   :  { %256 = dma.hbm_to_vmem [thread:$0]  %s10716_s4, 16, %s254_s10, [#allocation27]  }
  0xaf   :  { %s10571_s20 = smov [#allocation5]   ;;  %s10572_s0 = smov [#allocation10]  }
  0xb0   :  { %s85_s18 = sshll.u32 %s10571_s20, 4  ;;  %s107_s26 = sshll.u32 %s10572_s0, 4  ;;  %s86_s18 = int_to_ptr.vmem [resolvable:$true] %s85_s18  ;;  %s108_s26 = int_to_ptr.vmem [resolvable:$true] %s107_s26 }
  0xb1   :  { %s10316_s29 = scalar_lea.hbm %s10596_s9, 128 }
  0xb2   :  { %p10317_p0 = scmp.ne.s32.totalorder %s10596_s9, %s10316_s29  ;;  %p10320_p1 = scmp.lt.u32.totalorder %s10316_s29, %s10596_s9 }
  0xb4   :  { %p10322_p2 = pnand %p10320_p1, %p10317_p0 }
  0xb6   :  { %10325 = shalt.err (!%p10322_p2)
}
  0xb7   :  { %s10326_s28 = scalar_lea.vmem %s86_s18, 128  ;;  %p10331_p4 = scmp.lt.s32.totalorder %s86_s18, %s86_s18 }
  0xb8   :  { %p10327_p3 = scmp.ne.s32.totalorder %s86_s18, %s10326_s28  ;;  %p10332_p5 = scmp.lt.s32.totalorder %s10326_s28, %s10326_s28 }
  0xba   :  { %p10333_p6 = por %p10332_p5, %p10331_p4 }
  0xbc   :  { %p10334_p7 = pnand %p10333_p6, %p10327_p3 }
  0xbe   :  { %10337 = shalt.err (!%p10334_p7)
}
  0xbf   :  { %88 = dma.hbm_to_vmem [thread:$0]  %s10596_s9, 128, %s86_s18, [#allocation6]  }
  0xc0   :  { %s10338_s4 = scalar_lea.hbm %s10606_s17, 16 }
  0xc1   :  { %p10339_p8 = scmp.ne.s32.totalorder %s10606_s17, %s10338_s4  ;;  %p10342_p9 = scmp.lt.u32.totalorder %s10338_s4, %s10606_s17 }
  0xc3   :  { %p10344_p10 = pnand %p10342_p9, %p10339_p8 }
  0xc5   :  { %10347 = shalt.err (!%p10344_p10)
}
  0xc6   :  { %s10348_s1 = scalar_lea.vmem %s108_s26, 16  ;;  %s10352_s8 = scalar_lea.vmem %s108_s26, 32 }
  0xc7   :  { %p10349_p11 = scmp.ne.s32.totalorder %s108_s26, %s10348_s1  ;;  %p10353_p12 = scmp.lt.s32.totalorder %s108_s26, %s108_s26 }
  0xc8   :  { %p10354_p13 = scmp.lt.s32.totalorder %s10352_s8, %s10348_s1 }
  0xca   :  { %p10355_p0 = por %p10354_p13, %p10353_p12 }
  0xcc   :  { %p10356_p1 = pnand %p10355_p0, %p10349_p11 }
  0xce   :  { %10359 = shalt.err (!%p10356_p1)
}
  0xcf   :  { %110 = dma.hbm_to_vmem [thread:$0]  %s10606_s17, 16, %s108_s26, [#allocation9]  }
  0xd0   :  { %s10573_s9 = smov [#allocation13]   ;;  %s10574_s7 = smov [#allocation16]  }
  0xd1   :  { %s130_s2 = sshll.u32 %s10573_s9, 4  ;;  %s154_s10 = sshll.u32 %s10574_s7, 4  ;;  %s131_s2 = int_to_ptr.vmem [resolvable:$true] %s130_s2  ;;  %s155_s10 = int_to_ptr.vmem [resolvable:$true] %s154_s10 }
  0xd2   :  { %s10360_s13 = scalar_lea.hbm %s10616_s25, 256 }
  0xd3   :  { %p10361_p2 = scmp.ne.s32.totalorder %s10616_s25, %s10360_s13  ;;  %p10364_p3 = scmp.lt.u32.totalorder %s10360_s13, %s10616_s25 }
  0xd5   :  { %p10366_p4 = pnand %p10364_p3, %p10361_p2 }
  0xd7   :  { %10369 = shalt.err (!%p10366_p4)
}
  0xd8   :  { %s10370_s11 = scalar_lea.vmem %s131_s2, 256  ;;  %p10375_p6 = scmp.lt.s32.totalorder %s131_s2, %s131_s2 }
  0xd9   :  { %p10371_p5 = scmp.ne.s32.totalorder %s131_s2, %s10370_s11  ;;  %p10376_p7 = scmp.lt.s32.totalorder %s10370_s11, %s10370_s11 }
  0xdb   :  { %p10377_p8 = por %p10376_p7, %p10375_p6 }
  0xdd   :  { %p10378_p9 = pnand %p10377_p8, %p10371_p5 }
  0xdf   :  { %10381 = shalt.err (!%p10378_p9)
}
  0xe0   :  { %136 = dma.hbm_to_vmem [thread:$0]  %s10616_s25, 256, %s131_s2, [#allocation12], %s10563_s22, %s10563_s22, %s10564_s23  }
  0xe1   :  { %s10382_s17 = scalar_lea.hbm %s10626_s3, 256 }
  0xe2   :  { %p10383_p10 = scmp.ne.s32.totalorder %s10626_s3, %s10382_s17  ;;  %p10386_p11 = scmp.lt.u32.totalorder %s10382_s17, %s10626_s3 }
  0xe4   :  { %p10388_p12 = pnand %p10386_p11, %p10383_p10 }
  0xe6   :  { %10391 = shalt.err (!%p10388_p12)
}
  0xe7   :  { %s10392_s21 = scalar_lea.vmem %s155_s10, 256  ;;  %p10397_p0 = scmp.lt.s32.totalorder %s155_s10, %s155_s10 }
  0xe8   :  { %p10393_p13 = scmp.ne.s32.totalorder %s155_s10, %s10392_s21  ;;  %p10398_p1 = scmp.lt.s32.totalorder %s10392_s21, %s10392_s21 }
  0xea   :  { %p10399_p2 = por %p10398_p1, %p10397_p0 }
  0xec   :  { %p10400_p3 = pnand %p10399_p2, %p10393_p13 }
  0xee   :  { %10403 = shalt.err (!%p10400_p3)
}
  0xef   :  { %160 = dma.hbm_to_vmem [thread:$0]  %s10626_s3, 256, %s155_s10, [#allocation15], %s10563_s22, %s10563_s22, %s10564_s23  }
  0xf0   :  { %s10575_s25 = smov [#allocation19]   ;;  %s10576_s15 = smov [#allocation22]  }
  0xf1   :  { %s178_s6 = sshll.u32 %s10575_s25, 4  ;;  %s207_s16 = sshll.u32 %s10576_s15, 4  ;;  %s179_s6 = int_to_ptr.vmem [resolvable:$true] %s178_s6  ;;  %s208_s16 = int_to_ptr.vmem [resolvable:$true] %s207_s16 }
  0xf2   :  { %s10404_s20 = scalar_lea.hbm %s10636_s14, 256 }
  0xf3   :  { %p10405_p4 = scmp.ne.s32.totalorder %s10636_s14, %s10404_s20  ;;  %p10408_p5 = scmp.lt.u32.totalorder %s10404_s20, %s10636_s14 }
  0xf5   :  { %p10410_p6 = pnand %p10408_p5, %p10405_p4 }
  0xf7   :  { %10413 = shalt.err (!%p10410_p6)
}
  0xf8   :  { %s10414_s18 = scalar_lea.vmem %s179_s6, 256  ;;  %p10419_p8 = scmp.lt.s32.totalorder %s179_s6, %s179_s6 }
  0xf9   :  { %p10415_p7 = scmp.ne.s32.totalorder %s179_s6, %s10414_s18  ;;  %p10420_p9 = scmp.lt.s32.totalorder %s10414_s18, %s10414_s18 }
  0xfb   :  { %p10421_p10 = por %p10420_p9, %p10419_p8 }
  0xfd   :  { %p10422_p11 = pnand %p10421_p10, %p10415_p7 }
  0xff   :  { %10425 = shalt.err (!%p10422_p11)
}
 0x100   :  { %184 = dma.hbm_to_vmem [thread:$0]  %s10636_s14, 256, %s179_s6, [#allocation18], %s10563_s22, %s10563_s22, %s10564_s23  }
 0x101   :  { %s10426_s3 = scalar_lea.hbm %s10661_s12, 16 }
 0x102   :  { %p10427_p12 = scmp.ne.s32.totalorder %s10661_s12, %s10426_s3  ;;  %p10430_p13 = scmp.lt.u32.totalorder %s10426_s3, %s10661_s12 }
 0x104   :  { %p10432_p0 = pnand %p10430_p13, %p10427_p12 }
 0x106   :  { %10435 = shalt.err (!%p10432_p0)
}
 0x107   :  { %s10436_s0 = scalar_lea.vmem %s208_s16, 16  ;;  %s10440_s26 = scalar_lea.vmem %s208_s16, 32 }
 0x108   :  { %p10437_p1 = scmp.ne.s32.totalorder %s208_s16, %s10436_s0  ;;  %p10441_p2 = scmp.lt.s32.totalorder %s208_s16, %s208_s16 }
 0x109   :  { %p10442_p3 = scmp.lt.s32.totalorder %s10440_s26, %s10436_s0 }
 0x10b   :  { %p10443_p4 = por %p10442_p3, %p10441_p2 }
 0x10d   :  { %p10444_p5 = pnand %p10443_p4, %p10437_p1 }
 0x10f   :  { %10447 = shalt.err (!%p10444_p5)
}
 0x110   :  { %210 = dma.hbm_to_vmem [thread:$0]  %s10661_s12, 16, %s208_s16, [#allocation21]  }
 0x111   :  { %s10577_s14 = smov [#allocation25]   ;;  %s10578_s28 = smov [#allocation28]  }
 0x112   :  { %s227_s29 = sshll.u32 %s10577_s14, 4  ;;  %s266_s4 = sshll.u32 %s10578_s28, 4  ;;  %s228_s29 = int_to_ptr.vmem [resolvable:$true] %s227_s29  ;;  %s267_s4 = int_to_ptr.vmem [resolvable:$true] %s266_s4 }
 0x113   :  { %s10448_s1 = scalar_lea.hbm %s10671_s27, 16 }
 0x114   :  { %p10449_p6 = scmp.ne.s32.totalorder %s10671_s27, %s10448_s1  ;;  %p10452_p7 = scmp.lt.u32.totalorder %s10448_s1, %s10671_s27 }
 0x116   :  { %p10454_p8 = pnand %p10452_p7, %p10449_p6 }
 0x118   :  { %10457 = shalt.err (!%p10454_p8)
}
 0x119   :  { %s10458_s8 = scalar_lea.vmem %s228_s29, 16  ;;  %s10462_s9 = scalar_lea.vmem %s228_s29, 32 }
 0x11a   :  { %p10459_p9 = scmp.ne.s32.totalorder %s228_s29, %s10458_s8  ;;  %p10463_p10 = scmp.lt.s32.totalorder %s228_s29, %s228_s29 }
 0x11b   :  { %p10464_p11 = scmp.lt.s32.totalorder %s10462_s9, %s10458_s8 }
 0x11d   :  { %p10465_p12 = por %p10464_p11, %p10463_p10 }
 0x11f   :  { %p10466_p13 = pnand %p10465_p12, %p10459_p9 }
 0x121   :  { %10469 = shalt.err (!%p10466_p13)
}
 0x122   :  { %230 = dma.hbm_to_vmem [thread:$0]  %s10671_s27, 16, %s228_s29, [#allocation24]  }
 0x123   :  { %s10470_s12 = scalar_lea.hbm %s10731_s19, 256 }
 0x124   :  { %p10471_p0 = scmp.ne.s32.totalorder %s10731_s19, %s10470_s12  ;;  %p10474_p1 = scmp.lt.u32.totalorder %s10470_s12, %s10731_s19 }
 0x126   :  { %p10476_p2 = pnand %p10474_p1, %p10471_p0 }
 0x128   :  { %10479 = shalt.err (!%p10476_p2)
}
 0x129   :  { %s10480_s2 = scalar_lea.vmem %s267_s4, 256  ;;  %p10485_p4 = scmp.lt.s32.totalorder %s267_s4, %s267_s4 }
 0x12a   :  { %p10481_p3 = scmp.ne.s32.totalorder %s267_s4, %s10480_s2  ;;  %p10486_p5 = scmp.lt.s32.totalorder %s10480_s2, %s10480_s2 }
 0x12c   :  { %p10487_p6 = por %p10486_p5, %p10485_p4 }
 0x12e   :  { %p10488_p7 = pnand %p10487_p6, %p10481_p3 }
 0x130   :  { %10491 = shalt.err (!%p10488_p7)
}
 0x131   :  { %272 = dma.hbm_to_vmem [thread:$0]  %s10731_s19, 256, %s267_s4, [#allocation27], %s10563_s22, %s10563_s22, %s10564_s23  }
 0x132   :  { %10514 = dma.done.wait [#allocation6], 128  }
 0x133   :  { %10515 = vsyncadd [#allocation6], 4294967168 }
 0x134   :  { %10516 = dma.done.wait [#allocation9], 272  }
 0x135   :  { %10517 = vsyncadd [#allocation9], 4294967024 }
 0x136   :  { %10518 = dma.done.wait [#allocation12], 512  }
 0x137   :  { %10519 = vsyncadd [#allocation12], 4294966784 }
 0x138   :  { %10520 = dma.done.wait [#allocation15], 512  }
 0x139   :  { %10521 = vsyncadd [#allocation15], 4294966784 }
 0x13a   :  { %10522 = dma.done.wait [#allocation18], 512  }
 0x13b   :  { %10523 = vsyncadd [#allocation18], 4294966784 }
 0x13c   :  { %10524 = dma.done.wait [#allocation21], 32  }
 0x13d   :  { %10525 = vsyncadd [#allocation21], 4294967264 }
 0x13e   :  { %10526 = dma.done.wait [#allocation24], 32  }
 0x13f   :  { %10527 = vsyncadd [#allocation24], 4294967264 }
 0x140   :  { %10528 = dma.done.wait [#allocation27], 272  }
 0x141   :  { %10529 = vsyncadd [#allocation27], 4294967024  ;;  %v10579_v0 = vmov 0.0|0.0   ;;  %vm10580_vm0 = vmmov 0   ;;  %v10581_v1 = vmov 0.0   ;;  %v321_v2 = vld [vmem:[#allocation8] sm:$0xff] }
 0x142   :  { %9396 = vmatprep.subr.bf16.mxu0 %v10579_v0  ;;  %8437 = vmatprep.mubr.msk.f32.mxu0 %vm10580_vm0, %v10581_v1  ;;  %v322_v3 = vld [vmem:[#allocation8 + $0x8] sm:$0xff]  ;;  %v483_v10 = vld [vmem:[#allocation17] sm:$0xff]  ;;  %v484_v11 = vld [vmem:[#allocation17 + $0x8] sm:$0xff]  ;;  %vm330_vm1 = vcmask 130048   ;;  %s11988_s19 = sld [smem:[#allocation39_spill]]  ;;  %s11989_s27 = sld [smem:[#allocation40_spill]] }
 0x143   :  { %9399 = vmatprep.subr.bf16.mxu1 %v10579_v0  ;;  %8444 = vmatprep.mubr.msk.f32.mxu1 %vm10580_vm0, %v10581_v1  ;;  %v9397_v4 = vpack.c.bf16 %v322_v3, %v321_v2  ;;  %v404_v5 = vld [vmem:[#allocation16] sm:$0xff]  ;;  %v405_v6 = vld [vmem:[#allocation16 + $0x8] sm:$0xff]  ;;  %v320_v12 = vld [vmem:[#allocation5] sm:$0xff]  ;;  %v9403_v13 = vpack.c.bf16 %v484_v11, %v483_v10  ;;  %s11990_s7 = sld [smem:[#allocation42_spill]]  ;;  %s11991_s10 = sld [smem:[#allocation41_spill]]  ;;  %vm859_vm2 = vcmask 261120  }
 0x144   :  { %v562_v7 = vld [vmem:[#allocation19] sm:$0xff]  ;;  %v9400_v8 = vpack.c.bf16 %v405_v6, %v404_v5  ;;  %v563_v9 = vld [vmem:[#allocation19 + $0x8] sm:$0xff]  ;;  %v728_v14 = vld [vmem:[#allocation11] sm:$0xff]  ;;  %s11992_s13 = sld [smem:[#allocation47_spill]]  ;;  %s11993_s11 = sld [smem:[#allocation46_spill]] }
 0x145   :  { %9398 = vmatpush3.bf16.msra.mxu0 %v9397_v4  ;;  %v729_v15 = vld [vmem:[#allocation11 + $0x8] sm:$0xff]  ;;  %v9406_v16 = vpack.c.bf16 %v563_v9, %v562_v7  ;;  %v642_v18 = vld [vmem:[#allocation28 + $0x8] sm:$0xff]  ;;  %v983_v23 = vld [vmem:[#allocation14] sm:$0xff]  ;;  %s11994_s17 = sld [smem:[#allocation43_spill]]  ;;  %s11995_s21 = sld [smem:[#allocation44_spill]] }
 0x146   :  { %9401 = vmatpush3.bf16.msra.mxu1 %v9400_v8  ;;  %9402 = vmatprep.subr.bf16.mxu0 %v10579_v0  ;;  %v641_v17 = vld [vmem:[#allocation28] sm:$0xff]  ;;  %v9411_v19 = vpack.c.bf16 %v729_v15, %v728_v14  ;;  %v869_v21 = vld [vmem:[#allocation13 + $0x8] sm:$0xff]  ;;  %s11996_s25 = sld [smem:[#allocation45_spill]]  ;;  %s11997_s6 = sld [smem:[#allocation48_spill]] }
 0x147   :  { %9405 = vmatprep.subr.bf16.mxu1 %v10579_v0  ;;  %v868_v20 = vld [vmem:[#allocation13] sm:$0xff]  ;;  %v9409_v22 = vpack.c.bf16 %v642_v18, %v641_v17  ;;  %v984_v24 = vld [vmem:[#allocation14 + $0x8] sm:$0xff]  ;;  %v7802_v51 = vld [vmem:[#allocation10] ss:$0 sm:$0xff]  ;;  %s11998_s15 = sld [smem:[#allocation49_spill]]  ;;  %s11999_s16 = sld [smem:[#allocation50_spill]] }
 0x148   :  { %8438 = vmatmul.mubr.msk.f32.vlgmr.msra.gmra.mrb[0].mxu0 %vm330_vm1, %v320_v12  ;;  %v720_v25 = vld [vmem:[%s11988_s19] sm:$0xff]  ;;  %v9415_v26 = vpack.c.bf16 %v869_v21, %v868_v20  ;;  %v9419_v27 = vpack.c.bf16 %v984_v24, %v983_v23  ;;  %v721_v28 = vld [vmem:[%s11988_s19 + $0x8] sm:$0xff]  ;;  %v722_v29 = vld [vmem:[%s11988_s19 + $0x10] sm:$0xff]  ;;  %s12000_s20 = sld [smem:[#allocation51_spill]] }
 0x149   :  { %8445 = vmatmul.mubr.msk.f32.vlgmr.msra.gmra.mrb[0].mxu1 %vm330_vm1, %v320_v12  ;;  %9404 = vmatpush3.bf16.msra.mxu0 %v9403_v13  ;;  %v1101_v30 = vld [vmem:[%s11989_s27] sm:$0xff]  ;;  %v1102_v31 = vld [vmem:[%s11989_s27 + $0x8] sm:$0xff]  ;;  %v723_v32 = vld [vmem:[%s11988_s19 + $0x18] sm:$0xff] }
 0x14a   :  { %9407 = vmatpush3.bf16.msra.mxu1 %v9406_v16  ;;  %8458 = vmatprep.mubr.msk.f32.mxu1 %vm10580_vm0, %v10581_v1  ;;  %v10857_v33 = vpack.c.bf16 %v1102_v31, %v1101_v30  ;;  %v724_v34 = vld [vmem:[%s11988_s19 + $0x20] sm:$0xff]  ;;  %v1103_v35 = vld [vmem:[%s11989_s27 + $0x10] sm:$0xff]  ;;  %v1104_v36 = vld [vmem:[%s11989_s27 + $0x18] sm:$0xff] }
 0x14b   :  { %9412 = vmatprep.subr.bf16.mxu1 %v9411_v19  ;;  %8451 = vmatprep.mubr.msk.f32.mxu0 %vm10580_vm0, %v10581_v1  ;;  %v725_v37 = vld [vmem:[%s11988_s19 + $0x28] sm:$0xff]  ;;  %v10870_v38 = vpack.c.bf16 %v1104_v36, %v1103_v35  ;;  %v726_v39 = vld [vmem:[%s11988_s19 + $0x30] sm:$0xff]  ;;  %v727_v40 = vld [vmem:[%s11988_s19 + $0x38] sm:$0xff] }
 0x14c   :  { %8452 = vmatmul.mubr.msk.f32.vlgmr.msra.gmra.mrb[2].mxu0 %vm330_vm1, %v320_v12  ;;  %9408 = vmatprep.subr.bf16.mxu0 %v10579_v0  ;;  %v1252_v41 = vld [vmem:[%s11990_s7] sm:$0xff]  ;;  %v1253_v42 = vld [vmem:[%s11990_s7 + $0x8] sm:$0xff]  ;;  %v1254_v44 = vld [vmem:[%s11990_s7 + $0x10] sm:$0xff] }
 0x14d   :  { %8459 = vmatmul.mubr.msk.f32.vlgmr.msra.gmra.mrb[2].mxu1 %vm330_vm1, %v320_v12  ;;  %9410 = vmatpush3.bf16.msra.mxu0 %v9409_v22  ;;  %v10887_v43 = vpack.c.bf16 %v1253_v42, %v1252_v41  ;;  %v1255_v45 = vld [vmem:[%s11990_s7 + $0x18] sm:$0xff]  ;;  %v1178_v47 = vld [vmem:[%s11991_s10] sm:$0xff]  ;;  %v1179_v48 = vld [vmem:[%s11991_s10 + $0x8] sm:$0xff] }
 0x14e   :  { %9414 = vmatpush3.bf16.msra.mxu1 %v9411_v19  ;;  %8472 = vmatprep.mubr.msk.f32.mxu1 %vm330_vm1, %v720_v25  ;;  %v10897_v46 = vpack.c.bf16 %v1255_v45, %v1254_v44  ;;  %v1443_v49 = vld [vmem:[%s11992_s13] sm:$0xff]  ;;  %v1444_v50 = vld [vmem:[%s11992_s13 + $0x8] sm:$0xff]  ;;  %v10913_v53 = vpack.c.bf16 %v1179_v48, %v1178_v47  ;;  %v1180_v55 = vld [vmem:[%s11991_s10 + $0x10] sm:$0xff] }
 0x14f   :  { %8465 = vmatprep.mubr.msk.f32.mxu0 %vm10580_vm0, %v10581_v1  ;;  %9416 = vmatprep.subr.bf16.mxu0 %v9415_v26  ;;  %v10915_v54 = vpack.c.bf16 %v1444_v50, %v1443_v49  ;;  %v1181_v58 = vld [vmem:[%s11991_s10 + $0x18] sm:$0xff]  ;;  %v1445_v59 = vld [vmem:[%s11992_s13 + $0x10] sm:$0xff]  ;;  %v1369_v4 = vld [vmem:[%s11993_s11] sm:$0xff] }
 0x150   :  { %8466 = vmatmul.mubr.msk.f32.vlgmr.msra.gmra.mrb[4].mxu0 %vm330_vm1, %v320_v12  ;;  %9420 = vmatprep.subr.bf16.mxu1 %v9419_v27  ;;  %v1446_v60 = vld [vmem:[%s11992_s13 + $0x18] sm:$0xff]  ;;  %v10931_v63 = vpack.c.bf16 %v1181_v58, %v1180_v55  ;;  %v1370_v5 = vld [vmem:[%s11993_s11 + $0x8] sm:$0xff]  ;;  %v1371_v11 = vld [vmem:[%s11993_s11 + $0x10] sm:$0xff] }
 0x151   :  { %8473 = vmatmul.mubr.msk.f32.vlgmr.msra.gmra.mrb[4].mxu1 %vm330_vm1, %v721_v28  ;;  %9418 = vmatpush3.bf16.msra.mxu0 %v9415_v26  ;;  %v10933_v2 = vpack.c.bf16 %v1446_v60, %v1445_v59  ;;  %v10949_v9 = vpack.c.bf16 %v1370_v5, %v1369_v4  ;;  %v1372_v12 = vld [vmem:[%s11993_s11 + $0x18] sm:$0xff]  ;;  %v1357_v41 = vld [vmem:[%s11994_s17] sm:$0xff]  ;;  %v1358_v42 = vld [vmem:[%s11994_s17 + $0x8] sm:$0xff] }
 0x152   :  { %8475 = vmatprep.mubr.msk.f32.mxu1 %vm330_vm1, %v722_v29  ;;  %8488 = vmatprep.mubr.msk.f32.mxu0 %vm330_vm1, %v720_v25  ;;  %v10964_v16 = vpack.c.bf16 %v1372_v12, %v1371_v11  ;;  %v1361_v44 = vld [vmem:[%s11995_s21] sm:$0xff]  ;;  %v11002_v45 = vpack.c.bf16 %v1358_v42, %v1357_v41  ;;  %v1362_v47 = vld [vmem:[%s11995_s21 + $0x8] sm:$0xff]  ;;  %v1359_v49 = vld [vmem:[%s11994_s17 + $0x10] sm:$0xff] }
 0x153   :  { %9422 = vmatpush3.bf16.msra.mxu1 %v9419_v27  ;;  %9423 = vmatprep.subr.bf16.mxu0 %v10579_v0  ;;  %v11005_v48 = vpack.c.bf16 %v1362_v47, %v1361_v44  ;;  %v1360_v50 = vld [vmem:[%s11994_s17 + $0x18] sm:$0xff] }
 0x154   :  { %8489 = vmatmul.mubr.msk.f32.vlgmr.msra.gmra.mrb[6].mxu0 %vm330_vm1, %v721_v28  ;;  %9435 = vmatprep.subr.bf16.mxu1 %v10579_v0  ;;  %v1364_v55 = vld [vmem:[%s11995_s21 + $0x18] sm:$0xff] }
 0x155   :  { %8476 = vmatmul.mubr.msk.f32.gmra.mrb[6].mxu1 %vm330_vm1, %v723_v32  ;;  %8491 = vmatprep.mubr.msk.f32.mxu0 %vm330_vm1, %v722_v29  ;;  %v7804_v58 = vld [vmem:[#allocation20] ss:$0 sm:$0xff]  ;;  %v7806_v4 = vld [vmem:[#allocation22] ss:$0 sm:$0xff] }
 0x156   :  { %8478 = vmatprep.mubr.msk.f32.mxu1 %vm330_vm1, %v724_v34  ;;  %9425 = vmatpush3.bf16.msra.mxu0 %v10857_v33 }
 0x157   :  { %9426 = vmatprep.subr.bf16.mxu0 %v10579_v0 }
 0x158   :  { %8492 = vmatmul.mubr.msk.f32.gmra.mrb[8].mxu0 %vm330_vm1, %v723_v32 }
 0x159   :  { %8479 = vmatmul.mubr.msk.f32.gmra.mrb[8].mxu1 %vm330_vm1, %v725_v37  ;;  %8494 = vmatprep.mubr.msk.f32.mxu0 %vm330_vm1, %v724_v34 }
 0x15a   :  { %8481 = vmatprep.mubr.msk.f32.mxu1 %vm330_vm1, %v726_v39  ;;  %9428 = vmatpush3.bf16.msra.mxu0 %v10870_v38 }
 0x15b   :  { %9429 = vmatprep.subr.bf16.mxu0 %v10579_v0 }
 0x15c   :  { %8495 = vmatmul.mubr.msk.f32.gmra.mrb[10].mxu0 %vm330_vm1, %v725_v37 }
 0x15d   :  { %8482 = vmatmul.mubr.msk.f32.gmra.mrb[10].mxu1 %vm330_vm1, %v727_v40  ;;  %8497 = vmatprep.mubr.msk.f32.mxu0 %vm330_vm1, %v726_v39 }
 0x15e   :  { %8504 = vmatprep.mubr.msk.f32.mxu1 %vm330_vm1, %v720_v25 }
 0x160   :  { %8498 = vmatmul.mubr.msk.f32.gmra.mrb[12].mxu0 %vm330_vm1, %v727_v40 }
 0x161   :  { %8505 = vmatmul.mubr.msk.f32.vlgmr.msra.gmra.mrb[12].mxu1 %vm330_vm1, %v721_v28  ;;  %8524 = vmatprep.mubr.msk.f32.mxu0 %vm10580_vm0, %v10581_v1 }
 0x162   :  { %8507 = vmatprep.mubr.msk.f32.mxu1 %vm330_vm1, %v722_v29  ;;  %9437 = vmatpush3.bf16.msra.mxu1 %v10887_v43 }
 0x163   :  { %9438 = vmatprep.subr.bf16.mxu1 %v10579_v0 }
 0x165   :  { %8508 = vmatmul.mubr.msk.f32.gmra.mrb[14].mxu1 %vm330_vm1, %v723_v32 }
 0x166   :  { %8510 = vmatprep.mubr.msk.f32.mxu1 %vm330_vm1, %v724_v34  ;;  %9440 = vmatpush3.bf16.msra.mxu1 %v10897_v46 }
 0x167   :  { %9447 = vmatprep.subr.bf16.mxu1 %v10579_v0 }
 0x169   :  { %8511 = vmatmul.mubr.msk.f32.gmra.mrb[16].mxu1 %vm330_vm1, %v725_v37 }
 0x16a   :  { %8513 = vmatprep.mubr.msk.f32.mxu1 %vm330_vm1, %v726_v39 }
 0x16d   :  { %8514 = vmatmul.mubr.msk.f32.gmra.mrb[18].mxu1 %vm330_vm1, %v727_v40 }
 0x16e   :  { %8546 = vmatprep.mubr.msk.f32.mxu1 %vm10580_vm0, %v10581_v1 }
 0x21b   :  { %v400_v52 = vpop.f32.mrb[0].mxu0 }
 0x21c   :  { %v10918_v56 = vadd.f32 %v7802_v51, %v400_v52  ;;  %v8439_v57 = vpop.f32.mrb[1].mxu0  ;;  %v10923_v61 = vpop.f32.mrb[0].mxu1  ;;  %v1363_v51 = vld [vmem:[%s11995_s21 + $0x10] sm:$0xff]  ;;  %v11014_v52 = vpack.c.bf16 %v1360_v50, %v1359_v49 }
 0x21d   :  { %v8446_v62 = vpop.f32.mrb[1].mxu1  ;;  %v11017_v57 = vpack.c.bf16 %v1364_v55, %v1363_v51  ;;  %v11024_v59 = vadd.f32 %v7804_v58, %v10923_v61  ;;  %v1367_v49 = vld [vmem:[%s11996_s25 + $0x10] sm:$0xff]  ;;  %v1368_v51 = vld [vmem:[%s11996_s25 + $0x18] sm:$0xff] }
 0x21e   :  { %8525 = vmatmul.mubr.msk.f32.vlgmr.msra.gmra.mrb[14].mxu0 %vm859_vm2, %v10918_v56  ;;  %8547 = vmatmul.mubr.msk.f32.vlgmr.msra.gmra.mrb[20].mxu1 %vm859_vm2, %v10918_v56  ;;  %v1519_v55 = vld [vmem:[%s11997_s6 + $0x10] sm:$0xff]  ;;  %v1520_v58 = vld [vmem:[%s11997_s6 + $0x18] sm:$0xff] }
 0x21f   :  { %9431 = vmatpush3.bf16.msra.mxu0 %v10913_v53  ;;  %9449 = vmatpush3.bf16.msra.mxu1 %v10915_v54  ;;  %v10935_v3 = vpop.f32.mrb[2].mxu0 }
 0x220   :  { %9432 = vmatprep.subr.bf16.mxu0 %v10579_v0  ;;  %9450 = vmatprep.subr.bf16.mxu1 %v10579_v0  ;;  %v8453_v6 = vpop.f32.mrb[3].mxu0  ;;  %v10941_v7 = vpop.f32.mrb[2].mxu1 }
 0x221   :  { %8535 = vmatprep.mubr.msk.f32.mxu0 %vm10580_vm0, %v10581_v1  ;;  %8568 = vmatprep.mubr.msk.f32.mxu1 %vm10580_vm0, %v10581_v1  ;;  %v8460_v8 = vpop.f32.mrb[3].mxu1 }
 0x223   :  { %9434 = vmatpush3.bf16.msra.mxu0 %v10931_v63  ;;  %9452 = vmatpush3.bf16.msra.mxu1 %v10933_v2  ;;  %v10951_v10 = vpop.f32.mrb[4].mxu0 }
 0x224   :  { %9441 = vmatprep.subr.bf16.mxu0 %v10579_v0  ;;  %v8467_v13 = vpop.f32.mrb[5].mxu0  ;;  %v8474_v14 = vpop.f32.mrb[4].mxu1  ;;  %9459 = vmatprep.subr.bf16.mxu1 %v10579_v0 }
 0x225   :  { %861 = vst.msk [vmem:[#allocation2 + $0x8] sm:$0xff] %vm859_vm2, %v8474_v14  ;;  %v820_v15 = vpop.f32.mrb[5].mxu1  ;;  %v11028_v13 = vadd.f32 %v7806_v4, %v10935_v3  ;;  %v11031_v3 = vld [vmem:[#allocation25] ss:$0 sm:$0xff] }
 0x226   :  { %8536 = vmatmul.mubr.msk.f32.vlgmr.msra.gmra.mrb[16].mxu0 %vm859_vm2, %v10918_v56  ;;  %8569 = vmatmul.mubr.msk.f32.vlgmr.msra.gmra.mrb[22].mxu1 %vm859_vm2, %v10918_v56  ;;  %860 = vst.msk [vmem:[#allocation2] sm:$0xff] %vm859_vm2, %v820_v15  ;;  %v1853_v4 = vld [vmem:[%s10726_s30] sm:$0xff] }
 0x227   :  { %9443 = vmatpush3.bf16.msra.mxu0 %v10949_v9  ;;  %8557 = vmatprep.mubr.msk.f32.mxu0 %vm10580_vm0, %v10581_v1  ;;  %v8490_v17 = vpop.f32.mrb[6].mxu0 }
 0x228   :  { %9444 = vmatprep.subr.bf16.mxu0 %v10579_v0  ;;  %976 = vst.msk [vmem:[#allocation3 + $0x8] sm:$0xff] %vm859_vm2, %v8490_v17  ;;  %v936_v18 = vpop.f32.mrb[7].mxu0  ;;  %v8477_v19 = vpop.f32.mrb[6].mxu1  ;;  %8590 = vmatprep.mubr.msk.f32.mxu1 %vm10580_vm0, %v10581_v1 }
 0x229   :  { %975 = vst.msk [vmem:[#allocation3] sm:$0xff] %vm859_vm2, %v936_v18  ;;  %863 = vst.msk [vmem:[#allocation2 + $0x18] sm:$0xff] %vm859_vm2, %v8477_v19  ;;  %v830_v20 = vpop.f32.mrb[7].mxu1  ;;  %9461 = vmatpush3.bf16.msra.mxu1 %v11005_v48 }
 0x22a   :  { %862 = vst.msk [vmem:[#allocation2 + $0x10] sm:$0xff] %vm859_vm2, %v830_v20  ;;  %9462 = vmatprep.subr.bf16.mxu1 %v10579_v0 }
 0x22b   :  { %9446 = vmatpush3.bf16.msra.mxu0 %v10964_v16  ;;  %v8493_v21 = vpop.f32.mrb[8].mxu0 }
 0x22c   :  { %978 = vst.msk [vmem:[#allocation3 + $0x18] sm:$0xff] %vm859_vm2, %v8493_v21  ;;  %v946_v22 = vpop.f32.mrb[9].mxu0  ;;  %v8480_v23 = vpop.f32.mrb[8].mxu1  ;;  %9453 = vmatprep.subr.bf16.mxu0 %v10579_v0 }
 0x22d   :  { %977 = vst.msk [vmem:[#allocation3 + $0x10] sm:$0xff] %vm859_vm2, %v946_v22  ;;  %865 = vst.msk [vmem:[#allocation2 + $0x28] sm:$0xff] %vm859_vm2, %v8480_v23  ;;  %v840_v24 = vpop.f32.mrb[9].mxu1  ;;  %9464 = vmatpush3.bf16.msra.mxu1 %v11017_v57  ;;  %v1098_v60 = vld [vmem:[#allocation2] sm:$0xff]  ;;  %v7808_v23 = vld [vmem:[#allocation23] ss:$0 sm:$0xff] }
 0x22e   :  { %8558 = vmatmul.mubr.msk.f32.vlgmr.msra.gmra.mrb[18].mxu0 %vm859_vm2, %v10918_v56  ;;  %864 = vst.msk [vmem:[#allocation2 + $0x20] sm:$0xff] %vm859_vm2, %v840_v24  ;;  %9471 = vmatprep.subr.bf16.mxu1 %v10579_v0  ;;  %v1256_v62 = vadd.f32 %v1098_v60, %v11024_v59  ;;  %v11059_v60 = vpack.c.bf16 %v1368_v51, %v1367_v49  ;;  %v11125_v49 = vld [vmem:[#allocation26] ss:$0 sm:$0xff] }
 0x22f   :  { %v8496_v25 = vpop.f32.mrb[10].mxu0  ;;  %8579 = vmatprep.mubr.msk.f32.mxu0 %vm10580_vm0, %v10581_v1  ;;  %9455 = vmatpush3.bf16.msra.mxu0 %v11002_v45 }
 0x230   :  { %980 = vst.msk [vmem:[#allocation3 + $0x28] sm:$0xff] %vm859_vm2, %v8496_v25  ;;  %v956_v26 = vpop.f32.mrb[11].mxu0  ;;  %v8483_v27 = vpop.f32.mrb[10].mxu1  ;;  %9456 = vmatprep.subr.bf16.mxu0 %v10579_v0  ;;  %v1099_v15 = vld [vmem:[#allocation3] sm:$0xff]  ;;  %v11034_v25 = vadd.f32 %v7808_v23, %v10941_v7  ;;  %v1366_v7 = vld [vmem:[%s11996_s25 + $0x8] sm:$0xff] }
 0x231   :  { %979 = vst.msk [vmem:[#allocation3 + $0x20] sm:$0xff] %vm859_vm2, %v956_v26  ;;  %867 = vst.msk [vmem:[#allocation2 + $0x38] sm:$0xff] %vm859_vm2, %v8483_v27  ;;  %v850_v28 = vpop.f32.mrb[11].mxu1  ;;  %v1257_v17 = vadd.f32 %v1099_v15, %v11028_v13 }
 0x232   :  { %866 = vst.msk [vmem:[#allocation2 + $0x30] sm:$0xff] %vm859_vm2, %v850_v28 }
 0x233   :  { %v8499_v29 = vpop.f32.mrb[12].mxu0  ;;  %9458 = vmatpush3.bf16.msra.mxu0 %v11014_v52 }
 0x234   :  { %982 = vst.msk [vmem:[#allocation3 + $0x38] sm:$0xff] %vm859_vm2, %v8499_v29  ;;  %v966_v30 = vpop.f32.mrb[13].mxu0  ;;  %v8506_v31 = vpop.f32.mrb[12].mxu1  ;;  %9465 = vmatprep.subr.bf16.mxu0 %v10579_v0 }
 0x235   :  { %981 = vst.msk [vmem:[#allocation3 + $0x30] sm:$0xff] %vm859_vm2, %v966_v30  ;;  %1091 = vst.msk [vmem:[#allocation4 + $0x8] sm:$0xff] %vm859_vm2, %v8506_v31  ;;  %v1051_v32 = vpop.f32.mrb[13].mxu1 }
 0x236   :  { %1090 = vst.msk [vmem:[#allocation4] sm:$0xff] %vm859_vm2, %v1051_v32 }
 0x238   :  { %v8509_v34 = vpop.f32.mrb[14].mxu1 }
 0x239   :  { %1093 = vst.msk [vmem:[#allocation4 + $0x18] sm:$0xff] %vm859_vm2, %v8509_v34  ;;  %v1061_v35 = vpop.f32.mrb[15].mxu1 }
 0x23a   :  { %1092 = vst.msk [vmem:[#allocation4 + $0x10] sm:$0xff] %vm859_vm2, %v1061_v35  ;;  %v1365_v35 = vld [vmem:[%s11996_s25] sm:$0xff] }
 0x23b   :  { %v11043_v44 = vpack.c.bf16 %v1366_v7, %v1365_v35 }
 0x23c   :  { %v8512_v36 = vpop.f32.mrb[16].mxu1 }
 0x23d   :  { %1095 = vst.msk [vmem:[#allocation4 + $0x28] sm:$0xff] %vm859_vm2, %v8512_v36  ;;  %v1071_v37 = vpop.f32.mrb[17].mxu1  ;;  %v1100_v27 = vld [vmem:[#allocation4] sm:$0xff] }
 0x23e   :  { %1094 = vst.msk [vmem:[#allocation4 + $0x20] sm:$0xff] %vm859_vm2, %v1071_v37  ;;  %v1258_v30 = vadd.f32 %v1100_v27, %v11034_v25  ;;  %v1517_v37 = vld [vmem:[%s11997_s6] sm:$0xff] }
 0x240   :  { %v8515_v39 = vpop.f32.mrb[18].mxu1 }
 0x241   :  { %1097 = vst.msk [vmem:[#allocation4 + $0x38] sm:$0xff] %vm859_vm2, %v8515_v39  ;;  %v1081_v40 = vpop.f32.mrb[19].mxu1  ;;  %v1518_v39 = vld [vmem:[%s11997_s6 + $0x8] sm:$0xff] }
 0x242   :  { %1096 = vst.msk [vmem:[#allocation4 + $0x30] sm:$0xff] %vm859_vm2, %v1081_v40  ;;  %v11045_v47 = vpack.c.bf16 %v1518_v39, %v1517_v37  ;;  %v11123_v39 = vld [vmem:[%s12000_s20] ss:$0 sm:$0xff] }
 0x2f1   :  { %v1174_v5 = vpop.f32.mrb[14].mxu0  ;;  %v1332_v6 = vpop.f32.mrb[20].mxu1 }
 0x2f2   :  { %v1336_v8 = vadd.f32 %v1256_v62, %v1174_v5  ;;  %v8526_v11 = vpop.f32.mrb[15].mxu0  ;;  %v8548_v12 = vpop.f32.mrb[21].mxu1  ;;  %v1333_v28 = vadd.f32 %v11031_v3, %v1332_v6  ;;  %v11061_v62 = vpack.c.bf16 %v1520_v58, %v1519_v55  ;;  %v1854_v5 = vld [vmem:[%s10726_s30 + $0x8] sm:$0xff] }
 0x2f3   :  { %v11103_v6 = vpack.c.bf16 %v1854_v5, %v1853_v4  ;;  %v1856_v11 = vld [vmem:[%s10726_s30 + $0x18] sm:$0xff] }
 0x2f4   :  { %v7840_v14 = vmul.f32 -1.442695, %v1336_v8  ;;  %v1855_v8 = vld [vmem:[%s10726_s30 + $0x10] sm:$0xff] }
 0x2f5   :  { %v11109_v12 = vpack.c.bf16 %v1856_v11, %v1855_v8 }
 0x2f6   :  { %10002 = vpow2.f32 %v7840_v14  ;;  %v11114_v14 = vld [vmem:[%s11998_s15] ss:$0 sm:$0xff] }
 0x2f9   :  { %v1248_v18 = vpop.f32.mrb[16].mxu0 }
 0x2fa   :  { %v1343_v61 = vadd.f32 %v1257_v17, %v1248_v18  ;;  %v8537_v19 = vpop.f32.mrb[17].mxu0 }
 0x2fc   :  { %v7841_v20 = vmul.f32 -1.442695, %v1343_v61  ;;  %v11118_v61 = vld [vmem:[%s11999_s16] ss:$0 sm:$0xff] }
 0x2fe   :  { %10004 = vpow2.f32 %v7841_v20 }
 0x300   :  { %v10003_v21 = vpop.eup %10002 }
 0x301   :  { %v1340_v22 = vadd.f32 1.0, %v10003_v21 }
 0x303   :  { %10006 = vrcp.f32 %v1340_v22 }
 0x308   :  { %v10005_v24 = vpop.eup %10004 }
 0x309   :  { %v1347_v26 = vadd.f32 1.0, %v10005_v24 }
 0x30b   :  { %10008 = vrcp.f32 %v1347_v26 }
 0x30d   :  { %v10007_v29 = vpop.eup %10006 }
 0x30e   :  { %v1350_v31 = vmul.f32 %v10007_v29, %v1333_v28  ;;  %v1931_v29 = vld [vmem:[#allocation2 + $0x8] sm:$0xff] }
 0x310   :  { %v1351_v32 = vadd.f32 %v1350_v31, %v1258_v30  ;;  %v2086_v31 = vadd.f32 %v1931_v29, %v11024_v59 }
 0x312   :  { %10010 = vtanh.f32 %v1351_v32 }
 0x315   :  { %v10009_v34 = vpop.eup %10008 }
 0x316   :  { %v1353_v36 = vsub.f32 1.0, %v10009_v34  ;;  %v1355_v42 = vmul.f32 %v10009_v34, %v10918_v56 }
 0x31c   :  { %v10011_v40 = vpop.eup %10010 }
 0x31d   :  { %v1354_v41 = vmul.f32 %v10011_v40, %v1353_v36 }
 0x31f   :  { %v11048_v50 = vadd.f32 %v1355_v42, %v1354_v41 }
 0x321   :  { %8580 = vmatmul.mubr.msk.f32.vlgmr.msra.gmra.mrb[18].mxu0 %vm859_vm2, %v11048_v50  ;;  %8591 = vmatmul.mubr.msk.f32.vlgmr.msra.gmra.mrb[22].mxu1 %vm859_vm2, %v11048_v50 }
 0x322   :  { %9467 = vmatpush3.bf16.msra.mxu0 %v11043_v44  ;;  %9473 = vmatpush3.bf16.msra.mxu1 %v11045_v47 }
 0x323   :  { %9468 = vmatprep.subr.bf16.mxu0 %v10579_v0  ;;  %9474 = vmatprep.subr.bf16.mxu1 %v10579_v0 }
 0x324   :  { %8601 = vmatprep.mubr.msk.f32.mxu0 %vm10580_vm0, %v10581_v1  ;;  %8612 = vmatprep.mubr.msk.f32.mxu1 %vm10580_vm0, %v10581_v1 }
 0x326   :  { %9470 = vmatpush3.bf16.msra.mxu0 %v11059_v60  ;;  %9476 = vmatpush3.bf16.msra.mxu1 %v11061_v62 }
 0x327   :  { %9483 = vmatprep.subr.bf16.mxu1 %v10579_v0  ;;  %9477 = vmatprep.subr.bf16.mxu0 %v10579_v0 }
 0x329   :  { %8602 = vmatmul.mubr.msk.f32.vlgmr.msra.gmra.mrb[20].mxu0 %vm859_vm2, %v11048_v50  ;;  %8613 = vmatmul.mubr.msk.f32.vlgmr.msra.gmra.mrb[24].mxu1 %vm859_vm2, %v10918_v56 }
 0x32a   :  { %9485 = vmatpush3.bf16.msra.mxu1 %v10857_v33  ;;  %8634 = vmatprep.mubr.msk.f32.mxu1 %vm10580_vm0, %v10581_v1 }
 0x32b   :  { %9486 = vmatprep.subr.bf16.mxu1 %v10579_v0  ;;  %8623 = vmatprep.mubr.msk.f32.mxu0 %vm10580_vm0, %v10581_v1 }
 0x32c   :  { %9479 = vmatpush3.bf16.msra.mxu0 %v11103_v6 }
 0x32d   :  { %9480 = vmatprep.subr.bf16.mxu0 %v10579_v0 }
 0x32e   :  { %9488 = vmatpush3.bf16.msra.mxu1 %v10870_v38 }
 0x32f   :  { %9495 = vmatprep.subr.bf16.mxu1 %v10579_v0 }
 0x330   :  { %9482 = vmatpush3.bf16.msra.mxu0 %v11109_v12 }
 0x331   :  { %8635 = vmatmul.mubr.msk.f32.vlgmr.msra.gmra.mrb[26].mxu1 %vm859_vm2, %v11048_v50  ;;  %9489 = vmatprep.subr.bf16.mxu0 %v10579_v0 }
 0x332   :  { %9497 = vmatpush3.bf16.msra.mxu1 %v10887_v43  ;;  %8656 = vmatprep.mubr.msk.f32.mxu1 %vm10580_vm0, %v10581_v1 }
 0x333   :  { %9498 = vmatprep.subr.bf16.mxu1 %v10579_v0 }
 0x336   :  { %9500 = vmatpush3.bf16.msra.mxu1 %v10897_v46 }
 0x337   :  { %9507 = vmatprep.subr.bf16.mxu1 %v10579_v0 }
 0x339   :  { %8657 = vmatmul.mubr.msk.f32.vlgmr.msra.gmra.mrb[28].mxu1 %vm859_vm2, %v11048_v50 }
 0x33a   :  { %9509 = vmatpush3.bf16.msra.mxu1 %v10915_v54  ;;  %8678 = vmatprep.mubr.msk.f32.mxu1 %vm10580_vm0, %v10581_v1 }
 0x33b   :  { %9510 = vmatprep.subr.bf16.mxu1 %v10579_v0 }
 0x33e   :  { %9512 = vmatpush3.bf16.msra.mxu1 %v10933_v2 }
 0x33f   :  { %9519 = vmatprep.subr.bf16.mxu1 %v10579_v0 }
 0x3f4   :  { %v1597_v15 = vpop.f32.mrb[18].mxu0  ;;  %v1674_v17 = vpop.f32.mrb[22].mxu1 }
 0x3f5   :  { %v1598_v18 = vadd.f32 %v11114_v14, %v1597_v15  ;;  %v8581_v19 = vpop.f32.mrb[19].mxu0  ;;  %v8592_v20 = vpop.f32.mrb[23].mxu1  ;;  %v1675_v22 = vadd.f32 %v11118_v61, %v1674_v17 }
 0x3f7   :  { %v7852_v21 = vmul.f32 -1.442695, %v1598_v18  ;;  %v7853_v23 = vmul.f32 -1.442695, %v1675_v22  ;;  %v1933_v18 = vld [vmem:[#allocation4 + $0x8] sm:$0xff] }
 0x3f9   :  { %10012 = vpow2.f32 %v7852_v21 }
 0x3fa   :  { %10014 = vpow2.f32 %v7853_v23 }
 0x3fc   :  { %v1751_v24 = vpop.f32.mrb[20].mxu0  ;;  %v1828_v26 = vpop.f32.mrb[24].mxu1 }
 0x3fd   :  { %v8603_v27 = vpop.f32.mrb[21].mxu0  ;;  %v8614_v28 = vpop.f32.mrb[25].mxu1  ;;  %v1829_v51 = vadd.f32 %v11123_v39, %v1828_v26  ;;  %v1752_v58 = vadd.f32 %v11125_v49, %v1751_v24  ;;  %v2088_v26 = vadd.f32 %v1933_v18, %v11034_v25 }
 0x403   :  { %v10013_v30 = vpop.eup %10012 }
 0x404   :  { %v1836_v32 = vadd.f32 1.0, %v10013_v30  ;;  %v2004_v34 = vpop.f32.mrb[26].mxu1  ;;  %v10015_v37 = vpop.eup %10014 }
 0x405   :  { %v2166_v35 = vadd.f32 %v2086_v31, %v2004_v34  ;;  %v8636_v36 = vpop.f32.mrb[27].mxu1  ;;  %v1843_v41 = vadd.f32 1.0, %v10015_v37  ;;  %v1932_v34 = vld [vmem:[#allocation3 + $0x8] sm:$0xff] }
 0x406   :  { %10016 = vrcp.f32 %v1836_v32 }
 0x407   :  { %v7859_v7 = vmul.f32 -1.442695, %v2166_v35  ;;  %v2087_v35 = vadd.f32 %v1932_v34, %v11028_v13 }
 0x409   :  { %10018 = vpow2.f32 %v7859_v7 }
 0x40a   :  { %10020 = vrcp.f32 %v1843_v41 }
 0x40c   :  { %v2162_v40 = vpop.f32.mrb[28].mxu1 }
 0x40d   :  { %v8658_v42 = vpop.f32.mrb[29].mxu1  ;;  %v2163_v20 = vadd.f32 %v11031_v3, %v2162_v40 }
 0x410   :  { %v10017_v55 = vpop.eup %10016 }
 0x411   :  { %v1846_v4 = vmul.f32 %v10017_v55, %v1829_v51 }
 0x413   :  { %v10019_v5 = vpop.eup %10018  ;;  %v1847_v8 = vadd.f32 %v1846_v4, %v1752_v58 }
 0x414   :  { %v2170_v11 = vadd.f32 1.0, %v10019_v5  ;;  %v10021_v15 = vpop.eup %10020 }
 0x415   :  { %10022 = vtanh.f32 %v1847_v8  ;;  %v1849_v17 = vsub.f32 1.0, %v10021_v15  ;;  %v1851_v23 = vmul.f32 %v10021_v15, %v10918_v56  ;;  %v7810_v56 = vld [vmem:[%s10736_s5] ss:$0 sm:$0xff]  ;;  %s10582_s5 = smov [#allocation29]  }
 0x416   :  { %10024 = vrcp.f32 %v2170_v11  ;;  %v11168_v29 = vadd.f32 %v7810_v56, %v10951_v10 }
 0x41f   :  { %v10023_v19 = vpop.eup %10022 }
 0x420   :  { %v10025_v21 = vpop.eup %10024  ;;  %v1850_v22 = vmul.f32 %v10023_v19, %v1849_v17 }
 0x421   :  { %v2180_v27 = vmul.f32 %v10025_v21, %v2163_v20  ;;  %v2762_v20 = vld [vmem:[#allocation2 + $0x10] sm:$0xff] }
 0x422   :  { %v11132_v24 = vadd.f32 %v1851_v23, %v1850_v22  ;;  %v2917_v21 = vadd.f32 %v2762_v20, %v11024_v59 }
 0x423   :  { %v2181_v28 = vadd.f32 %v2180_v27, %v2088_v26 }
 0x424   :  { %8624 = vmatmul.mubr.msk.f32.vlgmr.msra.gmra.mrb[22].mxu0 %vm859_vm2, %v11132_v24  ;;  %8679 = vmatmul.mubr.msk.f32.vlgmr.msra.gmra.mrb[30].mxu1 %vm859_vm2, %v11132_v24 }
 0x425   :  { %9491 = vmatpush3.bf16.msra.mxu0 %v10913_v53  ;;  %8645 = vmatprep.mubr.msk.f32.mxu0 %vm10580_vm0, %v10581_v1 }
 0x426   :  { %9492 = vmatprep.subr.bf16.mxu0 %v10579_v0  ;;  %9521 = vmatpush3.bf16.msra.mxu1 %v11005_v48 }
 0x427   :  { %9522 = vmatprep.subr.bf16.mxu1 %v10579_v0  ;;  %8700 = vmatprep.mubr.msk.f32.mxu1 %vm10580_vm0, %v10581_v1 }
 0x429   :  { %9494 = vmatpush3.bf16.msra.mxu0 %v10931_v63 }
 0x42a   :  { %9501 = vmatprep.subr.bf16.mxu0 %v10579_v0  ;;  %9524 = vmatpush3.bf16.msra.mxu1 %v11017_v57 }
 0x42b   :  { %9531 = vmatprep.subr.bf16.mxu1 %v10579_v0 }
 0x42c   :  { %8646 = vmatmul.mubr.msk.f32.vlgmr.msra.gmra.mrb[24].mxu0 %vm859_vm2, %v11048_v50 }
 0x42d   :  { %9503 = vmatpush3.bf16.msra.mxu0 %v10949_v9  ;;  %8667 = vmatprep.mubr.msk.f32.mxu0 %vm10580_vm0, %v10581_v1 }
 0x42e   :  { %9504 = vmatprep.subr.bf16.mxu0 %v10579_v0 }
 0x431   :  { %9506 = vmatpush3.bf16.msra.mxu0 %v10964_v16 }
 0x432   :  { %9513 = vmatprep.subr.bf16.mxu0 %v10579_v0 }
 0x434   :  { %8668 = vmatmul.mubr.msk.f32.vlgmr.msra.gmra.mrb[26].mxu0 %vm859_vm2, %v11132_v24 }
 0x435   :  { %9515 = vmatpush3.bf16.msra.mxu0 %v11002_v45  ;;  %8689 = vmatprep.mubr.msk.f32.mxu0 %vm10580_vm0, %v10581_v1 }
 0x436   :  { %9516 = vmatprep.subr.bf16.mxu0 %v10579_v0 }
 0x439   :  { %9518 = vmatpush3.bf16.msra.mxu0 %v11014_v52 }
 0x43a   :  { %9525 = vmatprep.subr.bf16.mxu0 %v10579_v0 }
 0x4f7   :  { %v1926_v30 = vpop.f32.mrb[22].mxu0 }
 0x4f8   :  { %v1927_v31 = vadd.f32 %v1926_v30, %v11168_v29  ;;  %v8625_v32 = vpop.f32.mrb[23].mxu0 }
 0x4fa   :  { %1930 = vst [vmem:[#allocation29] sm:$0xff] %v1927_v31 }
 0x4ff   :  { %v2078_v36 = vpop.f32.mrb[24].mxu0 }
 0x500   :  { %v2173_v7 = vadd.f32 %v2087_v35, %v2078_v36  ;;  %v8647_v37 = vpop.f32.mrb[25].mxu0 }
 0x502   :  { %v7860_v40 = vmul.f32 -1.442695, %v2173_v7 }
 0x504   :  { %10026 = vpow2.f32 %v7860_v40 }
 0x50e   :  { %v10027_v41 = vpop.eup %10026 }
 0x50f   :  { %v2177_v42 = vadd.f32 1.0, %v10027_v41 }
 0x511   :  { %10028 = vrcp.f32 %v2177_v42 }
 0x512   :  { %10030 = vtanh.f32 %v2181_v28 }
 0x51b   :  { %v10029_v51 = vpop.eup %10028 }
 0x51c   :  { %v2183_v10 = vsub.f32 1.0, %v10029_v51  ;;  %v10031_v55 = vpop.eup %10030  ;;  %v2185_v4 = vmul.f32 %v10029_v51, %v11048_v50 }
 0x51e   :  { %v2184_v58 = vmul.f32 %v10031_v55, %v2183_v10  ;;  %v2764_v10 = vld [vmem:[#allocation4 + $0x10] sm:$0xff] }
 0x520   :  { %v11173_v5 = vadd.f32 %v2185_v4, %v2184_v58 }
 0x522   :  { %8690 = vmatmul.mubr.msk.f32.vlgmr.msra.gmra.mrb[26].mxu0 %vm859_vm2, %v11173_v5  ;;  %8701 = vmatmul.mubr.msk.f32.vlgmr.msra.gmra.mrb[30].mxu1 %vm859_vm2, %v11173_v5 }
 0x523   :  { %9527 = vmatpush3.bf16.msra.mxu0 %v11043_v44  ;;  %9533 = vmatpush3.bf16.msra.mxu1 %v11045_v47 }
 0x524   :  { %9528 = vmatprep.subr.bf16.mxu0 %v10579_v0  ;;  %9534 = vmatprep.subr.bf16.mxu1 %v10579_v0 }
 0x525   :  { %8711 = vmatprep.mubr.msk.f32.mxu0 %vm10580_vm0, %v10581_v1  ;;  %8722 = vmatprep.mubr.msk.f32.mxu1 %vm10580_vm0, %v10581_v1 }
 0x527   :  { %9530 = vmatpush3.bf16.msra.mxu0 %v11059_v60  ;;  %9536 = vmatpush3.bf16.msra.mxu1 %v11061_v62 }
 0x528   :  { %9543 = vmatprep.subr.bf16.mxu1 %v10579_v0  ;;  %9537 = vmatprep.subr.bf16.mxu0 %v10579_v0 }
 0x52a   :  { %8712 = vmatmul.mubr.msk.f32.vlgmr.msra.gmra.mrb[28].mxu0 %vm859_vm2, %v11173_v5  ;;  %8723 = vmatmul.mubr.msk.f32.vlgmr.msra.gmra.mrb[32].mxu1 %vm859_vm2, %v11132_v24 }
 0x52b   :  { %9545 = vmatpush3.bf16.msra.mxu1 %v10857_v33  ;;  %8744 = vmatprep.mubr.msk.f32.mxu1 %vm10580_vm0, %v10581_v1 }
 0x52c   :  { %9546 = vmatprep.subr.bf16.mxu1 %v10579_v0  ;;  %9539 = vmatpush3.bf16.msra.mxu0 %v11103_v6 }
 0x52d   :  { %9540 = vmatprep.subr.bf16.mxu0 %v10579_v0  ;;  %8733 = vmatprep.mubr.msk.f32.mxu0 %vm10580_vm0, %v10581_v1 }
 0x52f   :  { %9548 = vmatpush3.bf16.msra.mxu1 %v10870_v38 }
 0x530   :  { %9555 = vmatprep.subr.bf16.mxu1 %v10579_v0  ;;  %9542 = vmatpush3.bf16.msra.mxu0 %v11109_v12 }
 0x531   :  { %9549 = vmatprep.subr.bf16.mxu0 %v10579_v0 }
 0x532   :  { %8745 = vmatmul.mubr.msk.f32.vlgmr.msra.gmra.mrb[34].mxu1 %vm859_vm2, %v11173_v5 }
 0x533   :  { %9557 = vmatpush3.bf16.msra.mxu1 %v10887_v43  ;;  %8766 = vmatprep.mubr.msk.f32.mxu1 %vm10580_vm0, %v10581_v1 }
 0x534   :  { %9558 = vmatprep.subr.bf16.mxu1 %v10579_v0 }
 0x537   :  { %9560 = vmatpush3.bf16.msra.mxu1 %v10897_v46 }
 0x538   :  { %9567 = vmatprep.subr.bf16.mxu1 %v10579_v0 }
 0x53a   :  { %8767 = vmatmul.mubr.msk.f32.vlgmr.msra.gmra.mrb[36].mxu1 %vm859_vm2, %v11173_v5 }
 0x53b   :  { %9569 = vmatpush3.bf16.msra.mxu1 %v10915_v54  ;;  %8788 = vmatprep.mubr.msk.f32.mxu1 %vm10580_vm0, %v10581_v1 }
 0x53c   :  { %9570 = vmatprep.subr.bf16.mxu1 %v10579_v0 }
 0x53f   :  { %9572 = vmatpush3.bf16.msra.mxu1 %v10933_v2 }
 0x540   :  { %9579 = vmatprep.subr.bf16.mxu1 %v10579_v0 }
 0x5f5   :  { %v2427_v33 = vpop.f32.mrb[26].mxu0  ;;  %v2504_v38 = vpop.f32.mrb[30].mxu1 }
 0x5f6   :  { %v2428_v43 = vadd.f32 %v11114_v14, %v2427_v33  ;;  %v8691_v46 = vpop.f32.mrb[27].mxu0  ;;  %v8702_v50 = vpop.f32.mrb[31].mxu1  ;;  %v2505_v11 = vadd.f32 %v11118_v61, %v2504_v38 }
 0x5f8   :  { %v7871_v8 = vmul.f32 -1.442695, %v2428_v43  ;;  %v7872_v54 = vmul.f32 -1.442695, %v2505_v11  ;;  %v2919_v43 = vadd.f32 %v2764_v10, %v11034_v25 }
 0x5fa   :  { %10032 = vpow2.f32 %v7871_v8 }
 0x5fb   :  { %10034 = vpow2.f32 %v7872_v54 }
 0x5fd   :  { %v2581_v15 = vpop.f32.mrb[28].mxu0  ;;  %v2658_v17 = vpop.f32.mrb[32].mxu1 }
 0x5fe   :  { %v8713_v18 = vpop.f32.mrb[29].mxu0  ;;  %v8724_v19 = vpop.f32.mrb[33].mxu1  ;;  %v2659_v34 = vadd.f32 %v11123_v39, %v2658_v17  ;;  %v2582_v36 = vadd.f32 %v11125_v49, %v2581_v15 }
 0x604   :  { %v10033_v2 = vpop.eup %10032 }
 0x605   :  { %v2666_v22 = vadd.f32 1.0, %v10033_v2  ;;  %v2835_v23 = vpop.f32.mrb[34].mxu1  ;;  %v10035_v56 = vpop.eup %10034 }
 0x606   :  { %v2997_v26 = vadd.f32 %v2917_v21, %v2835_v23  ;;  %v8746_v27 = vpop.f32.mrb[35].mxu1  ;;  %v2673_v31 = vadd.f32 1.0, %v10035_v56  ;;  %v3596_v21 = vld [vmem:[%s11989_s27] sm:$0xff]  ;;  %v3745_v23 = vld [vmem:[%s11990_s7 + $0x8] sm:$0xff] }
 0x607   :  { %10036 = vrcp.f32 %v2666_v22  ;;  %v3599_v22 = vld [vmem:[%s11989_s27 + $0x18] sm:$0xff]  ;;  %v3746_v27 = vld [vmem:[%s11990_s7 + $0x10] sm:$0xff]  ;;  %v3936_v56 = vld [vmem:[%s11992_s13 + $0x8] sm:$0xff] }
 0x608   :  { %v7878_v28 = vmul.f32 -1.442695, %v2997_v26 }
 0x60a   :  { %10038 = vpow2.f32 %v7878_v28  ;;  %v3747_v28 = vld [vmem:[%s11990_s7 + $0x18] sm:$0xff] }
 0x60b   :  { %10040 = vrcp.f32 %v2673_v31  ;;  %v3937_v31 = vld [vmem:[%s11992_s13 + $0x10] sm:$0xff] }
 0x60d   :  { %v2993_v30 = vpop.f32.mrb[36].mxu1 }
 0x60e   :  { %v8768_v32 = vpop.f32.mrb[37].mxu1  ;;  %v2994_v58 = vadd.f32 %v11031_v3, %v2993_v30 }
 0x60f   :  { %v3938_v32 = vld [vmem:[%s11992_s13 + $0x18] sm:$0xff] }
 0x611   :  { %v10037_v35 = vpop.eup %10036 }
 0x612   :  { %v2676_v7 = vmul.f32 %v10037_v35, %v2659_v34  ;;  %v11338_v34 = vpack.c.bf16 %v3938_v32, %v3937_v31  ;;  %v3862_v32 = vld [vmem:[%s11993_s11 + $0x8] sm:$0xff] }
 0x614   :  { %v10039_v37 = vpop.eup %10038  ;;  %v2677_v40 = vadd.f32 %v2676_v7, %v2582_v36 }
 0x615   :  { %v3001_v41 = vadd.f32 1.0, %v10039_v37  ;;  %v10041_v42 = vpop.eup %10040 }
 0x616   :  { %10042 = vtanh.f32 %v2677_v40  ;;  %v2679_v51 = vsub.f32 1.0, %v10041_v42  ;;  %v2681_v38 = vmul.f32 %v10041_v42, %v11132_v24 }
 0x617   :  { %10044 = vrcp.f32 %v3001_v41 }
 0x620   :  { %v10043_v55 = vpop.eup %10042 }
 0x621   :  { %v10045_v4 = vpop.eup %10044  ;;  %v2680_v33 = vmul.f32 %v10043_v55, %v2679_v51 }
 0x622   :  { %v3011_v46 = vmul.f32 %v10045_v4, %v2994_v58 }
 0x623   :  { %v11231_v50 = vadd.f32 %v2681_v38, %v2680_v33  ;;  %v3593_v33 = vld [vmem:[#allocation2 + $0x18] sm:$0xff] }
 0x624   :  { %v3012_v8 = vadd.f32 %v3011_v46, %v2919_v43  ;;  %v3748_v43 = vadd.f32 %v3593_v33, %v11024_v59  ;;  %v3855_v33 = vld [vmem:[%s11995_s21 + $0x10] sm:$0xff] }
 0x625   :  { %8734 = vmatmul.mubr.msk.f32.vlgmr.msra.gmra.mrb[30].mxu0 %vm859_vm2, %v11231_v50  ;;  %8789 = vmatmul.mubr.msk.f32.vlgmr.msra.gmra.mrb[38].mxu1 %vm859_vm2, %v11231_v50 }
 0x626   :  { %9551 = vmatpush3.bf16.msra.mxu0 %v10913_v53  ;;  %8755 = vmatprep.mubr.msk.f32.mxu0 %vm10580_vm0, %v10581_v1 }
 0x627   :  { %9552 = vmatprep.subr.bf16.mxu0 %v10579_v0  ;;  %9581 = vmatpush3.bf16.msra.mxu1 %v11005_v48 }
 0x628   :  { %9582 = vmatprep.subr.bf16.mxu1 %v10579_v0  ;;  %8810 = vmatprep.mubr.msk.f32.mxu1 %vm10580_vm0, %v10581_v1 }
 0x62a   :  { %9554 = vmatpush3.bf16.msra.mxu0 %v10931_v63 }
 0x62b   :  { %9561 = vmatprep.subr.bf16.mxu0 %v10579_v0  ;;  %9584 = vmatpush3.bf16.msra.mxu1 %v11017_v57 }
 0x62c   :  { %9591 = vmatprep.subr.bf16.mxu1 %v10579_v0 }
 0x62d   :  { %8756 = vmatmul.mubr.msk.f32.vlgmr.msra.gmra.mrb[32].mxu0 %vm859_vm2, %v11173_v5 }
 0x62e   :  { %9563 = vmatpush3.bf16.msra.mxu0 %v10949_v9  ;;  %8777 = vmatprep.mubr.msk.f32.mxu0 %vm10580_vm0, %v10581_v1 }
 0x62f   :  { %9564 = vmatprep.subr.bf16.mxu0 %v10579_v0 }
 0x632   :  { %9566 = vmatpush3.bf16.msra.mxu0 %v10964_v16  ;;  %v2763_v16 = vld [vmem:[#allocation3 + $0x10] sm:$0xff] }
 0x633   :  { %9573 = vmatprep.subr.bf16.mxu0 %v10579_v0  ;;  %v2918_v48 = vadd.f32 %v2763_v16, %v11028_v13 }
 0x635   :  { %8778 = vmatmul.mubr.msk.f32.vlgmr.msra.gmra.mrb[34].mxu0 %vm859_vm2, %v11231_v50 }
 0x636   :  { %9575 = vmatpush3.bf16.msra.mxu0 %v11002_v45  ;;  %8799 = vmatprep.mubr.msk.f32.mxu0 %vm10580_vm0, %v10581_v1 }
 0x637   :  { %9576 = vmatprep.subr.bf16.mxu0 %v10579_v0 }
 0x63a   :  { %9578 = vmatpush3.bf16.msra.mxu0 %v11014_v52 }
 0x63b   :  { %9585 = vmatprep.subr.bf16.mxu0 %v10579_v0 }
 0x6f8   :  { %v2756_v53 = vpop.f32.mrb[30].mxu0 }
 0x6f9   :  { %v2757_v63 = vadd.f32 %v2756_v53, %v11168_v29  ;;  %v8735_v9 = vpop.f32.mrb[31].mxu0 }
 0x6fb   :  { %2761 = vst [vmem:[#allocation29 + $0x8] sm:$0xff] %v2757_v63 }
 0x700   :  { %v2909_v57 = vpop.f32.mrb[32].mxu0 }
 0x701   :  { %v3004_v24 = vadd.f32 %v2918_v48, %v2909_v57  ;;  %v8757_v45 = vpop.f32.mrb[33].mxu0 }
 0x703   :  { %v7879_v11 = vmul.f32 -1.442695, %v3004_v24 }
 0x705   :  { %10046 = vpow2.f32 %v7879_v11 }
 0x70f   :  { %v10047_v54 = vpop.eup %10046 }
 0x710   :  { %v3008_v15 = vadd.f32 1.0, %v10047_v54 }
 0x712   :  { %10048 = vrcp.f32 %v3008_v15 }
 0x713   :  { %10050 = vtanh.f32 %v3012_v8 }
 0x71c   :  { %v10049_v52 = vpop.eup %10048 }
 0x71d   :  { %v3014_v17 = vsub.f32 1.0, %v10049_v52  ;;  %v10051_v18 = vpop.eup %10050  ;;  %v3016_v20 = vmul.f32 %v10049_v52, %v11173_v5  ;;  %v3597_v5 = vld [vmem:[%s11989_s27 + $0x8] sm:$0xff] }
 0x71f   :  { %v3015_v19 = vmul.f32 %v10051_v18, %v3014_v17 }
 0x721   :  { %v11268_v2 = vadd.f32 %v3016_v20, %v3015_v19  ;;  %v3595_v19 = vld [vmem:[#allocation4 + $0x18] sm:$0xff]  ;;  %v3670_v20 = vld [vmem:[%s11991_s10] sm:$0xff] }
 0x723   :  { %8800 = vmatmul.mubr.msk.f32.vlgmr.msra.gmra.mrb[34].mxu0 %vm859_vm2, %v11268_v2  ;;  %8811 = vmatmul.mubr.msk.f32.vlgmr.msra.gmra.mrb[38].mxu1 %vm859_vm2, %v11268_v2 }
 0x724   :  { %9587 = vmatpush3.bf16.msra.mxu0 %v11043_v44  ;;  %9593 = vmatpush3.bf16.msra.mxu1 %v11045_v47  ;;  %v11286_v44 = vpack.c.bf16 %v3597_v5, %v3596_v21  ;;  %v3598_v47 = vld [vmem:[%s11989_s27 + $0x10] sm:$0xff]  ;;  %v3671_v21 = vld [vmem:[%s11991_s10 + $0x8] sm:$0xff] }
 0x725   :  { %9588 = vmatprep.subr.bf16.mxu0 %v10579_v0  ;;  %9594 = vmatprep.subr.bf16.mxu1 %v10579_v0 }
 0x726   :  { %8821 = vmatprep.mubr.msk.f32.mxu0 %vm10580_vm0, %v10581_v1  ;;  %8832 = vmatprep.mubr.msk.f32.mxu1 %vm10580_vm0, %v10581_v1 }
 0x728   :  { %9590 = vmatpush3.bf16.msra.mxu0 %v11059_v60  ;;  %9596 = vmatpush3.bf16.msra.mxu1 %v11061_v62  ;;  %v11297_v60 = vpack.c.bf16 %v3599_v22, %v3598_v47  ;;  %v3744_v62 = vld [vmem:[%s11990_s7] sm:$0xff] }
 0x729   :  { %9603 = vmatprep.subr.bf16.mxu1 %v10579_v0  ;;  %9597 = vmatprep.subr.bf16.mxu0 %v10579_v0  ;;  %v11309_v26 = vpack.c.bf16 %v3745_v23, %v3744_v62  ;;  %v3750_v62 = vadd.f32 %v3595_v19, %v11034_v25 }
 0x72b   :  { %8822 = vmatmul.mubr.msk.f32.vlgmr.msra.gmra.mrb[36].mxu0 %vm859_vm2, %v11268_v2  ;;  %8833 = vmatmul.mubr.msk.f32.vlgmr.msra.gmra.mrb[40].mxu1 %vm859_vm2, %v11231_v50 }
 0x72c   :  { %9605 = vmatpush3.bf16.msra.mxu1 %v11286_v44  ;;  %8854 = vmatprep.mubr.msk.f32.mxu1 %vm10580_vm0, %v10581_v1 }
 0x72d   :  { %9606 = vmatprep.subr.bf16.mxu1 %v10579_v0  ;;  %9599 = vmatpush3.bf16.msra.mxu0 %v11103_v6  ;;  %v11319_v6 = vpack.c.bf16 %v3747_v28, %v3746_v27  ;;  %v11352_v27 = vpack.c.bf16 %v3671_v21, %v3670_v20 }
 0x72e   :  { %9600 = vmatprep.subr.bf16.mxu0 %v10579_v0  ;;  %8843 = vmatprep.mubr.msk.f32.mxu0 %vm10580_vm0, %v10581_v1 }
 0x730   :  { %9608 = vmatpush3.bf16.msra.mxu1 %v11297_v60 }
 0x731   :  { %9615 = vmatprep.subr.bf16.mxu1 %v10579_v0  ;;  %9602 = vmatpush3.bf16.msra.mxu0 %v11109_v12  ;;  %v3935_v12 = vld [vmem:[%s11992_s13] sm:$0xff] }
 0x732   :  { %9609 = vmatprep.subr.bf16.mxu0 %v10579_v0  ;;  %v11332_v30 = vpack.c.bf16 %v3936_v56, %v3935_v12  ;;  %v3672_v12 = vld [vmem:[%s11991_s10 + $0x10] sm:$0xff]  ;;  %v3673_v56 = vld [vmem:[%s11991_s10 + $0x18] sm:$0xff] }
 0x733   :  { %8855 = vmatmul.mubr.msk.f32.vlgmr.msra.gmra.mrb[42].mxu1 %vm859_vm2, %v11268_v2 }
 0x734   :  { %9617 = vmatpush3.bf16.msra.mxu1 %v11309_v26  ;;  %8876 = vmatprep.mubr.msk.f32.mxu1 %vm10580_vm0, %v10581_v1 }
 0x735   :  { %9618 = vmatprep.subr.bf16.mxu1 %v10579_v0 }
 0x738   :  { %9620 = vmatpush3.bf16.msra.mxu1 %v11319_v6 }
 0x739   :  { %9627 = vmatprep.subr.bf16.mxu1 %v10579_v0 }
 0x73b   :  { %8877 = vmatmul.mubr.msk.f32.vlgmr.msra.gmra.mrb[44].mxu1 %vm859_vm2, %v11268_v2 }
 0x73c   :  { %8898 = vmatprep.mubr.msk.f32.mxu1 %vm10580_vm0, %v10581_v1  ;;  %9629 = vmatpush3.bf16.msra.mxu1 %v11332_v30 }
 0x73d   :  { %9630 = vmatprep.subr.bf16.mxu1 %v10579_v0 }
 0x740   :  { %9632 = vmatpush3.bf16.msra.mxu1 %v11338_v34 }
 0x741   :  { %9639 = vmatprep.subr.bf16.mxu1 %v10579_v0 }
 0x7f6   :  { %v3258_v35 = vpop.f32.mrb[34].mxu0  ;;  %v3335_v36 = vpop.f32.mrb[38].mxu1 }
 0x7f7   :  { %v3259_v7 = vadd.f32 %v11114_v14, %v3258_v35  ;;  %v8801_v37 = vpop.f32.mrb[35].mxu0  ;;  %v8812_v40 = vpop.f32.mrb[39].mxu1  ;;  %v3336_v42 = vadd.f32 %v11118_v61, %v3335_v36  ;;  %v3863_v36 = vld [vmem:[%s11993_s11 + $0x10] sm:$0xff] }
 0x7f8   :  { %v3849_v40 = vld [vmem:[%s11994_s17] sm:$0xff] }
 0x7f9   :  { %v7890_v41 = vmul.f32 -1.442695, %v3259_v7  ;;  %v7891_v51 = vmul.f32 -1.442695, %v3336_v42  ;;  %v3864_v7 = vld [vmem:[%s11993_s11 + $0x18] sm:$0xff]  ;;  %v3853_v42 = vld [vmem:[%s11995_s21] sm:$0xff] }
 0x7fa   :  { %v11381_v37 = vpack.c.bf16 %v3864_v7, %v3863_v36  ;;  %v4348_v36 = vld [vmem:[%s10726_s30 + $0x18] sm:$0xff] }
 0x7fb   :  { %10052 = vpow2.f32 %v7890_v41  ;;  %v3850_v41 = vld [vmem:[%s11994_s17 + $0x8] sm:$0xff] }
 0x7fc   :  { %10054 = vpow2.f32 %v7891_v51  ;;  %v11395_v51 = vpack.c.bf16 %v3850_v41, %v3849_v40  ;;  %v11494_v40 = vld [vmem:[%s11998_s15] ss:$0 sm:$0xff] }
 0x7fe   :  { %v3412_v10 = vpop.f32.mrb[36].mxu0  ;;  %v3489_v55 = vpop.f32.mrb[40].mxu1 }
 0x7ff   :  { %v8823_v58 = vpop.f32.mrb[37].mxu0  ;;  %v8834_v4 = vpop.f32.mrb[41].mxu1  ;;  %v3490_v57 = vadd.f32 %v11123_v39, %v3489_v55  ;;  %v3413_v45 = vadd.f32 %v11125_v49, %v3412_v10  ;;  %v3854_v10 = vld [vmem:[%s11995_s21 + $0x8] sm:$0xff] }
 0x800   :  { %v11398_v55 = vpack.c.bf16 %v3854_v10, %v3853_v42  ;;  %v3851_v58 = vld [vmem:[%s11994_s17 + $0x10] sm:$0xff]  ;;  %v3852_v4 = vld [vmem:[%s11994_s17 + $0x18] sm:$0xff] }
 0x805   :  { %v10053_v38 = vpop.eup %10052 }
 0x806   :  { %v3497_v46 = vadd.f32 1.0, %v10053_v38  ;;  %v3666_v8 = vpop.f32.mrb[42].mxu1  ;;  %v10055_v9 = vpop.eup %10054  ;;  %v11407_v38 = vpack.c.bf16 %v3852_v4, %v3851_v58  ;;  %v11498_v58 = vld [vmem:[%s11999_s16] ss:$0 sm:$0xff] }
 0x807   :  { %v3828_v53 = vadd.f32 %v3748_v43, %v3666_v8  ;;  %v8856_v14 = vpop.f32.mrb[43].mxu1  ;;  %v3504_v16 = vadd.f32 1.0, %v10055_v9  ;;  %v3856_v43 = vld [vmem:[%s11995_s21 + $0x18] sm:$0xff] }
 0x808   :  { %10056 = vrcp.f32 %v3497_v46  ;;  %v11410_v46 = vpack.c.bf16 %v3856_v43, %v3855_v33 }
 0x809   :  { %v7897_v63 = vmul.f32 -1.442695, %v3828_v53 }
 0x80b   :  { %10058 = vpow2.f32 %v7897_v63  ;;  %v3594_v63 = vld [vmem:[#allocation3 + $0x18] sm:$0xff] }
 0x80c   :  { %10060 = vrcp.f32 %v3504_v16  ;;  %v3749_v9 = vadd.f32 %v3594_v63, %v11028_v13 }
 0x80e   :  { %v3824_v61 = vpop.f32.mrb[44].mxu1 }
 0x80f   :  { %v8878_v48 = vpop.f32.mrb[45].mxu1  ;;  %v3825_v39 = vadd.f32 %v11031_v3, %v3824_v61  ;;  %v11363_v3 = vpack.c.bf16 %v3673_v56, %v3672_v12  ;;  %v4345_v56 = vld [vmem:[%s10726_s30] sm:$0xff] }
 0x812   :  { %v10057_v24 = vpop.eup %10056 }
 0x813   :  { %v3507_v11 = vmul.f32 %v10057_v24, %v3490_v57 }
 0x815   :  { %v10059_v54 = vpop.eup %10058  ;;  %v3508_v15 = vadd.f32 %v3507_v11, %v3413_v45 }
 0x816   :  { %v3832_v52 = vadd.f32 1.0, %v10059_v54  ;;  %v10061_v17 = vpop.eup %10060  ;;  %v3857_v54 = vld [vmem:[%s11996_s25] sm:$0xff] }
 0x817   :  { %10062 = vtanh.f32 %v3508_v15  ;;  %v3510_v18 = vsub.f32 1.0, %v10061_v17  ;;  %v3512_v49 = vmul.f32 %v10061_v17, %v11231_v50  ;;  %v3861_v50 = vld [vmem:[%s11993_s11] sm:$0xff] }
 0x818   :  { %10064 = vrcp.f32 %v3832_v52  ;;  %v11373_v35 = vpack.c.bf16 %v3862_v32, %v3861_v50  ;;  %v3858_v52 = vld [vmem:[%s11996_s25 + $0x8] sm:$0xff]  ;;  %v4009_v17 = vld [vmem:[%s11997_s6] sm:$0xff]  ;;  %v4347_v32 = vld [vmem:[%s10726_s30 + $0x10] sm:$0xff] }
 0x819   :  { %v11489_v7 = vpack.c.bf16 %v4348_v36, %v4347_v32 }
 0x821   :  { %v10063_v5 = vpop.eup %10062 }
 0x822   :  { %v10065_v47 = vpop.eup %10064  ;;  %v3511_v22 = vmul.f32 %v10063_v5, %v3510_v18  ;;  %v4010_v18 = vld [vmem:[%s11997_s6 + $0x8] sm:$0xff]  ;;  %v11423_v5 = vpack.c.bf16 %v3858_v52, %v3857_v54 }
 0x823   :  { %v3842_v23 = vmul.f32 %v10065_v47, %v3825_v39  ;;  %v11425_v39 = vpack.c.bf16 %v4010_v18, %v4009_v17  ;;  %v3859_v47 = vld [vmem:[%s11996_s25 + $0x10] sm:$0xff]  ;;  %v11503_v17 = vld [vmem:[%s12000_s20] ss:$0 sm:$0xff] }
 0x824   :  { %v11354_v28 = vadd.f32 %v3512_v49, %v3511_v22  ;;  %v3860_v49 = vld [vmem:[%s11996_s25 + $0x18] sm:$0xff] }
 0x825   :  { %v3843_v31 = vadd.f32 %v3842_v23, %v3750_v62  ;;  %v4011_v62 = vld [vmem:[%s11997_s6 + $0x10] sm:$0xff]  ;;  %v4012_v23 = vld [vmem:[%s11997_s6 + $0x18] sm:$0xff] }
 0x826   :  { %8844 = vmatmul.mubr.msk.f32.vlgmr.msra.gmra.mrb[38].mxu0 %vm859_vm2, %v11354_v28  ;;  %8899 = vmatmul.mubr.msk.f32.vlgmr.msra.gmra.mrb[46].mxu1 %vm859_vm2, %v11354_v28  ;;  %v11441_v12 = vpack.c.bf16 %v4012_v23, %v4011_v62 }
 0x827   :  { %9611 = vmatpush3.bf16.msra.mxu0 %v11352_v27  ;;  %8865 = vmatprep.mubr.msk.f32.mxu0 %vm10580_vm0, %v10581_v1 }
 0x828   :  { %9612 = vmatprep.subr.bf16.mxu0 %v10579_v0  ;;  %8920 = vmatprep.mubr.msk.f32.mxu1 %vm10580_vm0, %v10581_v1 }
 0x829   :  { %9641 = vmatpush3.bf16.msra.mxu1 %v11398_v55 }
 0x82a   :  { %9642 = vmatprep.subr.bf16.mxu1 %v10579_v0 }
 0x82b   :  { %9614 = vmatpush3.bf16.msra.mxu0 %v11363_v3 }
 0x82c   :  { %9621 = vmatprep.subr.bf16.mxu0 %v10579_v0 }
 0x82d   :  { %9644 = vmatpush3.bf16.msra.mxu1 %v11410_v46 }
 0x82e   :  { %8866 = vmatmul.mubr.msk.f32.vlgmr.msra.gmra.mrb[40].mxu0 %vm859_vm2, %v11268_v2  ;;  %9651 = vmatprep.subr.bf16.mxu1 %v10579_v0 }
 0x82f   :  { %9623 = vmatpush3.bf16.msra.mxu0 %v11373_v35  ;;  %8887 = vmatprep.mubr.msk.f32.mxu0 %vm10580_vm0, %v10581_v1 }
 0x830   :  { %9624 = vmatprep.subr.bf16.mxu0 %v10579_v0 }
 0x833   :  { %9626 = vmatpush3.bf16.msra.mxu0 %v11381_v37 }
 0x834   :  { %9633 = vmatprep.subr.bf16.mxu0 %v10579_v0 }
 0x836   :  { %8888 = vmatmul.mubr.msk.f32.vlgmr.msra.gmra.mrb[42].mxu0 %vm859_vm2, %v11354_v28 }
 0x837   :  { %8909 = vmatprep.mubr.msk.f32.mxu0 %vm10580_vm0, %v10581_v1  ;;  %9635 = vmatpush3.bf16.msra.mxu0 %v11395_v51 }
 0x838   :  { %9636 = vmatprep.subr.bf16.mxu0 %v10579_v0 }
 0x83b   :  { %9638 = vmatpush3.bf16.msra.mxu0 %v11407_v38 }
 0x83c   :  { %9645 = vmatprep.subr.bf16.mxu0 %v10579_v0 }
 0x8f9   :  { %v3587_v8 = vpop.f32.mrb[38].mxu0 }
 0x8fa   :  { %v3588_v53 = vadd.f32 %v3587_v8, %v11168_v29  ;;  %v8845_v14 = vpop.f32.mrb[39].mxu0 }
 0x8fc   :  { %3592 = vst [vmem:[#allocation29 + $0x10] sm:$0xff] %v3588_v53 }
 0x901   :  { %v3740_v61 = vpop.f32.mrb[40].mxu0 }
 0x902   :  { %v3835_v16 = vadd.f32 %v3749_v9, %v3740_v61  ;;  %v8867_v48 = vpop.f32.mrb[41].mxu0 }
 0x904   :  { %v7898_v57 = vmul.f32 -1.442695, %v3835_v16  ;;  %v4424_v16 = vld [vmem:[#allocation2 + $0x20] sm:$0xff] }
 0x906   :  { %10066 = vpow2.f32 %v7898_v57  ;;  %v4579_v57 = vadd.f32 %v4424_v16, %v11024_v59 }
 0x910   :  { %v10067_v24 = vpop.eup %10066 }
 0x911   :  { %v3839_v45 = vadd.f32 1.0, %v10067_v24 }
 0x913   :  { %10068 = vrcp.f32 %v3839_v45 }
 0x914   :  { %10070 = vtanh.f32 %v3843_v31  ;;  %v4346_v31 = vld [vmem:[%s10726_s30 + $0x8] sm:$0xff] }
 0x915   :  { %v11483_v50 = vpack.c.bf16 %v4346_v31, %v4345_v56 }
 0x91d   :  { %v10069_v11 = vpop.eup %10068 }
 0x91e   :  { %v3845_v15 = vsub.f32 1.0, %v10069_v11  ;;  %v10071_v19 = vpop.eup %10070  ;;  %v3847_v21 = vmul.f32 %v10069_v11, %v11268_v2  ;;  %v11439_v2 = vpack.c.bf16 %v3860_v49, %v3859_v47 }
 0x920   :  { %v3846_v20 = vmul.f32 %v10071_v19, %v3845_v15 }
 0x922   :  { %v11428_v22 = vadd.f32 %v3847_v21, %v3846_v20  ;;  %v11505_v21 = vld [vmem:[#allocation26] ss:$0 sm:$0xff] }
 0x924   :  { %8910 = vmatmul.mubr.msk.f32.vlgmr.msra.gmra.mrb[42].mxu0 %vm859_vm2, %v11428_v22  ;;  %8921 = vmatmul.mubr.msk.f32.vlgmr.msra.gmra.mrb[46].mxu1 %vm859_vm2, %v11428_v22 }
 0x925   :  { %9647 = vmatpush3.bf16.msra.mxu0 %v11423_v5  ;;  %9653 = vmatpush3.bf16.msra.mxu1 %v11425_v39 }
 0x926   :  { %9648 = vmatprep.subr.bf16.mxu0 %v10579_v0  ;;  %9654 = vmatprep.subr.bf16.mxu1 %v10579_v0 }
 0x927   :  { %8931 = vmatprep.mubr.msk.f32.mxu0 %vm10580_vm0, %v10581_v1  ;;  %8942 = vmatprep.mubr.msk.f32.mxu1 %vm10580_vm0, %v10581_v1 }
 0x929   :  { %9650 = vmatpush3.bf16.msra.mxu0 %v11439_v2  ;;  %9656 = vmatpush3.bf16.msra.mxu1 %v11441_v12 }
 0x92a   :  { %9663 = vmatprep.subr.bf16.mxu1 %v10579_v0  ;;  %9657 = vmatprep.subr.bf16.mxu0 %v10579_v0 }
 0x92c   :  { %8932 = vmatmul.mubr.msk.f32.vlgmr.msra.gmra.mrb[44].mxu0 %vm859_vm2, %v11428_v22  ;;  %8943 = vmatmul.mubr.msk.f32.vlgmr.msra.gmra.mrb[48].mxu1 %vm859_vm2, %v11354_v28 }
 0x92d   :  { %9665 = vmatpush3.bf16.msra.mxu1 %v11286_v44  ;;  %8964 = vmatprep.mubr.msk.f32.mxu1 %vm10580_vm0, %v10581_v1 }
 0x92e   :  { %9666 = vmatprep.subr.bf16.mxu1 %v10579_v0  ;;  %8953 = vmatprep.mubr.msk.f32.mxu0 %vm10580_vm0, %v10581_v1 }
 0x92f   :  { %9659 = vmatpush3.bf16.msra.mxu0 %v11483_v50 }
 0x930   :  { %9660 = vmatprep.subr.bf16.mxu0 %v10579_v0 }
 0x931   :  { %9668 = vmatpush3.bf16.msra.mxu1 %v11297_v60 }
 0x932   :  { %9675 = vmatprep.subr.bf16.mxu1 %v10579_v0 }
 0x933   :  { %9662 = vmatpush3.bf16.msra.mxu0 %v11489_v7 }
 0x934   :  { %8965 = vmatmul.mubr.msk.f32.vlgmr.msra.gmra.mrb[50].mxu1 %vm859_vm2, %v11428_v22  ;;  %9669 = vmatprep.subr.bf16.mxu0 %v10579_v0 }
 0x935   :  { %9677 = vmatpush3.bf16.msra.mxu1 %v11309_v26  ;;  %8986 = vmatprep.mubr.msk.f32.mxu1 %vm10580_vm0, %v10581_v1 }
 0x936   :  { %9678 = vmatprep.subr.bf16.mxu1 %v10579_v0 }
 0x939   :  { %9680 = vmatpush3.bf16.msra.mxu1 %v11319_v6 }
 0x93a   :  { %9687 = vmatprep.subr.bf16.mxu1 %v10579_v0 }
 0x93c   :  { %8987 = vmatmul.mubr.msk.f32.vlgmr.msra.gmra.mrb[52].mxu1 %vm859_vm2, %v11428_v22 }
 0x93d   :  { %9689 = vmatpush3.bf16.msra.mxu1 %v11332_v30  ;;  %9008 = vmatprep.mubr.msk.f32.mxu1 %vm10580_vm0, %v10581_v1 }
 0x93e   :  { %9690 = vmatprep.subr.bf16.mxu1 %v10579_v0 }
 0x941   :  { %9692 = vmatpush3.bf16.msra.mxu1 %v11338_v34 }
 0x942   :  { %9699 = vmatprep.subr.bf16.mxu1 %v10579_v0 }
 0x9f7   :  { %v4089_v41 = vpop.f32.mrb[42].mxu0  ;;  %v4166_v42 = vpop.f32.mrb[46].mxu1 }
 0x9f8   :  { %v4090_v10 = vadd.f32 %v11494_v40, %v4089_v41  ;;  %v8911_v4 = vpop.f32.mrb[43].mxu0  ;;  %v8922_v33 = vpop.f32.mrb[47].mxu1  ;;  %v4167_v8 = vadd.f32 %v11498_v58, %v4166_v42  ;;  %v11509_v41 = vld [vmem:[#allocation25] ss:$0 sm:$0xff] }
 0x9fa   :  { %v7909_v43 = vmul.f32 -1.442695, %v4090_v10  ;;  %v7910_v53 = vmul.f32 -1.442695, %v4167_v8  ;;  %v4426_v10 = vld [vmem:[#allocation4 + $0x20] sm:$0xff] }
 0x9fc   :  { %10072 = vpow2.f32 %v7909_v43 }
 0x9fd   :  { %10074 = vpow2.f32 %v7910_v53 }
 0x9ff   :  { %v4243_v14 = vpop.f32.mrb[44].mxu0  ;;  %v4320_v63 = vpop.f32.mrb[48].mxu1 }
 0xa00   :  { %v8933_v9 = vpop.f32.mrb[45].mxu0  ;;  %v8944_v61 = vpop.f32.mrb[49].mxu1  ;;  %v4321_v47 = vadd.f32 %v11503_v17, %v4320_v63  ;;  %v4244_v62 = vadd.f32 %v11505_v21, %v4243_v14  ;;  %v4581_v14 = vadd.f32 %v4426_v10, %v11034_v25 }
 0xa06   :  { %v10073_v48 = vpop.eup %10072 }
 0xa07   :  { %v4328_v24 = vadd.f32 1.0, %v10073_v48  ;;  %v4497_v45 = vpop.f32.mrb[50].mxu1  ;;  %v10075_v52 = vpop.eup %10074 }
 0xa08   :  { %v4659_v11 = vadd.f32 %v4579_v57, %v4497_v45  ;;  %v8966_v54 = vpop.f32.mrb[51].mxu1  ;;  %v4335_v19 = vadd.f32 1.0, %v10075_v52  ;;  %v4425_v57 = vld [vmem:[#allocation3 + $0x20] sm:$0xff] }
 0xa09   :  { %10076 = vrcp.f32 %v4328_v24  ;;  %v4580_v24 = vadd.f32 %v4425_v57, %v11028_v13 }
 0xa0a   :  { %v7916_v15 = vmul.f32 -1.442695, %v4659_v11 }
 0xa0c   :  { %10078 = vpow2.f32 %v7916_v15 }
 0xa0d   :  { %10080 = vrcp.f32 %v4335_v19 }
 0xa0f   :  { %v4655_v18 = vpop.f32.mrb[52].mxu1 }
 0xa10   :  { %v8988_v20 = vpop.f32.mrb[53].mxu1  ;;  %v4656_v33 = vadd.f32 %v11509_v41, %v4655_v18 }
 0xa13   :  { %v10077_v49 = vpop.eup %10076 }
 0xa14   :  { %v4338_v23 = vmul.f32 %v10077_v49, %v4321_v47 }
 0xa16   :  { %v10079_v56 = vpop.eup %10078  ;;  %v4339_v31 = vadd.f32 %v4338_v23, %v4244_v62 }
 0xa17   :  { %v4663_v32 = vadd.f32 1.0, %v10079_v56  ;;  %v10081_v36 = vpop.eup %10080 }
 0xa18   :  { %10082 = vtanh.f32 %v4339_v31  ;;  %v4341_v42 = vsub.f32 1.0, %v10081_v36  ;;  %v4343_v53 = vmul.f32 %v10081_v36, %v11354_v28 }
 0xa19   :  { %10084 = vrcp.f32 %v4663_v32 }
 0xa22   :  { %v10083_v4 = vpop.eup %10082 }
 0xa23   :  { %v10085_v43 = vpop.eup %10084  ;;  %v4342_v8 = vmul.f32 %v10083_v4, %v4341_v42  ;;  %v5255_v4 = vld [vmem:[#allocation2 + $0x28] sm:$0xff] }
 0xa24   :  { %v4673_v63 = vmul.f32 %v10085_v43, %v4656_v33  ;;  %v5410_v33 = vadd.f32 %v5255_v4, %v11024_v59 }
 0xa25   :  { %v11514_v9 = vadd.f32 %v4343_v53, %v4342_v8 }
 0xa26   :  { %v4674_v61 = vadd.f32 %v4673_v63, %v4581_v14 }
 0xa27   :  { %8954 = vmatmul.mubr.msk.f32.vlgmr.msra.gmra.mrb[46].mxu0 %vm859_vm2, %v11514_v9  ;;  %9009 = vmatmul.mubr.msk.f32.vlgmr.msra.gmra.mrb[54].mxu1 %vm859_vm2, %v11514_v9 }
 0xa28   :  { %9671 = vmatpush3.bf16.msra.mxu0 %v11352_v27  ;;  %8975 = vmatprep.mubr.msk.f32.mxu0 %vm10580_vm0, %v10581_v1 }
 0xa29   :  { %9672 = vmatprep.subr.bf16.mxu0 %v10579_v0  ;;  %9701 = vmatpush3.bf16.msra.mxu1 %v11398_v55 }
 0xa2a   :  { %9702 = vmatprep.subr.bf16.mxu1 %v10579_v0  ;;  %9030 = vmatprep.mubr.msk.f32.mxu1 %vm10580_vm0, %v10581_v1 }
 0xa2c   :  { %9674 = vmatpush3.bf16.msra.mxu0 %v11363_v3 }
 0xa2d   :  { %9681 = vmatprep.subr.bf16.mxu0 %v10579_v0  ;;  %9704 = vmatpush3.bf16.msra.mxu1 %v11410_v46 }
 0xa2e   :  { %9711 = vmatprep.subr.bf16.mxu1 %v10579_v0 }
 0xa2f   :  { %8976 = vmatmul.mubr.msk.f32.vlgmr.msra.gmra.mrb[48].mxu0 %vm859_vm2, %v11428_v22 }
 0xa30   :  { %9683 = vmatpush3.bf16.msra.mxu0 %v11373_v35  ;;  %8997 = vmatprep.mubr.msk.f32.mxu0 %vm10580_vm0, %v10581_v1 }
 0xa31   :  { %9684 = vmatprep.subr.bf16.mxu0 %v10579_v0 }
 0xa34   :  { %9686 = vmatpush3.bf16.msra.mxu0 %v11381_v37 }
 0xa35   :  { %9693 = vmatprep.subr.bf16.mxu0 %v10579_v0 }
 0xa37   :  { %8998 = vmatmul.mubr.msk.f32.vlgmr.msra.gmra.mrb[50].mxu0 %vm859_vm2, %v11514_v9 }
 0xa38   :  { %9695 = vmatpush3.bf16.msra.mxu0 %v11395_v51  ;;  %9019 = vmatprep.mubr.msk.f32.mxu0 %vm10580_vm0, %v10581_v1 }
 0xa39   :  { %9696 = vmatprep.subr.bf16.mxu0 %v10579_v0 }
 0xa3c   :  { %9698 = vmatpush3.bf16.msra.mxu0 %v11407_v38 }
 0xa3d   :  { %9705 = vmatprep.subr.bf16.mxu0 %v10579_v0 }
 0xafa   :  { %v4418_v28 = vpop.f32.mrb[46].mxu0 }
 0xafb   :  { %v4419_v16 = vadd.f32 %v4418_v28, %v11168_v29  ;;  %v8955_v48 = vpop.f32.mrb[47].mxu0 }
 0xafd   :  { %4423 = vst [vmem:[#allocation29 + $0x18] sm:$0xff] %v4419_v16 }
 0xb02   :  { %v4571_v45 = vpop.f32.mrb[48].mxu0 }
 0xb03   :  { %v4666_v11 = vadd.f32 %v4580_v24, %v4571_v45  ;;  %v8977_v54 = vpop.f32.mrb[49].mxu0 }
 0xb05   :  { %v7917_v15 = vmul.f32 -1.442695, %v4666_v11 }
 0xb07   :  { %10086 = vpow2.f32 %v7917_v15 }
 0xb11   :  { %v10087_v52 = vpop.eup %10086 }
 0xb12   :  { %v4670_v18 = vadd.f32 1.0, %v10087_v52 }
 0xb14   :  { %10088 = vrcp.f32 %v4670_v18 }
 0xb15   :  { %10090 = vtanh.f32 %v4674_v61 }
 0xb1e   :  { %v10089_v19 = vpop.eup %10088 }
 0xb1f   :  { %v4676_v20 = vsub.f32 1.0, %v10089_v19  ;;  %v10091_v47 = vpop.eup %10090  ;;  %v4678_v62 = vmul.f32 %v10089_v19, %v11428_v22 }
 0xb21   :  { %v4677_v49 = vmul.f32 %v10091_v47, %v4676_v20  ;;  %v5257_v20 = vld [vmem:[#allocation4 + $0x28] sm:$0xff] }
 0xb23   :  { %v11551_v23 = vadd.f32 %v4678_v62, %v4677_v49 }
 0xb25   :  { %9020 = vmatmul.mubr.msk.f32.vlgmr.msra.gmra.mrb[50].mxu0 %vm859_vm2, %v11551_v23  ;;  %9031 = vmatmul.mubr.msk.f32.vlgmr.msra.gmra.mrb[54].mxu1 %vm859_vm2, %v11551_v23 }
 0xb26   :  { %9707 = vmatpush3.bf16.msra.mxu0 %v11423_v5  ;;  %9713 = vmatpush3.bf16.msra.mxu1 %v11425_v39 }
 0xb27   :  { %9708 = vmatprep.subr.bf16.mxu0 %v10579_v0  ;;  %9714 = vmatprep.subr.bf16.mxu1 %v10579_v0 }
 0xb28   :  { %9041 = vmatprep.mubr.msk.f32.mxu0 %vm10580_vm0, %v10581_v1  ;;  %9052 = vmatprep.mubr.msk.f32.mxu1 %vm10580_vm0, %v10581_v1 }
 0xb2a   :  { %9710 = vmatpush3.bf16.msra.mxu0 %v11439_v2  ;;  %9716 = vmatpush3.bf16.msra.mxu1 %v11441_v12 }
 0xb2b   :  { %9723 = vmatprep.subr.bf16.mxu1 %v10579_v0  ;;  %9717 = vmatprep.subr.bf16.mxu0 %v10579_v0 }
 0xb2d   :  { %9042 = vmatmul.mubr.msk.f32.vlgmr.msra.gmra.mrb[52].mxu0 %vm859_vm2, %v11551_v23  ;;  %9053 = vmatmul.mubr.msk.f32.vlgmr.msra.gmra.mrb[56].mxu1 %vm859_vm2, %v11514_v9 }
 0xb2e   :  { %9725 = vmatpush3.bf16.msra.mxu1 %v11286_v44  ;;  %9074 = vmatprep.mubr.msk.f32.mxu1 %vm10580_vm0, %v10581_v1 }
 0xb2f   :  { %9726 = vmatprep.subr.bf16.mxu1 %v10579_v0  ;;  %9719 = vmatpush3.bf16.msra.mxu0 %v11483_v50 }
 0xb30   :  { %9720 = vmatprep.subr.bf16.mxu0 %v10579_v0  ;;  %9063 = vmatprep.mubr.msk.f32.mxu0 %vm10580_vm0, %v10581_v1 }
 0xb32   :  { %9728 = vmatpush3.bf16.msra.mxu1 %v11297_v60 }
 0xb33   :  { %9735 = vmatprep.subr.bf16.mxu1 %v10579_v0  ;;  %9722 = vmatpush3.bf16.msra.mxu0 %v11489_v7 }
 0xb34   :  { %9729 = vmatprep.subr.bf16.mxu0 %v10579_v0 }
 0xb35   :  { %9075 = vmatmul.mubr.msk.f32.vlgmr.msra.gmra.mrb[58].mxu1 %vm859_vm2, %v11551_v23 }
 0xb36   :  { %9737 = vmatpush3.bf16.msra.mxu1 %v11309_v26  ;;  %9096 = vmatprep.mubr.msk.f32.mxu1 %vm10580_vm0, %v10581_v1 }
 0xb37   :  { %9738 = vmatprep.subr.bf16.mxu1 %v10579_v0 }
 0xb3a   :  { %9740 = vmatpush3.bf16.msra.mxu1 %v11319_v6 }
 0xb3b   :  { %9747 = vmatprep.subr.bf16.mxu1 %v10579_v0 }
 0xb3d   :  { %9097 = vmatmul.mubr.msk.f32.vlgmr.msra.gmra.mrb[60].mxu1 %vm859_vm2, %v11551_v23 }
 0xb3e   :  { %9749 = vmatpush3.bf16.msra.mxu1 %v11332_v30  ;;  %9118 = vmatprep.mubr.msk.f32.mxu1 %vm10580_vm0, %v10581_v1 }
 0xb3f   :  { %9750 = vmatprep.subr.bf16.mxu1 %v10579_v0 }
 0xb42   :  { %9752 = vmatpush3.bf16.msra.mxu1 %v11338_v34 }
 0xb43   :  { %9759 = vmatprep.subr.bf16.mxu1 %v10579_v0 }
 0xbf8   :  { %v4920_v44 = vpop.f32.mrb[50].mxu0  ;;  %v4997_v60 = vpop.f32.mrb[54].mxu1 }
 0xbf9   :  { %v4921_v26 = vadd.f32 %v11494_v40, %v4920_v44  ;;  %v9021_v6 = vpop.f32.mrb[51].mxu0  ;;  %v9032_v22 = vpop.f32.mrb[55].mxu1  ;;  %v4998_v31 = vadd.f32 %v11498_v58, %v4997_v60 }
 0xbfb   :  { %v7928_v56 = vmul.f32 -1.442695, %v4921_v26  ;;  %v7929_v30 = vmul.f32 -1.442695, %v4998_v31  ;;  %v5412_v26 = vadd.f32 %v5257_v20, %v11034_v25 }
 0xbfd   :  { %10092 = vpow2.f32 %v7928_v56 }
 0xbfe   :  { %10094 = vpow2.f32 %v7929_v30 }
 0xc00   :  { %v5074_v32 = vpop.f32.mrb[52].mxu0  ;;  %v5151_v36 = vpop.f32.mrb[56].mxu1 }
 0xc01   :  { %v9043_v42 = vpop.f32.mrb[53].mxu0  ;;  %v9054_v10 = vpop.f32.mrb[57].mxu1  ;;  %v5152_v57 = vadd.f32 %v11503_v17, %v5151_v36  ;;  %v5075_v45 = vadd.f32 %v11505_v21, %v5074_v32 }
 0xc07   :  { %v10093_v34 = vpop.eup %10092 }
 0xc08   :  { %v5159_v43 = vadd.f32 1.0, %v10093_v34  ;;  %v5328_v8 = vpop.f32.mrb[58].mxu1  ;;  %v10095_v61 = vpop.eup %10094 }
 0xc09   :  { %v5490_v53 = vadd.f32 %v5410_v33, %v5328_v8  ;;  %v9076_v14 = vpop.f32.mrb[59].mxu1  ;;  %v5166_v16 = vadd.f32 1.0, %v10095_v61  ;;  %v6089_v33 = vld [vmem:[%s11989_s27] sm:$0xff]  ;;  %v6238_v8 = vld [vmem:[%s11990_s7 + $0x8] sm:$0xff] }
 0xc0a   :  { %10096 = vrcp.f32 %v5159_v43  ;;  %v6092_v43 = vld [vmem:[%s11989_s27 + $0x18] sm:$0xff]  ;;  %v6239_v14 = vld [vmem:[%s11990_s7 + $0x10] sm:$0xff]  ;;  %v6429_v61 = vld [vmem:[%s11992_s13 + $0x8] sm:$0xff] }
 0xc0b   :  { %v7935_v63 = vmul.f32 -1.442695, %v5490_v53 }
 0xc0d   :  { %10098 = vpow2.f32 %v7935_v63  ;;  %v6240_v63 = vld [vmem:[%s11990_s7 + $0x18] sm:$0xff] }
 0xc0e   :  { %10100 = vrcp.f32 %v5166_v16  ;;  %v6430_v16 = vld [vmem:[%s11992_s13 + $0x10] sm:$0xff] }
 0xc10   :  { %v5486_v28 = vpop.f32.mrb[60].mxu1 }
 0xc11   :  { %v9098_v48 = vpop.f32.mrb[61].mxu1  ;;  %v5487_v49 = vadd.f32 %v11509_v41, %v5486_v28 }
 0xc12   :  { %v6431_v48 = vld [vmem:[%s11992_s13 + $0x18] sm:$0xff] }
 0xc14   :  { %v10097_v24 = vpop.eup %10096 }
 0xc15   :  { %v5169_v11 = vmul.f32 %v10097_v24, %v5152_v57  ;;  %v11716_v57 = vpack.c.bf16 %v6431_v48, %v6430_v16  ;;  %v6355_v48 = vld [vmem:[%s11993_s11 + $0x8] sm:$0xff] }
 0xc17   :  { %v10099_v54 = vpop.eup %10098  ;;  %v5170_v15 = vadd.f32 %v5169_v11, %v5075_v45 }
 0xc18   :  { %v5494_v52 = vadd.f32 1.0, %v10099_v54  ;;  %v10101_v18 = vpop.eup %10100 }
 0xc19   :  { %10102 = vtanh.f32 %v5170_v15  ;;  %v5172_v19 = vsub.f32 1.0, %v10101_v18  ;;  %v5174_v60 = vmul.f32 %v10101_v18, %v11514_v9 }
 0xc1a   :  { %10104 = vrcp.f32 %v5494_v52 }
 0xc23   :  { %v10103_v47 = vpop.eup %10102 }
 0xc24   :  { %v10105_v62 = vpop.eup %10104  ;;  %v5173_v44 = vmul.f32 %v10103_v47, %v5172_v19 }
 0xc25   :  { %v5504_v6 = vmul.f32 %v10105_v62, %v5487_v49 }
 0xc26   :  { %v11609_v22 = vadd.f32 %v5174_v60, %v5173_v44  ;;  %v6086_v44 = vld [vmem:[#allocation2 + $0x30] sm:$0xff] }
 0xc27   :  { %v5505_v56 = vadd.f32 %v5504_v6, %v5412_v26  ;;  %v6241_v26 = vadd.f32 %v6086_v44, %v11024_v59  ;;  %v6348_v44 = vld [vmem:[%s11995_s21 + $0x10] sm:$0xff] }
 0xc28   :  { %9064 = vmatmul.mubr.msk.f32.vlgmr.msra.gmra.mrb[54].mxu0 %vm859_vm2, %v11609_v22  ;;  %9119 = vmatmul.mubr.msk.f32.vlgmr.msra.gmra.mrb[62].mxu1 %vm859_vm2, %v11609_v22 }
 0xc29   :  { %9731 = vmatpush3.bf16.msra.mxu0 %v11352_v27  ;;  %9085 = vmatprep.mubr.msk.f32.mxu0 %vm10580_vm0, %v10581_v1 }
 0xc2a   :  { %9732 = vmatprep.subr.bf16.mxu0 %v10579_v0  ;;  %9761 = vmatpush3.bf16.msra.mxu1 %v11398_v55 }
 0xc2b   :  { %9762 = vmatprep.subr.bf16.mxu1 %v10579_v0  ;;  %9140 = vmatprep.mubr.msk.f32.mxu1 %vm10580_vm0, %v10581_v1 }
 0xc2d   :  { %9734 = vmatpush3.bf16.msra.mxu0 %v11363_v3 }
 0xc2e   :  { %9741 = vmatprep.subr.bf16.mxu0 %v10579_v0  ;;  %9764 = vmatpush3.bf16.msra.mxu1 %v11410_v46 }
 0xc2f   :  { %9771 = vmatprep.subr.bf16.mxu1 %v10579_v0 }
 0xc30   :  { %9086 = vmatmul.mubr.msk.f32.vlgmr.msra.gmra.mrb[56].mxu0 %vm859_vm2, %v11551_v23 }
 0xc31   :  { %9743 = vmatpush3.bf16.msra.mxu0 %v11373_v35  ;;  %9107 = vmatprep.mubr.msk.f32.mxu0 %vm10580_vm0, %v10581_v1 }
 0xc32   :  { %9744 = vmatprep.subr.bf16.mxu0 %v10579_v0 }
 0xc35   :  { %9746 = vmatpush3.bf16.msra.mxu0 %v11381_v37  ;;  %v5256_v37 = vld [vmem:[#allocation3 + $0x28] sm:$0xff] }
 0xc36   :  { %9753 = vmatprep.subr.bf16.mxu0 %v10579_v0  ;;  %v5411_v55 = vadd.f32 %v5256_v37, %v11028_v13 }
 0xc38   :  { %9108 = vmatmul.mubr.msk.f32.vlgmr.msra.gmra.mrb[58].mxu0 %vm859_vm2, %v11609_v22 }
 0xc39   :  { %9755 = vmatpush3.bf16.msra.mxu0 %v11395_v51  ;;  %9129 = vmatprep.mubr.msk.f32.mxu0 %vm10580_vm0, %v10581_v1 }
 0xc3a   :  { %9756 = vmatprep.subr.bf16.mxu0 %v10579_v0 }
 0xc3d   :  { %9758 = vmatpush3.bf16.msra.mxu0 %v11407_v38 }
 0xc3e   :  { %9765 = vmatprep.subr.bf16.mxu0 %v10579_v0 }
 0xcfb   :  { %v5249_v27 = vpop.f32.mrb[54].mxu0 }
 0xcfc   :  { %v5250_v3 = vadd.f32 %v5249_v27, %v11168_v29  ;;  %v9065_v35 = vpop.f32.mrb[55].mxu0 }
 0xcfe   :  { %5254 = vst [vmem:[#allocation29 + $0x20] sm:$0xff] %v5250_v3 }
 0xd03   :  { %v5402_v46 = vpop.f32.mrb[56].mxu0 }
 0xd04   :  { %v5497_v9 = vadd.f32 %v5411_v55, %v5402_v46  ;;  %v9087_v51 = vpop.f32.mrb[57].mxu0 }
 0xd06   :  { %v7936_v31 = vmul.f32 -1.442695, %v5497_v9 }
 0xd08   :  { %10106 = vpow2.f32 %v7936_v31 }
 0xd12   :  { %v10107_v30 = vpop.eup %10106 }
 0xd13   :  { %v5501_v32 = vadd.f32 1.0, %v10107_v30 }
 0xd15   :  { %10108 = vrcp.f32 %v5501_v32 }
 0xd16   :  { %10110 = vtanh.f32 %v5505_v56 }
 0xd1f   :  { %v10109_v38 = vpop.eup %10108 }
 0xd20   :  { %v5507_v36 = vsub.f32 1.0, %v10109_v38  ;;  %v10111_v42 = vpop.eup %10110  ;;  %v5509_v4 = vmul.f32 %v10109_v38, %v11551_v23  ;;  %v6090_v23 = vld [vmem:[%s11989_s27 + $0x8] sm:$0xff] }
 0xd22   :  { %v5508_v10 = vmul.f32 %v10111_v42, %v5507_v36 }
 0xd24   :  { %v11646_v34 = vadd.f32 %v5509_v4, %v5508_v10  ;;  %v6088_v10 = vld [vmem:[#allocation4 + $0x30] sm:$0xff]  ;;  %v6163_v4 = vld [vmem:[%s11991_s10] sm:$0xff] }
 0xd26   :  { %9130 = vmatmul.mubr.msk.f32.vlgmr.msra.gmra.mrb[58].mxu0 %vm859_vm2, %v11646_v34  ;;  %9141 = vmatmul.mubr.msk.f32.vlgmr.msra.gmra.mrb[62].mxu1 %vm859_vm2, %v11646_v34 }
 0xd27   :  { %9767 = vmatpush3.bf16.msra.mxu0 %v11423_v5  ;;  %9773 = vmatpush3.bf16.msra.mxu1 %v11425_v39  ;;  %v11664_v5 = vpack.c.bf16 %v6090_v23, %v6089_v33  ;;  %v6091_v39 = vld [vmem:[%s11989_s27 + $0x10] sm:$0xff]  ;;  %v6164_v33 = vld [vmem:[%s11991_s10 + $0x8] sm:$0xff] }
 0xd28   :  { %9768 = vmatprep.subr.bf16.mxu0 %v10579_v0  ;;  %9774 = vmatprep.subr.bf16.mxu1 %v10579_v0 }
 0xd29   :  { %9151 = vmatprep.mubr.msk.f32.mxu0 %vm10580_vm0, %v10581_v1  ;;  %9162 = vmatprep.mubr.msk.f32.mxu1 %vm10580_vm0, %v10581_v1 }
 0xd2b   :  { %9770 = vmatpush3.bf16.msra.mxu0 %v11439_v2  ;;  %9776 = vmatpush3.bf16.msra.mxu1 %v11441_v12  ;;  %v11675_v2 = vpack.c.bf16 %v6092_v43, %v6091_v39  ;;  %v6237_v12 = vld [vmem:[%s11990_s7] sm:$0xff] }
 0xd2c   :  { %9783 = vmatprep.subr.bf16.mxu1 %v10579_v0  ;;  %9777 = vmatprep.subr.bf16.mxu0 %v10579_v0  ;;  %v11687_v53 = vpack.c.bf16 %v6238_v8, %v6237_v12  ;;  %v6243_v12 = vadd.f32 %v6088_v10, %v11034_v25 }
 0xd2e   :  { %9152 = vmatmul.mubr.msk.f32.vlgmr.msra.gmra.mrb[60].mxu0 %vm859_vm2, %v11646_v34  ;;  %9163 = vmatmul.mubr.msk.f32.vlgmr.msra.gmra.mrb[64].mxu1 %vm859_vm2, %v11609_v22 }
 0xd2f   :  { %9785 = vmatpush3.bf16.msra.mxu1 %v11664_v5  ;;  %9184 = vmatprep.mubr.msk.f32.mxu1 %vm10580_vm0, %v10581_v1 }
 0xd30   :  { %9786 = vmatprep.subr.bf16.mxu1 %v10579_v0  ;;  %9779 = vmatpush3.bf16.msra.mxu0 %v11483_v50  ;;  %v11697_v50 = vpack.c.bf16 %v6240_v63, %v6239_v14  ;;  %v11730_v14 = vpack.c.bf16 %v6164_v33, %v6163_v4 }
 0xd31   :  { %9780 = vmatprep.subr.bf16.mxu0 %v10579_v0  ;;  %9173 = vmatprep.mubr.msk.f32.mxu0 %vm10580_vm0, %v10581_v1 }
 0xd33   :  { %9788 = vmatpush3.bf16.msra.mxu1 %v11675_v2 }
 0xd34   :  { %9795 = vmatprep.subr.bf16.mxu1 %v10579_v0  ;;  %9782 = vmatpush3.bf16.msra.mxu0 %v11489_v7  ;;  %v6428_v7 = vld [vmem:[%s11992_s13] sm:$0xff] }
 0xd35   :  { %9789 = vmatprep.subr.bf16.mxu0 %v10579_v0  ;;  %v11710_v28 = vpack.c.bf16 %v6429_v61, %v6428_v7  ;;  %v6165_v7 = vld [vmem:[%s11991_s10 + $0x10] sm:$0xff]  ;;  %v6166_v61 = vld [vmem:[%s11991_s10 + $0x18] sm:$0xff] }
 0xd36   :  { %9185 = vmatmul.mubr.msk.f32.vlgmr.msra.gmra.mrb[66].mxu1 %vm859_vm2, %v11646_v34 }
 0xd37   :  { %9797 = vmatpush3.bf16.msra.mxu1 %v11687_v53  ;;  %9206 = vmatprep.mubr.msk.f32.mxu1 %vm10580_vm0, %v10581_v1 }
 0xd38   :  { %9798 = vmatprep.subr.bf16.mxu1 %v10579_v0 }
 0xd3b   :  { %9800 = vmatpush3.bf16.msra.mxu1 %v11697_v50 }
 0xd3c   :  { %9807 = vmatprep.subr.bf16.mxu1 %v10579_v0 }
 0xd3e   :  { %9207 = vmatmul.mubr.msk.f32.vlgmr.msra.gmra.mrb[68].mxu1 %vm859_vm2, %v11646_v34 }
 0xd3f   :  { %9228 = vmatprep.mubr.msk.f32.mxu1 %vm10580_vm0, %v10581_v1  ;;  %9809 = vmatpush3.bf16.msra.mxu1 %v11710_v28 }
 0xd40   :  { %9810 = vmatprep.subr.bf16.mxu1 %v10579_v0 }
 0xd43   :  { %9812 = vmatpush3.bf16.msra.mxu1 %v11716_v57 }
 0xd44   :  { %9819 = vmatprep.subr.bf16.mxu1 %v10579_v0 }
 0xdf9   :  { %v5751_v24 = vpop.f32.mrb[58].mxu0  ;;  %v5828_v45 = vpop.f32.mrb[62].mxu1 }
 0xdfa   :  { %v5752_v11 = vadd.f32 %v11494_v40, %v5751_v24  ;;  %v9131_v54 = vpop.f32.mrb[59].mxu0  ;;  %v9142_v15 = vpop.f32.mrb[63].mxu1  ;;  %v5829_v18 = vadd.f32 %v11498_v58, %v5828_v45  ;;  %v6356_v45 = vld [vmem:[%s11993_s11 + $0x10] sm:$0xff] }
 0xdfb   :  { %v6342_v15 = vld [vmem:[%s11994_s17] sm:$0xff] }
 0xdfc   :  { %v7947_v52 = vmul.f32 -1.442695, %v5752_v11  ;;  %v7948_v19 = vmul.f32 -1.442695, %v5829_v18  ;;  %v6357_v11 = vld [vmem:[%s11993_s11 + $0x18] sm:$0xff]  ;;  %v6346_v18 = vld [vmem:[%s11995_s21] sm:$0xff] }
 0xdfd   :  { %v11759_v54 = vpack.c.bf16 %v6357_v11, %v6356_v45  ;;  %v11876_v45 = vld [vmem:[%s11999_s16] ss:$0 sm:$0xff] }
 0xdfe   :  { %10112 = vpow2.f32 %v7947_v52  ;;  %v6343_v52 = vld [vmem:[%s11994_s17 + $0x8] sm:$0xff] }
 0xdff   :  { %10114 = vpow2.f32 %v7948_v19  ;;  %v11773_v19 = vpack.c.bf16 %v6343_v52, %v6342_v15 }
 0xe01   :  { %v5905_v20 = vpop.f32.mrb[60].mxu0  ;;  %v5982_v47 = vpop.f32.mrb[64].mxu1 }
 0xe02   :  { %v9153_v49 = vpop.f32.mrb[61].mxu0  ;;  %v9164_v62 = vpop.f32.mrb[65].mxu1  ;;  %v5983_v46 = vadd.f32 %v11503_v17, %v5982_v47  ;;  %v5906_v51 = vadd.f32 %v11505_v21, %v5905_v20  ;;  %v6347_v20 = vld [vmem:[%s11995_s21 + $0x8] sm:$0xff] }
 0xe03   :  { %v11776_v47 = vpack.c.bf16 %v6347_v20, %v6346_v18  ;;  %v6344_v49 = vld [vmem:[%s11994_s17 + $0x10] sm:$0xff]  ;;  %v6345_v62 = vld [vmem:[%s11994_s17 + $0x18] sm:$0xff] }
 0xe08   :  { %v10113_v60 = vpop.eup %10112 }
 0xe09   :  { %v5990_v6 = vadd.f32 1.0, %v10113_v60  ;;  %v6159_v56 = vpop.f32.mrb[66].mxu1  ;;  %v10115_v35 = vpop.eup %10114  ;;  %v11785_v60 = vpack.c.bf16 %v6345_v62, %v6344_v49 }
 0xe0a   :  { %v6321_v27 = vadd.f32 %v6241_v26, %v6159_v56  ;;  %v9186_v40 = vpop.f32.mrb[67].mxu1  ;;  %v5997_v37 = vadd.f32 1.0, %v10115_v35  ;;  %v6349_v26 = vld [vmem:[%s11995_s21 + $0x18] sm:$0xff] }
 0xe0b   :  { %10116 = vrcp.f32 %v5990_v6  ;;  %v11788_v6 = vpack.c.bf16 %v6349_v26, %v6348_v44 }
 0xe0c   :  { %v7954_v3 = vmul.f32 -1.442695, %v6321_v27 }
 0xe0e   :  { %10118 = vpow2.f32 %v7954_v3  ;;  %v6087_v3 = vld [vmem:[#allocation3 + $0x30] sm:$0xff] }
 0xe0f   :  { %10120 = vrcp.f32 %v5997_v37  ;;  %v6242_v35 = vadd.f32 %v6087_v3, %v11028_v13 }
 0xe11   :  { %v6317_v58 = vpop.f32.mrb[68].mxu1 }
 0xe12   :  { %v9208_v55 = vpop.f32.mrb[69].mxu1  ;;  %v6318_v17 = vadd.f32 %v11509_v41, %v6317_v58  ;;  %v11741_v41 = vpack.c.bf16 %v6166_v61, %v6165_v7 }
 0xe15   :  { %v10117_v9 = vpop.eup %10116 }
 0xe16   :  { %v6000_v31 = vmul.f32 %v10117_v9, %v5983_v46 }
 0xe18   :  { %v10119_v30 = vpop.eup %10118  ;;  %v6001_v32 = vadd.f32 %v6000_v31, %v5906_v51 }
 0xe19   :  { %v6325_v38 = vadd.f32 1.0, %v10119_v30  ;;  %v10121_v36 = vpop.eup %10120  ;;  %v6350_v30 = vld [vmem:[%s11996_s25] sm:$0xff] }
 0xe1a   :  { %10122 = vtanh.f32 %v6001_v32  ;;  %v6003_v42 = vsub.f32 1.0, %v10121_v36  ;;  %v6005_v21 = vmul.f32 %v10121_v36, %v11609_v22  ;;  %v6354_v22 = vld [vmem:[%s11993_s11] sm:$0xff] }
 0xe1b   :  { %10124 = vrcp.f32 %v6325_v38  ;;  %v11751_v24 = vpack.c.bf16 %v6355_v48, %v6354_v22  ;;  %v6351_v38 = vld [vmem:[%s11996_s25 + $0x8] sm:$0xff]  ;;  %v6502_v36 = vld [vmem:[%s11997_s6] sm:$0xff] }
 0xe24   :  { %v10123_v23 = vpop.eup %10122 }
 0xe25   :  { %v10125_v39 = vpop.eup %10124  ;;  %v6004_v43 = vmul.f32 %v10123_v23, %v6003_v42  ;;  %v6503_v42 = vld [vmem:[%s11997_s6 + $0x8] sm:$0xff]  ;;  %v11801_v23 = vpack.c.bf16 %v6351_v38, %v6350_v30 }
 0xe26   :  { %v6335_v8 = vmul.f32 %v10125_v39, %v6318_v17  ;;  %v11803_v17 = vpack.c.bf16 %v6503_v42, %v6502_v36  ;;  %v6352_v39 = vld [vmem:[%s11996_s25 + $0x10] sm:$0xff] }
 0xe27   :  { %v11732_v63 = vadd.f32 %v6005_v21, %v6004_v43  ;;  %v6353_v21 = vld [vmem:[%s11996_s25 + $0x18] sm:$0xff] }
 0xe28   :  { %v6336_v16 = vadd.f32 %v6335_v8, %v6243_v12  ;;  %v6504_v12 = vld [vmem:[%s11997_s6 + $0x10] sm:$0xff]  ;;  %v6505_v8 = vld [vmem:[%s11997_s6 + $0x18] sm:$0xff] }
 0xe29   :  { %9174 = vmatmul.mubr.msk.f32.vlgmr.msra.gmra.mrb[62].mxu0 %vm859_vm2, %v11732_v63  ;;  %9229 = vmatmul.mubr.msk.f32.vlgmr.msra.gmra.mrb[70].mxu1 %vm859_vm2, %v11732_v63  ;;  %v11819_v7 = vpack.c.bf16 %v6505_v8, %v6504_v12  ;;  %v6919_v8 = vld [vmem:[#allocation4 + $0x38] sm:$0xff] }
 0xe2a   :  { %9791 = vmatpush3.bf16.msra.mxu0 %v11730_v14  ;;  %9195 = vmatprep.mubr.msk.f32.mxu0 %vm10580_vm0, %v10581_v1 }
 0xe2b   :  { %9792 = vmatprep.subr.bf16.mxu0 %v10579_v0  ;;  %9250 = vmatprep.mubr.msk.f32.mxu1 %vm10580_vm0, %v10581_v1 }
 0xe2c   :  { %9821 = vmatpush3.bf16.msra.mxu1 %v11776_v47 }
 0xe2d   :  { %9822 = vmatprep.subr.bf16.mxu1 %v10579_v0 }
 0xe2e   :  { %9794 = vmatpush3.bf16.msra.mxu0 %v11741_v41 }
 0xe2f   :  { %9801 = vmatprep.subr.bf16.mxu0 %v10579_v0 }
 0xe30   :  { %9824 = vmatpush3.bf16.msra.mxu1 %v11788_v6 }
 0xe31   :  { %9196 = vmatmul.mubr.msk.f32.vlgmr.msra.gmra.mrb[64].mxu0 %vm859_vm2, %v11646_v34  ;;  %9831 = vmatprep.subr.bf16.mxu1 %v10579_v0 }
 0xe32   :  { %9803 = vmatpush3.bf16.msra.mxu0 %v11751_v24  ;;  %9217 = vmatprep.mubr.msk.f32.mxu0 %vm10580_vm0, %v10581_v1 }
 0xe33   :  { %9804 = vmatprep.subr.bf16.mxu0 %v10579_v0 }
 0xe36   :  { %9806 = vmatpush3.bf16.msra.mxu0 %v11759_v54 }
 0xe37   :  { %9813 = vmatprep.subr.bf16.mxu0 %v10579_v0 }
 0xe39   :  { %9218 = vmatmul.mubr.msk.f32.vlgmr.msra.gmra.mrb[66].mxu0 %vm859_vm2, %v11732_v63 }
 0xe3a   :  { %9239 = vmatprep.mubr.msk.f32.mxu0 %vm10580_vm0, %v10581_v1  ;;  %9815 = vmatpush3.bf16.msra.mxu0 %v11773_v19 }
 0xe3b   :  { %9816 = vmatprep.subr.bf16.mxu0 %v10579_v0 }
 0xe3e   :  { %9818 = vmatpush3.bf16.msra.mxu0 %v11785_v60 }
 0xe3f   :  { %9825 = vmatprep.subr.bf16.mxu0 %v10579_v0 }
 0xefc   :  { %v6080_v56 = vpop.f32.mrb[62].mxu0 }
 0xefd   :  { %v6081_v27 = vadd.f32 %v6080_v56, %v11168_v29  ;;  %v9175_v40 = vpop.f32.mrb[63].mxu0  ;;  %v6917_v56 = vld [vmem:[#allocation2 + $0x38] sm:$0xff] }
 0xefe   :  { %v7072_v40 = vadd.f32 %v6917_v56, %v11024_v59 }
 0xeff   :  { %6085 = vst [vmem:[#allocation29 + $0x28] sm:$0xff] %v6081_v27 }
 0xf04   :  { %v6233_v58 = vpop.f32.mrb[64].mxu0 }
 0xf05   :  { %v6328_v37 = vadd.f32 %v6242_v35, %v6233_v58  ;;  %v9197_v55 = vpop.f32.mrb[65].mxu0 }
 0xf07   :  { %v7955_v46 = vmul.f32 -1.442695, %v6328_v37 }
 0xf09   :  { %10126 = vpow2.f32 %v7955_v46 }
 0xf13   :  { %v10127_v9 = vpop.eup %10126 }
 0xf14   :  { %v6332_v51 = vadd.f32 1.0, %v10127_v9  ;;  %v11881_v9 = vld [vmem:[%s12000_s20] ss:$0 sm:$0xff] }
 0xf16   :  { %10128 = vrcp.f32 %v6332_v51 }
 0xf17   :  { %10130 = vtanh.f32 %v6336_v16 }
 0xf20   :  { %v10129_v31 = vpop.eup %10128 }
 0xf21   :  { %v6338_v32 = vsub.f32 1.0, %v10129_v31  ;;  %v10131_v10 = vpop.eup %10130  ;;  %v6340_v33 = vmul.f32 %v10129_v31, %v11646_v34  ;;  %v11817_v34 = vpack.c.bf16 %v6353_v21, %v6352_v39  ;;  %v7971_v21 = vld [vmem:[#allocation25] ss:$0 sm:$0xff] }
 0xf23   :  { %v6339_v4 = vmul.f32 %v10131_v10, %v6338_v32  ;;  %v11883_v32 = vld [vmem:[#allocation26] ss:$0 sm:$0xff] }
 0xf25   :  { %v11806_v43 = vadd.f32 %v6340_v33, %v6339_v4 }
 0xf27   :  { %9240 = vmatmul.mubr.msk.f32.vlgmr.msra.gmra.mrb[66].mxu0 %vm859_vm2, %v11806_v43  ;;  %9251 = vmatmul.mubr.msk.f32.vlgmr.msra.gmra.mrb[70].mxu1 %vm859_vm2, %v11806_v43 }
 0xf28   :  { %9827 = vmatpush3.bf16.msra.mxu0 %v11801_v23  ;;  %9833 = vmatpush3.bf16.msra.mxu1 %v11803_v17 }
 0xf29   :  { %9828 = vmatprep.subr.bf16.mxu0 %v10579_v0  ;;  %9834 = vmatprep.subr.bf16.mxu1 %v10579_v0 }
 0xf2a   :  { %9261 = vmatprep.mubr.msk.f32.mxu0 %vm10580_vm0, %v10581_v1  ;;  %9272 = vmatprep.mubr.msk.f32.mxu1 %vm10580_vm0, %v10581_v1 }
 0xf2c   :  { %9830 = vmatpush3.bf16.msra.mxu0 %v11817_v34  ;;  %9836 = vmatpush3.bf16.msra.mxu1 %v11819_v7 }
 0xf2d   :  { %9843 = vmatprep.subr.bf16.mxu1 %v10579_v0  ;;  %9837 = vmatprep.subr.bf16.mxu0 %v10579_v0 }
 0xf2f   :  { %9262 = vmatmul.mubr.msk.f32.vlgmr.msra.gmra.mrb[68].mxu0 %vm859_vm2, %v11806_v43  ;;  %9273 = vmatmul.mubr.msk.f32.vlgmr.msra.gmra.mrb[72].mxu1 %vm859_vm2, %v11732_v63 }
 0xf30   :  { %9845 = vmatpush3.bf16.msra.mxu1 %v11664_v5  ;;  %9294 = vmatprep.mubr.msk.f32.mxu1 %vm10580_vm0, %v10581_v1  ;;  %v6838_v5 = vld [vmem:[%s10726_s30] sm:$0xff] }
 0xf31   :  { %9846 = vmatprep.subr.bf16.mxu1 %v10579_v0  ;;  %9283 = vmatprep.mubr.msk.f32.mxu0 %vm10580_vm0, %v10581_v1 }
 0xf34   :  { %9848 = vmatpush3.bf16.msra.mxu1 %v11675_v2  ;;  %v6839_v2 = vld [vmem:[%s10726_s30 + $0x8] sm:$0xff] }
 0xf35   :  { %9855 = vmatprep.subr.bf16.mxu1 %v10579_v0 }
 0xf37   :  { %9295 = vmatmul.mubr.msk.f32.vlgmr.msra.gmra.mrb[74].mxu1 %vm859_vm2, %v11806_v43 }
 0xf38   :  { %9857 = vmatpush3.bf16.msra.mxu1 %v11687_v53  ;;  %9316 = vmatprep.mubr.msk.f32.mxu1 %vm10580_vm0, %v10581_v1  ;;  %v11861_v53 = vpack.c.bf16 %v6839_v2, %v6838_v5 }
 0xf39   :  { %9858 = vmatprep.subr.bf16.mxu1 %v10579_v0 }
 0xf3a   :  { %9839 = vmatpush3.bf16.msra.mxu0 %v11861_v53 }
 0xf3b   :  { %9840 = vmatprep.subr.bf16.mxu0 %v10579_v0 }
 0xf3c   :  { %9860 = vmatpush3.bf16.msra.mxu1 %v11697_v50  ;;  %v6840_v50 = vld [vmem:[%s10726_s30 + $0x10] sm:$0xff] }
 0xf3d   :  { %9867 = vmatprep.subr.bf16.mxu1 %v10579_v0 }
 0xf3f   :  { %9317 = vmatmul.mubr.msk.f32.vlgmr.msra.gmra.mrb[76].mxu1 %vm859_vm2, %v11806_v43 }
 0xf40   :  { %9869 = vmatpush3.bf16.msra.mxu1 %v11710_v28  ;;  %9338 = vmatprep.mubr.msk.f32.mxu1 %vm10580_vm0, %v10581_v1  ;;  %v6841_v28 = vld [vmem:[%s10726_s30 + $0x18] sm:$0xff]  ;;  %s7753_s30 = sshll.u32 %s10582_s5, 4  ;;  %s7754_s30 = int_to_ptr.vmem [resolvable:$true] %s7753_s30 }
 0xf41   :  { %9870 = vmatprep.subr.bf16.mxu1 %v10579_v0  ;;  %v11867_v61 = vpack.c.bf16 %v6841_v28, %v6840_v50  ;;  %s10492_s18 = scalar_lea.vmem %s7754_s30, 1024  ;;  %p10497_p9 = scmp.lt.s32.totalorder %s7754_s30, %s7754_s30 }
 0xf42   :  { %p10493_p8 = scmp.ne.s32.totalorder %s7754_s30, %s10492_s18  ;;  %p10498_p10 = scmp.lt.s32.totalorder %s10492_s18, %s10492_s18 }
 0xf43   :  { %9842 = vmatpush3.bf16.msra.mxu0 %v11867_v61 }
 0xf44   :  { %9872 = vmatpush3.bf16.msra.mxu1 %v11716_v57  ;;  %9849 = vmatprep.subr.bf16.mxu0 %v10579_v0  ;;  %v11872_v57 = vld [vmem:[%s11998_s15] ss:$0 sm:$0xff]  ;;  %p10499_p11 = por %p10498_p10, %p10497_p9 }
 0xf45   :  { %9879 = vmatprep.subr.bf16.mxu1 %v10579_v0 }
 0xf46   :  { %p10500_p12 = pnand %p10499_p11, %p10493_p8 }
 0xffa   :  { %v6582_v16 = vpop.f32.mrb[66].mxu0  ;;  %v6659_v22 = vpop.f32.mrb[70].mxu1 }
 0xffb   :  { %v6583_v48 = vadd.f32 %v11872_v57, %v6582_v16  ;;  %v9241_v11 = vpop.f32.mrb[67].mxu0  ;;  %v9252_v15 = vpop.f32.mrb[71].mxu1  ;;  %v6660_v18 = vadd.f32 %v11876_v45, %v6659_v22  ;;  %v7074_v22 = vadd.f32 %v6919_v8, %v11034_v25 }
 0xffd   :  { %v7966_v52 = vmul.f32 -1.442695, %v6583_v48  ;;  %v7967_v20 = vmul.f32 -1.442695, %v6660_v18 }
 0xfff   :  { %10132 = vpow2.f32 %v7966_v52 }
0x1000   :  { %10134 = vpow2.f32 %v7967_v20 }
0x1002   :  { %v6736_v49 = vpop.f32.mrb[68].mxu0  ;;  %v6813_v62 = vpop.f32.mrb[72].mxu1 }
0x1003   :  { %v9263_v44 = vpop.f32.mrb[69].mxu0  ;;  %v9274_v26 = vpop.f32.mrb[73].mxu1  ;;  %v6814_v38 = vadd.f32 %v11881_v9, %v6813_v62  ;;  %v6737_v59 = vadd.f32 %v11883_v32, %v6736_v49 }
0x1009   :  { %v10133_v27 = vpop.eup %10132 }
0x100a   :  { %v6821_v3 = vadd.f32 1.0, %v10133_v27  ;;  %v6990_v35 = vpop.f32.mrb[74].mxu1  ;;  %v10135_v46 = vpop.eup %10134 }
0x100b   :  { %v7152_v58 = vadd.f32 %v7072_v40, %v6990_v35  ;;  %v9296_v37 = vpop.f32.mrb[75].mxu1  ;;  %v6828_v31 = vadd.f32 1.0, %v10135_v46 }
0x100c   :  { %10136 = vrcp.f32 %v6821_v3 }
0x100d   :  { %v7973_v55 = vmul.f32 -1.442695, %v7152_v58 }
0x100f   :  { %10138 = vpow2.f32 %v7973_v55 }
0x1010   :  { %10140 = vrcp.f32 %v6828_v31 }
0x1012   :  { %v7148_v51 = vpop.f32.mrb[76].mxu1 }
0x1013   :  { %v9318_v30 = vpop.f32.mrb[77].mxu1  ;;  %v7149_v2 = vadd.f32 %v7971_v21, %v7148_v51 }
0x1016   :  { %v10137_v36 = vpop.eup %10136 }
0x1017   :  { %v6831_v42 = vmul.f32 %v10137_v36, %v6814_v38 }
0x1019   :  { %v10139_v10 = vpop.eup %10138  ;;  %v6832_v4 = vadd.f32 %v6831_v42, %v6737_v59 }
0x101a   :  { %v7156_v33 = vadd.f32 1.0, %v10139_v10  ;;  %v10141_v39 = vpop.eup %10140 }
0x101b   :  { %10142 = vtanh.f32 %v6832_v4  ;;  %v6834_v12 = vsub.f32 1.0, %v10141_v39  ;;  %v6836_v16 = vmul.f32 %v10141_v39, %v11732_v63 }
0x101c   :  { %10144 = vrcp.f32 %v7156_v33 }
0x1025   :  { %v10143_v5 = vpop.eup %10142 }
0x1026   :  { %v10145_v50 = vpop.eup %10144  ;;  %v6835_v28 = vmul.f32 %v10143_v5, %v6834_v12 }
0x1027   :  { %v7166_v48 = vmul.f32 %v10145_v50, %v7149_v2 }
0x1028   :  { %v11889_v11 = vadd.f32 %v6836_v16, %v6835_v28 }
0x1029   :  { %v7167_v15 = vadd.f32 %v7166_v48, %v7074_v22 }
0x102a   :  { %9284 = vmatmul.mubr.msk.f32.vlgmr.msra.gmra.mrb[70].mxu0 %vm859_vm2, %v11889_v11  ;;  %9339 = vmatmul.mubr.msk.f32.vlgmr.msra.gmra.mrb[78].mxu1 %vm859_vm2, %v11889_v11 }
0x102b   :  { %9851 = vmatpush3.bf16.msra.mxu0 %v11730_v14  ;;  %9305 = vmatprep.mubr.msk.f32.mxu0 %vm10580_vm0, %v10581_v1 }
0x102c   :  { %9852 = vmatprep.subr.bf16.mxu0 %v10579_v0  ;;  %9881 = vmatpush3.bf16.msra.mxu1 %v11776_v47 }
0x102d   :  { %9882 = vmatprep.subr.bf16.mxu1 %v10579_v0  ;;  %9360 = vmatprep.mubr.msk.f32.mxu1 %vm10580_vm0, %v10581_v1 }
0x102f   :  { %9854 = vmatpush3.bf16.msra.mxu0 %v11741_v41  ;;  %v6918_v41 = vld [vmem:[#allocation3 + $0x38] sm:$0xff] }
0x1030   :  { %9861 = vmatprep.subr.bf16.mxu0 %v10579_v0  ;;  %9884 = vmatpush3.bf16.msra.mxu1 %v11788_v6 }
0x1031   :  { %9891 = vmatprep.subr.bf16.mxu1 %v10579_v0 }
0x1032   :  { %9306 = vmatmul.mubr.msk.f32.vlgmr.msra.gmra.mrb[72].mxu0 %vm859_vm2, %v11806_v43 }
0x1033   :  { %9863 = vmatpush3.bf16.msra.mxu0 %v11751_v24  ;;  %9327 = vmatprep.mubr.msk.f32.mxu0 %vm10580_vm0, %v10581_v1  ;;  %v7073_v24 = vadd.f32 %v6918_v41, %v11028_v13 }
0x1034   :  { %9864 = vmatprep.subr.bf16.mxu0 %v10579_v0 }
0x1037   :  { %9866 = vmatpush3.bf16.msra.mxu0 %v11759_v54 }
0x1038   :  { %9873 = vmatprep.subr.bf16.mxu0 %v10579_v0 }
0x103a   :  { %9328 = vmatmul.mubr.msk.f32.vlgmr.msra.gmra.mrb[74].mxu0 %vm859_vm2, %v11889_v11 }
0x103b   :  { %9875 = vmatpush3.bf16.msra.mxu0 %v11773_v19  ;;  %9349 = vmatprep.mubr.msk.f32.mxu0 %vm10580_vm0, %v10581_v1 }
0x103c   :  { %9876 = vmatprep.subr.bf16.mxu0 %v10579_v0 }
0x103f   :  { %9878 = vmatpush3.bf16.msra.mxu0 %v11785_v60 }
0x1040   :  { %9885 = vmatprep.subr.bf16.mxu0 %v10579_v0 }
0x10fd   :  { %v6911_v25 = vpop.f32.mrb[70].mxu0 }
0x10fe   :  { %v6912_v14 = vadd.f32 %v6911_v25, %v11168_v29  ;;  %v9285_v63 = vpop.f32.mrb[71].mxu0 }
0x1100   :  { %6916 = vst [vmem:[#allocation29 + $0x30] sm:$0xff] %v6912_v14 }
0x1105   :  { %v7064_v54 = vpop.f32.mrb[72].mxu0 }
0x1106   :  { %v7159_v47 = vadd.f32 %v7073_v24, %v7064_v54  ;;  %v9307_v19 = vpop.f32.mrb[73].mxu0 }
0x1108   :  { %v7974_v6 = vmul.f32 -1.442695, %v7159_v47 }
0x110a   :  { %10146 = vpow2.f32 %v7974_v6 }
0x1114   :  { %v10147_v52 = vpop.eup %10146 }
0x1115   :  { %v7163_v18 = vadd.f32 1.0, %v10147_v52 }
0x1117   :  { %10148 = vrcp.f32 %v7163_v18 }
0x1118   :  { %10150 = vtanh.f32 %v7167_v15 }
0x1121   :  { %v10149_v60 = vpop.eup %10148 }
0x1122   :  { %v7169_v20 = vsub.f32 1.0, %v10149_v60  ;;  %v10151_v49 = vpop.eup %10150  ;;  %v7171_v44 = vmul.f32 %v10149_v60, %v11806_v43 }
0x1124   :  { %v7170_v62 = vmul.f32 %v10151_v49, %v7169_v20 }
0x1126   :  { %v7172_v26 = vadd.f32 %v7171_v44, %v7170_v62 }
0x1128   :  { %9350 = vmatmul.mubr.msk.f32.vlgmr.msra.gmra.mrb[74].mxu0 %vm859_vm2, %v7172_v26  ;;  %9361 = vmatmul.mubr.msk.f32.vlgmr.msra.gmra.mrb[78].mxu1 %vm859_vm2, %v7172_v26 }
0x1129   :  { %9887 = vmatpush3.bf16.msra.mxu0 %v11801_v23  ;;  %9893 = vmatpush3.bf16.msra.mxu1 %v11803_v17 }
0x112a   :  { %9888 = vmatprep.subr.bf16.mxu0 %v10579_v0  ;;  %9894 = vmatprep.subr.bf16.mxu1 %v10579_v0 }
0x112b   :  { %9371 = vmatprep.mubr.msk.f32.mxu0 %vm10580_vm0, %v10581_v1  ;;  %9382 = vmatprep.mubr.msk.f32.mxu1 %vm10580_vm0, %v10581_v1 }
0x112d   :  { %9890 = vmatpush3.bf16.msra.mxu0 %v11817_v34  ;;  %9896 = vmatpush3.bf16.msra.mxu1 %v11819_v7 }
0x112e   :  { %9897 = vmatprep.subr.bf16.mxu0 %v10579_v0 }
0x1130   :  { %9372 = vmatmul.mubr.msk.f32.vlgmr.msra.gmra.mrb[76].mxu0 %vm859_vm2, %v7172_v26  ;;  %9383 = vmatmul.mubr.msk.f32.vlgmr.msra.gmra.mrb[80].mxu1 %vm859_vm2, %v11889_v11 }
0x1131   :  { %9899 = vmatpush3.bf16.msra.mxu0 %v11861_v53  ;;  %9393 = vmatprep.mubr.msk.f32.mxu0 %vm10580_vm0, %v10581_v1 }
0x1132   :  { %9900 = vmatprep.subr.bf16.mxu0 %v10579_v0 }
0x1135   :  { %9902 = vmatpush3.bf16.msra.mxu0 %v11867_v61 }
0x11fb   :  { %v7413_v13 = vpop.f32.mrb[74].mxu0  ;;  %v7490_v23 = vpop.f32.mrb[78].mxu1 }
0x11fc   :  { %v7414_v17 = vadd.f32 %v11872_v57, %v7413_v13  ;;  %v9351_v43 = vpop.f32.mrb[75].mxu0  ;;  %v9362_v34 = vpop.f32.mrb[79].mxu1  ;;  %v7491_v56 = vadd.f32 %v11876_v45, %v7490_v23 }
0x11fe   :  { %v7985_v7 = vmul.f32 -1.442695, %v7414_v17  ;;  %v7986_v27 = vmul.f32 -1.442695, %v7491_v56 }
0x1200   :  { %10152 = vpow2.f32 %v7985_v7 }
0x1201   :  { %10154 = vpow2.f32 %v7986_v27 }
0x1203   :  { %v7567_v40 = vpop.f32.mrb[76].mxu0  ;;  %v7644_v53 = vpop.f32.mrb[80].mxu1 }
0x1204   :  { %v9373_v3 = vpop.f32.mrb[77].mxu0  ;;  %v9384_v35 = vpop.f32.mrb[81].mxu1  ;;  %v7645_v37 = vadd.f32 %v11881_v9, %v7644_v53  ;;  %v7568_v55 = vadd.f32 %v11883_v32, %v7567_v40 }
0x120a   :  { %v10153_v1 = vpop.eup %10152 }
0x120b   :  { %v7652_v0 = vadd.f32 1.0, %v10153_v1  ;;  %v10155_v61 = vpop.eup %10154 }
0x120c   :  { %v7659_v58 = vadd.f32 1.0, %v10155_v61 }
0x120d   :  { %10156 = vrcp.f32 %v7652_v0 }
0x120e   :  { %10158 = vrcp.f32 %v7659_v58 }
0x1217   :  { %v10157_v57 = vpop.eup %10156 }
0x1218   :  { %v7662_v46 = vmul.f32 %v10157_v57, %v7645_v37  ;;  %v10159_v51 = vpop.eup %10158 }
0x1219   :  { %v7665_v31 = vsub.f32 1.0, %v10159_v51  ;;  %v7667_v36 = vmul.f32 %v10159_v51, %v11889_v11 }
0x121a   :  { %v7663_v45 = vadd.f32 %v7662_v46, %v7568_v55 }
0x121c   :  { %10160 = vtanh.f32 %v7663_v45 }
0x1226   :  { %v10161_v30 = vpop.eup %10160 }
0x1227   :  { %v7666_v38 = vmul.f32 %v10161_v30, %v7665_v31 }
0x1229   :  { %v7668_v59 = vadd.f32 %v7667_v36, %v7666_v38 }
0x122b   :  { %9394 = vmatmul.mubr.msk.f32.vlgmr.msra.gmra.mrb[78].mxu0 %vm859_vm2, %v7668_v59 }
0x12fe   :  { %v7742_v42 = vpop.f32.mrb[78].mxu0 }
0x12ff   :  { %v7743_v9 = vadd.f32 %v7742_v42, %v11168_v29  ;;  %v9395_v10 = vpop.f32.mrb[79].mxu0 }
0x1301   :  { %7747 = vst [vmem:[#allocation29 + $0x38] sm:$0xff] %v7743_v9 }
0x1302   :  { %10503 = shalt.err (!%p10500_p12)
}
0x1303   :  { %s10504_s3 = scalar_lea.hbm %s10741_s24, 1024 }
0x1304   :  { %p10505_p13 = scmp.ne.s32.totalorder %s10741_s24, %s10504_s3  ;;  %p10508_p0 = scmp.lt.u32.totalorder %s10504_s3, %s10741_s24 }
0x1306   :  { %p10510_p1 = pnand %p10508_p0, %p10505_p13 }
0x1308   :  { %10513 = shalt.err (!%p10510_p1)
}
0x1309   :  { %7759 = dma.vmem_to_hbm [thread:$0]  %s7754_s30, 1024, %s10741_s24, [#allocation7], %s10563_s22, %s10563_s22, %s10564_s23  }
0x130a   :  { %10530 = dma.done.wait [#allocation7], 1024  }
0x130b   :  { %10531 = vsyncadd [#allocation7], 4294966272 }
0x130c   :  { %7763 = vsyncpa [#allocation6], 1 }
0x130d   :  { %7764 = vsyncpa [#allocation9], 1 }
0x130e   :  { %7765 = vsyncpa [#allocation12], 1 }
0x130f   :  { %7766 = vsyncpa [#allocation15], 1 }
0x1310   :  { %7767 = vsyncpa [#allocation18], 1 }
0x1311   :  { %7768 = vsyncpa [#allocation21], 1 }
0x1312   :  { %7769 = vsyncpa [#allocation24], 1 }
0x1313   :  { %7770 = vsyncpa [#allocation27], 1 }
0x1314   :  { %7771 = vsyncpa [#allocation7], 1 }

</bundles_post_ra>
